<compile_context>
chip_gen: v5e
topology: v5e:2x2
jax: 0.10.0
libtpu: 0.0.40
codegen_flags: <defaults>
</compile_context>

<pallas_src>
import math

import jax
import jax.numpy as jnp
from jax.experimental import pallas as pl
from jax.experimental.pallas import tpu as pltpu

# Synthetic configuration implied by Mediator(num_actions=2, num_input=4,
# params=..., fix_input_output=True):
#   params.transformer: d_model=32, nhead=4, num_layers=2, norm=None
#   TransformerEncoderLayer defaults: dim_feedforward=2048, activation=relu,
#       layer_norm_eps=1e-5, batch_first=False, norm_first=False
#       (dropout treated as eval-mode identity)
#   params.mlps: encoder_hidden=32, encoder_output=32,
#                decoder_input=32, decoder_hidden=32
SEQ = 8
BATCH = 2
NUM_INPUT = 4
D_MODEL = 32
NHEAD = 4
HEAD_DIM = D_MODEL // NHEAD
DIM_FF = 2048
NUM_LAYERS = 2
ENC_HIDDEN = 32
DEC_HIDDEN = 32
NUM_ACTIONS = 2
LN_EPS = 1e-5
NROWS = SEQ * BATCH                       # fused row dimension


def _layernorm(z, gamma, beta):
    mu = jnp.mean(z, axis=-1, keepdims=True)
    var = jnp.mean((z - mu) ** 2, axis=-1, keepdims=True)
    return (z - mu) * jax.lax.rsqrt(var + LN_EPS) * gamma + beta


def mediator_kernel(x_ref, ew1_ref, eb1_ref, ew2_ref, eb2_ref,
                    wq_ref, wk_ref, wv_ref, bq_ref, bk_ref, bv_ref,
                    wo_ref, bo_ref, ln1g_ref, ln1b_ref,
                    wf1_ref, bf1_ref, wf2_ref, bf2_ref, ln2g_ref, ln2b_ref,
                    dw1_ref, db1_ref, dw2_ref, db2_ref, gum_ref,
                    act_ref, lp_ref, ent_ref):
    scale = 1.0 / math.sqrt(HEAD_DIM)

    # Static additive mask: row n = s*B + b, so rows with the same (n % B)
    # belong to the same batch element and may attend to each other.
    row_b = jax.lax.broadcasted_iota(jnp.int32, (NROWS, NROWS), 0) % BATCH
    col_b = jax.lax.broadcasted_iota(jnp.int32, (NROWS, NROWS), 1) % BATCH
    attn_bias = jnp.where(row_b == col_b, 0.0, -1e30).astype(jnp.float32)

    x = x_ref[...]                                                # [N, NUM_INPUT]

    # ---- encoder MLP: Linear -> ReLU -> Linear (fused over batch) ----
    h = jnp.dot(x, ew1_ref[...], preferred_element_type=jnp.float32) + eb1_ref[...]
    h = jnp.maximum(h, 0.0)
    h = jnp.dot(h, ew2_ref[...], preferred_element_type=jnp.float32) + eb2_ref[...]  # [N, D]

    # ---- transformer encoder layers (post-norm, ReLU FFN) ----
    for l in range(NUM_LAYERS):                                   # static unroll
        hb = h.astype(jnp.bfloat16)                               # one cast, reused by q/k/v
        attn_acc = jnp.zeros((NROWS, D_MODEL), jnp.float32)
        for hh in range(NHEAD):                                   # static unroll, leading-axis idx
            qh = jnp.dot(hb, wq_ref[l, hh], preferred_element_type=jnp.float32) + bq_ref[l, hh]
            kh = jnp.dot(hb, wk_ref[l, hh], preferred_element_type=jnp.float32) + bk_ref[l, hh]
            vh = jnp.dot(hb, wv_ref[l, hh], preferred_element_type=jnp.float32) + bv_ref[l, hh]
            # q @ k^T without materializing a transpose (contract dim 1 of both)
            sc = jax.lax.dot_general(qh, kh, (((1,), (1,)), ((), ())),
                                     preferred_element_type=jnp.float32)
            sc = sc * scale + attn_bias                           # [N, N], cross-batch masked
            sc = sc - jnp.max(sc, axis=-1, keepdims=True)
            e = jnp.exp(sc)
            attn = e / jnp.sum(e, axis=-1, keepdims=True)
            ctx = jnp.dot(attn, vh, preferred_element_type=jnp.float32)      # [N, HD]
            attn_acc = attn_acc + jnp.dot(ctx.astype(jnp.bfloat16), wo_ref[l, hh],
                                          preferred_element_type=jnp.float32)
        h = _layernorm(h + attn_acc + bo_ref[l], ln1g_ref[l], ln1b_ref[l])

        ff = jnp.dot(h.astype(jnp.bfloat16), wf1_ref[l],
                     preferred_element_type=jnp.float32) + bf1_ref[l]         # [N, FF]
        ff = jnp.maximum(ff, 0.0)
        ff = jnp.dot(ff.astype(jnp.bfloat16), wf2_ref[l],
                     preferred_element_type=jnp.float32) + bf2_ref[l]         # [N, D]
        h = _layernorm(h + ff, ln2g_ref[l], ln2b_ref[l])

    # ---- decoder MLP -> logits (kept f32 to protect log_prob / entropy) ----
    d1 = jnp.dot(h, dw1_ref[...], preferred_element_type=jnp.float32) + db1_ref[...]
    d1 = jnp.maximum(d1, 0.0)
    logits = jnp.dot(d1, dw2_ref[...], preferred_element_type=jnp.float32) + db2_ref[...]  # [N, A]

    # ---- Categorical: normalize, entropy, Gumbel-max sample, log_prob ----
    m = jnp.max(logits, axis=-1, keepdims=True)
    z = logits - m
    lse = jnp.log(jnp.sum(jnp.exp(z), axis=-1, keepdims=True))
    logp = z - lse                                                # normalized log-probs [N, A]
    p = jnp.exp(logp)
    ent_ref[...] = -jnp.sum(p * logp, axis=-1, keepdims=True)     # [N, 1]

    ids = jax.lax.broadcasted_iota(jnp.int32, (NROWS, NUM_ACTIONS), 1)
    vals = logits + gum_ref[...]                                  # Gumbel-perturbed logits
    mx = jnp.max(vals, axis=-1, keepdims=True)
    action = jnp.min(jnp.where(vals >= mx, ids, NUM_ACTIONS),
                     axis=-1, keepdims=True).astype(jnp.int32)    # [N, 1]
    act_ref[...] = action
    onehot = (ids == action).astype(jnp.float32)
    lp_ref[...] = jnp.sum(logp * onehot, axis=-1, keepdims=True)  # [N, 1]


def init_params(key):
    keys = jax.random.split(key, 24)
    it = iter(keys)

    def w(shape, scale=0.1):
        return (scale * jax.random.normal(next(it), shape)).astype(jnp.float32)

    p = dict(
        # encoder MLP (num_input -> enc_hidden -> d_model), weights stored [in, out]
        ew1=w((NUM_INPUT, ENC_HIDDEN)), eb1=w((1, ENC_HIDDEN)),
        ew2=w((ENC_HIDDEN, D_MODEL)), eb2=w((1, D_MODEL)),
        # self-attention per layer (in_proj split into q/k/v, stored [in, out])
        wq=w((NUM_LAYERS, D_MODEL, D_MODEL)),
        wk=w((NUM_LAYERS, D_MODEL, D_MODEL)),
        wv=w((NUM_LAYERS, D_MODEL, D_MODEL)),
        bq=w((NUM_LAYERS, 1, D_MODEL)),
        bk=w((NUM_LAYERS, 1, D_MODEL)),
        bv=w((NUM_LAYERS, 1, D_MODEL)),
        wo=w((NUM_LAYERS, D_MODEL, D_MODEL)),
        bo=w((NUM_LAYERS, 1, D_MODEL)),
        ln1g=jnp.ones((NUM_LAYERS, 1, D_MODEL), jnp.float32),
        ln1b=jnp.zeros((NUM_LAYERS, 1, D_MODEL), jnp.float32),
        # feed-forward per layer
        wf1=w((NUM_LAYERS, D_MODEL, DIM_FF)),
        bf1=w((NUM_LAYERS, 1, DIM_FF)),
        wf2=w((NUM_LAYERS, DIM_FF, D_MODEL), scale=0.02),
        bf2=w((NUM_LAYERS, 1, D_MODEL)),
        ln2g=jnp.ones((NUM_LAYERS, 1, D_MODEL), jnp.float32),
        ln2b=jnp.zeros((NUM_LAYERS, 1, D_MODEL), jnp.float32),
        # decoder MLP (d_model -> dec_hidden -> num_actions)
        dw1=w((D_MODEL, DEC_HIDDEN)), db1=w((1, DEC_HIDDEN)),
        dw2=w((DEC_HIDDEN, NUM_ACTIONS)), db2=w((1, NUM_ACTIONS)),
    )
    return p


def _split_heads_out(wqkv):
    # [L, D(in), D(out)] -> [L, H, D(in), HD(out)]
    return wqkv.reshape(NUM_LAYERS, D_MODEL, NHEAD, HEAD_DIM).transpose(0, 2, 1, 3)


def _split_heads_bias(b):
    # [L, 1, D] -> [L, H, 1, HD]
    return b.reshape(NUM_LAYERS, 1, NHEAD, HEAD_DIM).transpose(0, 2, 1, 3)


def mediator_forward(x_sbi, params, sample_key):
    """x_sbi: [S, B, num_input] (PyTorch seq-first). Returns (action, log_prob, entropy, None)."""
    x = x_sbi.astype(jnp.float32).reshape(NROWS, NUM_INPUT)       # row n = s*B + b

    # Gumbel noise for the Categorical sampler (Gumbel-max trick).
    u = jax.random.uniform(sample_key, (NROWS, NUM_ACTIONS),
                           minval=1e-6, maxval=1.0, dtype=jnp.float32)
    gumbel = -jnp.log(-jnp.log(u))

    bf16 = jnp.bfloat16
    inputs = (
        x,
        params["ew1"], params["eb1"], params["ew2"], params["eb2"],
        # per-head, leading-axis attention weights; matmul weights in bf16
        _split_heads_out(params["wq"]).astype(bf16),
        _split_heads_out(params["wk"]).astype(bf16),
        _split_heads_out(params["wv"]).astype(bf16),
        _split_heads_bias(params["bq"]),
        _split_heads_bias(params["bk"]),
        _split_heads_bias(params["bv"]),
        params["wo"].reshape(NUM_LAYERS, NHEAD, HEAD_DIM, D_MODEL).astype(bf16),
        params["bo"], params["ln1g"], params["ln1b"],
        params["wf1"].astype(bf16), params["bf1"],
        params["wf2"].astype(bf16), params["bf2"],
        params["ln2g"], params["ln2b"],
        params["dw1"], params["db1"], params["dw2"], params["db2"],
        gumbel,
    )

    vmem = pl.BlockSpec(memory_space=pltpu.MemorySpace.VMEM)
    action, log_prob, entropy = pl.pallas_call(
        mediator_kernel,
        out_shape=(
            jax.ShapeDtypeStruct((NROWS, 1), jnp.int32),
            jax.ShapeDtypeStruct((NROWS, 1), jnp.float32),
            jax.ShapeDtypeStruct((NROWS, 1), jnp.float32),
        ),
        in_specs=[vmem] * len(inputs),
        out_specs=(vmem, vmem, vmem),
    )(*inputs)

    # Back to PyTorch batch shape [S, B] (row n = s*B + b).
    action = action.reshape(SEQ, BATCH)
    log_prob = log_prob.reshape(SEQ, BATCH)
    entropy = entropy.reshape(SEQ, BATCH)
    return (action, log_prob, entropy, None)


if __name__ == "__main__":
    key = jax.random.PRNGKey(0)
    pkey, xkey, skey = jax.random.split(key, 3)
    params = init_params(pkey)
    x = jax.random.normal(xkey, (SEQ, BATCH, NUM_INPUT), dtype=jnp.float32)

    action, log_prob, entropy, _ = mediator_forward(x, params, skey)
    jax.block_until_ready((action, log_prob, entropy))

    assert action.shape == (SEQ, BATCH) and action.dtype == jnp.int32
    assert log_prob.shape == (SEQ, BATCH) and entropy.shape == (SEQ, BATCH)
    assert bool(jnp.all((action >= 0) & (action < NUM_ACTIONS)))
    assert bool(jnp.all(jnp.isfinite(log_prob))) and bool(jnp.all(jnp.isfinite(entropy)))
    assert bool(jnp.all(log_prob <= 1e-6)) and bool(jnp.all(entropy >= -1e-6))
    print("KERNEL_OK")
</pallas_src>

<mosaic_0001>
module attributes {stable_mosaic.version = 11 : i64} {
  func.func @mediator_kernel(%arg0: memref<16x4xf32, #tpu.memory_space<vmem>>, %arg1: memref<4x32xf32, #tpu.memory_space<vmem>>, %arg2: memref<1x32xf32, #tpu.memory_space<vmem>>, %arg3: memref<32x32xf32, #tpu.memory_space<vmem>>, %arg4: memref<1x32xf32, #tpu.memory_space<vmem>>, %arg5: memref<2x4x32x8xbf16, #tpu.memory_space<vmem>>, %arg6: memref<2x4x32x8xbf16, #tpu.memory_space<vmem>>, %arg7: memref<2x4x32x8xbf16, #tpu.memory_space<vmem>>, %arg8: memref<2x4x1x8xf32, #tpu.memory_space<vmem>>, %arg9: memref<2x4x1x8xf32, #tpu.memory_space<vmem>>, %arg10: memref<2x4x1x8xf32, #tpu.memory_space<vmem>>, %arg11: memref<2x4x8x32xbf16, #tpu.memory_space<vmem>>, %arg12: memref<2x1x32xf32, #tpu.memory_space<vmem>>, %arg13: memref<2x1x32xf32, #tpu.memory_space<vmem>>, %arg14: memref<2x1x32xf32, #tpu.memory_space<vmem>>, %arg15: memref<2x32x2048xbf16, #tpu.memory_space<vmem>>, %arg16: memref<2x1x2048xf32, #tpu.memory_space<vmem>>, %arg17: memref<2x2048x32xbf16, #tpu.memory_space<vmem>>, %arg18: memref<2x1x32xf32, #tpu.memory_space<vmem>>, %arg19: memref<2x1x32xf32, #tpu.memory_space<vmem>>, %arg20: memref<2x1x32xf32, #tpu.memory_space<vmem>>, %arg21: memref<32x32xf32, #tpu.memory_space<vmem>>, %arg22: memref<1x32xf32, #tpu.memory_space<vmem>>, %arg23: memref<32x2xf32, #tpu.memory_space<vmem>>, %arg24: memref<1x2xf32, #tpu.memory_space<vmem>>, %arg25: memref<16x2xf32, #tpu.memory_space<vmem>>, %arg26: memref<16x1xi32, #tpu.memory_space<vmem>>, %arg27: memref<16x1xf32, #tpu.memory_space<vmem>>, %arg28: memref<16x1xf32, #tpu.memory_space<vmem>>) attributes {dimension_semantics = [], scalar_prefetch = 0 : i64, scratch_operands = 0 : i64, tpu.core_type = #tpu.core_type<tc>} {
    %0 = tpu.iota {dimensions = array<i32: 0>} : vector<16x16xi32>
    %c2_i32 = arith.constant 2 : i32
    %c0_i32 = arith.constant 0 : i32
    %1 = arith.cmpi eq, %c2_i32, %c0_i32 : i32
    %c1_i32 = arith.constant 1 : i32
    %2 = arith.select %1, %c1_i32, %c2_i32 : i32
    %3 = vector.broadcast %2 : i32 to vector<16x16xi32>
    %4 = arith.remsi %0, %3 : vector<16x16xi32>
    %c0_i32_0 = arith.constant 0 : i32
    %5 = vector.broadcast %c0_i32_0 : i32 to vector<16x16xi32>
    %6 = arith.cmpi ne, %4, %5 : vector<16x16xi32>
    %c0_i32_1 = arith.constant 0 : i32
    %7 = vector.broadcast %c0_i32_1 : i32 to vector<16x16xi32>
    %8 = arith.cmpi slt, %4, %7 : vector<16x16xi32>
    %c0_i32_2 = arith.constant 0 : i32
    %9 = arith.cmpi slt, %2, %c0_i32_2 : i32
    %10 = vector.broadcast %9 : i1 to vector<16x16xi1>
    %11 = vector.broadcast %10 : vector<16x16xi1> to vector<16x16xi1>
    %12 = arith.xori %8, %11 : vector<16x16xi1>
    %13 = arith.andi %12, %6 : vector<16x16xi1>
    %14 = vector.broadcast %2 : i32 to vector<16x16xi32>
    %15 = arith.addi %4, %14 : vector<16x16xi32>
    %16 = arith.select %13, %15, %4 : vector<16x16xi1>, vector<16x16xi32>
    %17 = tpu.iota {dimensions = array<i32: 1>} : vector<16x16xi32>
    %c2_i32_3 = arith.constant 2 : i32
    %c0_i32_4 = arith.constant 0 : i32
    %18 = arith.cmpi eq, %c2_i32_3, %c0_i32_4 : i32
    %c1_i32_5 = arith.constant 1 : i32
    %19 = arith.select %18, %c1_i32_5, %c2_i32_3 : i32
    %20 = vector.broadcast %19 : i32 to vector<16x16xi32>
    %21 = arith.remsi %17, %20 : vector<16x16xi32>
    %c0_i32_6 = arith.constant 0 : i32
    %22 = vector.broadcast %c0_i32_6 : i32 to vector<16x16xi32>
    %23 = arith.cmpi ne, %21, %22 : vector<16x16xi32>
    %c0_i32_7 = arith.constant 0 : i32
    %24 = vector.broadcast %c0_i32_7 : i32 to vector<16x16xi32>
    %25 = arith.cmpi slt, %21, %24 : vector<16x16xi32>
    %c0_i32_8 = arith.constant 0 : i32
    %26 = arith.cmpi slt, %19, %c0_i32_8 : i32
    %27 = vector.broadcast %26 : i1 to vector<16x16xi1>
    %28 = vector.broadcast %27 : vector<16x16xi1> to vector<16x16xi1>
    %29 = arith.xori %25, %28 : vector<16x16xi1>
    %30 = arith.andi %29, %23 : vector<16x16xi1>
    %31 = vector.broadcast %19 : i32 to vector<16x16xi32>
    %32 = arith.addi %21, %31 : vector<16x16xi32>
    %33 = arith.select %30, %32, %21 : vector<16x16xi1>, vector<16x16xi32>
    %34 = arith.cmpi eq, %16, %33 : vector<16x16xi32>
    %cst = arith.constant 0.000000e+00 : f32
    %cst_9 = arith.constant -1.000000e+30 : f32
    %35 = vector.broadcast %cst : f32 to vector<16x16xf32>
    %36 = vector.broadcast %cst_9 : f32 to vector<16x16xf32>
    %37 = arith.select %34, %35, %36 : vector<16x16xi1>, vector<16x16xf32>
    %c0 = arith.constant 0 : index
    %c0_10 = arith.constant 0 : index
    %38 = vector.load %arg0[%c0, %c0_10] : memref<16x4xf32, #tpu.memory_space<vmem>>, vector<16x4xf32>
    %c0_11 = arith.constant 0 : index
    %c0_12 = arith.constant 0 : index
    %39 = vector.load %arg1[%c0_11, %c0_12] : memref<4x32xf32, #tpu.memory_space<vmem>>, vector<4x32xf32>
    %cst_13 = arith.constant dense<0.000000e+00> : vector<16x32xf32>
    %40 = tpu.matmul %38, %39, %cst_13 {dimension_numbers = #tpu.dot_dimension_numbers<[1], [0], [0], [1], [0, 0, 1, 1], [], []>} : vector<16x4xf32>, vector<4x32xf32>, vector<16x32xf32> -> vector<16x32xf32>
    %c0_14 = arith.constant 0 : index
    %c0_15 = arith.constant 0 : index
    %41 = vector.load %arg2[%c0_14, %c0_15] : memref<1x32xf32, #tpu.memory_space<vmem>>, vector<1x32xf32>
    %42 = vector.broadcast %41 : vector<1x32xf32> to vector<16x32xf32>
    %43 = arith.addf %40, %42 : vector<16x32xf32>
    %cst_16 = arith.constant 0.000000e+00 : f32
    %44 = vector.broadcast %cst_16 : f32 to vector<16x32xf32>
    %45 = arith.maximumf %43, %44 : vector<16x32xf32>
    %c0_17 = arith.constant 0 : index
    %c0_18 = arith.constant 0 : index
    %46 = vector.load %arg3[%c0_17, %c0_18] : memref<32x32xf32, #tpu.memory_space<vmem>>, vector<32x32xf32>
    %cst_19 = arith.constant dense<0.000000e+00> : vector<16x32xf32>
    %47 = tpu.matmul %45, %46, %cst_19 {dimension_numbers = #tpu.dot_dimension_numbers<[1], [0], [0], [1], [0, 0, 1, 1], [], []>} : vector<16x32xf32>, vector<32x32xf32>, vector<16x32xf32> -> vector<16x32xf32>
    %c0_20 = arith.constant 0 : index
    %c0_21 = arith.constant 0 : index
    %48 = vector.load %arg4[%c0_20, %c0_21] : memref<1x32xf32, #tpu.memory_space<vmem>>, vector<1x32xf32>
    %49 = vector.broadcast %48 : vector<1x32xf32> to vector<16x32xf32>
    %50 = arith.addf %47, %49 : vector<16x32xf32>
    %51 = arith.truncf %50 : vector<16x32xf32> to vector<16x32xbf16>
    %cst_22 = arith.constant 0.000000e+00 : f32
    %52 = vector.broadcast %cst_22 : f32 to vector<16x32xf32>
    %c0_23 = arith.constant 0 : index
    %c0_24 = arith.constant 0 : index
    %c0_25 = arith.constant 0 : index
    %c0_26 = arith.constant 0 : index
    %53 = vector.load %arg5[%c0_23, %c0_24, %c0_25, %c0_26] : memref<2x4x32x8xbf16, #tpu.memory_space<vmem>>, vector<1x1x32x8xbf16>
    %54 = vector.shape_cast %53 : vector<1x1x32x8xbf16> to vector<32x8xbf16>
    %cst_27 = arith.constant dense<0.000000e+00> : vector<16x8xf32>
    %55 = tpu.matmul %51, %54, %cst_27 {dimension_numbers = #tpu.dot_dimension_numbers<[1], [0], [0], [1], [0, 0, 1, 1], [], []>} : vector<16x32xbf16>, vector<32x8xbf16>, vector<16x8xf32> -> vector<16x8xf32>
    %c0_28 = arith.constant 0 : index
    %c0_29 = arith.constant 0 : index
    %c0_30 = arith.constant 0 : index
    %c0_31 = arith.constant 0 : index
    %56 = vector.load %arg8[%c0_28, %c0_29, %c0_30, %c0_31] : memref<2x4x1x8xf32, #tpu.memory_space<vmem>>, vector<1x1x1x8xf32>
    %57 = vector.shape_cast %56 : vector<1x1x1x8xf32> to vector<1x8xf32>
    %58 = vector.broadcast %57 : vector<1x8xf32> to vector<16x8xf32>
    %59 = arith.addf %55, %58 : vector<16x8xf32>
    %c0_32 = arith.constant 0 : index
    %c0_33 = arith.constant 0 : index
    %c0_34 = arith.constant 0 : index
    %c0_35 = arith.constant 0 : index
    %60 = vector.load %arg6[%c0_32, %c0_33, %c0_34, %c0_35] : memref<2x4x32x8xbf16, #tpu.memory_space<vmem>>, vector<1x1x32x8xbf16>
    %61 = vector.shape_cast %60 : vector<1x1x32x8xbf16> to vector<32x8xbf16>
    %cst_36 = arith.constant dense<0.000000e+00> : vector<16x8xf32>
    %62 = tpu.matmul %51, %61, %cst_36 {dimension_numbers = #tpu.dot_dimension_numbers<[1], [0], [0], [1], [0, 0, 1, 1], [], []>} : vector<16x32xbf16>, vector<32x8xbf16>, vector<16x8xf32> -> vector<16x8xf32>
    %c0_37 = arith.constant 0 : index
    %c0_38 = arith.constant 0 : index
    %c0_39 = arith.constant 0 : index
    %c0_40 = arith.constant 0 : index
    %63 = vector.load %arg9[%c0_37, %c0_38, %c0_39, %c0_40] : memref<2x4x1x8xf32, #tpu.memory_space<vmem>>, vector<1x1x1x8xf32>
    %64 = vector.shape_cast %63 : vector<1x1x1x8xf32> to vector<1x8xf32>
    %65 = vector.broadcast %64 : vector<1x8xf32> to vector<16x8xf32>
    %66 = arith.addf %62, %65 : vector<16x8xf32>
    %c0_41 = arith.constant 0 : index
    %c0_42 = arith.constant 0 : index
    %c0_43 = arith.constant 0 : index
    %c0_44 = arith.constant 0 : index
    %67 = vector.load %arg7[%c0_41, %c0_42, %c0_43, %c0_44] : memref<2x4x32x8xbf16, #tpu.memory_space<vmem>>, vector<1x1x32x8xbf16>
    %68 = vector.shape_cast %67 : vector<1x1x32x8xbf16> to vector<32x8xbf16>
    %cst_45 = arith.constant dense<0.000000e+00> : vector<16x8xf32>
    %69 = tpu.matmul %51, %68, %cst_45 {dimension_numbers = #tpu.dot_dimension_numbers<[1], [0], [0], [1], [0, 0, 1, 1], [], []>} : vector<16x32xbf16>, vector<32x8xbf16>, vector<16x8xf32> -> vector<16x8xf32>
    %c0_46 = arith.constant 0 : index
    %c0_47 = arith.constant 0 : index
    %c0_48 = arith.constant 0 : index
    %c0_49 = arith.constant 0 : index
    %70 = vector.load %arg10[%c0_46, %c0_47, %c0_48, %c0_49] : memref<2x4x1x8xf32, #tpu.memory_space<vmem>>, vector<1x1x1x8xf32>
    %71 = vector.shape_cast %70 : vector<1x1x1x8xf32> to vector<1x8xf32>
    %72 = vector.broadcast %71 : vector<1x8xf32> to vector<16x8xf32>
    %73 = arith.addf %69, %72 : vector<16x8xf32>
    %cst_50 = arith.constant dense<0.000000e+00> : vector<16x16xf32>
    %74 = tpu.matmul %59, %66, %cst_50 {dimension_numbers = #tpu.dot_dimension_numbers<[1], [1], [0], [0], [0, 0, 1, 0], [], []>} : vector<16x8xf32>, vector<16x8xf32>, vector<16x16xf32> -> vector<16x16xf32>
    %cst_51 = arith.constant 0.353553385 : f32
    %75 = vector.broadcast %cst_51 : f32 to vector<16x16xf32>
    %76 = arith.mulf %74, %75 : vector<16x16xf32>
    %77 = arith.addf %76, %37 : vector<16x16xf32>
    %cst_52 = arith.constant dense<0xFF800000> : vector<16xf32>
    %78 = vector.multi_reduction <maximumf>, %77, %cst_52 [1] : vector<16x16xf32> to vector<16xf32>
    %79 = vector.shape_cast %78 : vector<16xf32> to vector<16x1xf32>
    %80 = vector.broadcast %79 : vector<16x1xf32> to vector<16x16xf32>
    %81 = arith.subf %77, %80 : vector<16x16xf32>
    %82 = math.exp %81 : vector<16x16xf32>
    %cst_53 = arith.constant dense<0.000000e+00> : vector<16xf32>
    %83 = vector.multi_reduction <add>, %82, %cst_53 [1] : vector<16x16xf32> to vector<16xf32>
    %84 = vector.shape_cast %83 : vector<16xf32> to vector<16x1xf32>
    %85 = vector.broadcast %84 : vector<16x1xf32> to vector<16x16xf32>
    %86 = arith.divf %82, %85 : vector<16x16xf32>
    %cst_54 = arith.constant dense<0.000000e+00> : vector<16x8xf32>
    %87 = tpu.matmul %86, %73, %cst_54 {dimension_numbers = #tpu.dot_dimension_numbers<[1], [0], [0], [1], [0, 0, 1, 1], [], []>} : vector<16x16xf32>, vector<16x8xf32>, vector<16x8xf32> -> vector<16x8xf32>
    %88 = arith.truncf %87 : vector<16x8xf32> to vector<16x8xbf16>
    %c0_55 = arith.constant 0 : index
    %c0_56 = arith.constant 0 : index
    %c0_57 = arith.constant 0 : index
    %c0_58 = arith.constant 0 : index
    %89 = vector.load %arg11[%c0_55, %c0_56, %c0_57, %c0_58] : memref<2x4x8x32xbf16, #tpu.memory_space<vmem>>, vector<1x1x8x32xbf16>
    %90 = vector.shape_cast %89 : vector<1x1x8x32xbf16> to vector<8x32xbf16>
    %cst_59 = arith.constant dense<0.000000e+00> : vector<16x32xf32>
    %91 = tpu.matmul %88, %90, %cst_59 {dimension_numbers = #tpu.dot_dimension_numbers<[1], [0], [0], [1], [0, 0, 1, 1], [], []>} : vector<16x8xbf16>, vector<8x32xbf16>, vector<16x32xf32> -> vector<16x32xf32>
    %92 = arith.addf %52, %91 : vector<16x32xf32>
    %c0_60 = arith.constant 0 : index
    %c1 = arith.constant 1 : index
    %c0_61 = arith.constant 0 : index
    %c0_62 = arith.constant 0 : index
    %93 = vector.load %arg5[%c0_60, %c1, %c0_61, %c0_62] : memref<2x4x32x8xbf16, #tpu.memory_space<vmem>>, vector<1x1x32x8xbf16>
    %94 = vector.shape_cast %93 : vector<1x1x32x8xbf16> to vector<32x8xbf16>
    %cst_63 = arith.constant dense<0.000000e+00> : vector<16x8xf32>
    %95 = tpu.matmul %51, %94, %cst_63 {dimension_numbers = #tpu.dot_dimension_numbers<[1], [0], [0], [1], [0, 0, 1, 1], [], []>} : vector<16x32xbf16>, vector<32x8xbf16>, vector<16x8xf32> -> vector<16x8xf32>
    %c0_64 = arith.constant 0 : index
    %c1_65 = arith.constant 1 : index
    %c0_66 = arith.constant 0 : index
    %c0_67 = arith.constant 0 : index
    %96 = vector.load %arg8[%c0_64, %c1_65, %c0_66, %c0_67] : memref<2x4x1x8xf32, #tpu.memory_space<vmem>>, vector<1x1x1x8xf32>
    %97 = vector.shape_cast %96 : vector<1x1x1x8xf32> to vector<1x8xf32>
    %98 = vector.broadcast %97 : vector<1x8xf32> to vector<16x8xf32>
    %99 = arith.addf %95, %98 : vector<16x8xf32>
    %c0_68 = arith.constant 0 : index
    %c1_69 = arith.constant 1 : index
    %c0_70 = arith.constant 0 : index
    %c0_71 = arith.constant 0 : index
    %100 = vector.load %arg6[%c0_68, %c1_69, %c0_70, %c0_71] : memref<2x4x32x8xbf16, #tpu.memory_space<vmem>>, vector<1x1x32x8xbf16>
    %101 = vector.shape_cast %100 : vector<1x1x32x8xbf16> to vector<32x8xbf16>
    %cst_72 = arith.constant dense<0.000000e+00> : vector<16x8xf32>
    %102 = tpu.matmul %51, %101, %cst_72 {dimension_numbers = #tpu.dot_dimension_numbers<[1], [0], [0], [1], [0, 0, 1, 1], [], []>} : vector<16x32xbf16>, vector<32x8xbf16>, vector<16x8xf32> -> vector<16x8xf32>
    %c0_73 = arith.constant 0 : index
    %c1_74 = arith.constant 1 : index
    %c0_75 = arith.constant 0 : index
    %c0_76 = arith.constant 0 : index
    %103 = vector.load %arg9[%c0_73, %c1_74, %c0_75, %c0_76] : memref<2x4x1x8xf32, #tpu.memory_space<vmem>>, vector<1x1x1x8xf32>
    %104 = vector.shape_cast %103 : vector<1x1x1x8xf32> to vector<1x8xf32>
    %105 = vector.broadcast %104 : vector<1x8xf32> to vector<16x8xf32>
    %106 = arith.addf %102, %105 : vector<16x8xf32>
    %c0_77 = arith.constant 0 : index
    %c1_78 = arith.constant 1 : index
    %c0_79 = arith.constant 0 : index
    %c0_80 = arith.constant 0 : index
    %107 = vector.load %arg7[%c0_77, %c1_78, %c0_79, %c0_80] : memref<2x4x32x8xbf16, #tpu.memory_space<vmem>>, vector<1x1x32x8xbf16>
    %108 = vector.shape_cast %107 : vector<1x1x32x8xbf16> to vector<32x8xbf16>
    %cst_81 = arith.constant dense<0.000000e+00> : vector<16x8xf32>
    %109 = tpu.matmul %51, %108, %cst_81 {dimension_numbers = #tpu.dot_dimension_numbers<[1], [0], [0], [1], [0, 0, 1, 1], [], []>} : vector<16x32xbf16>, vector<32x8xbf16>, vector<16x8xf32> -> vector<16x8xf32>
    %c0_82 = arith.constant 0 : index
    %c1_83 = arith.constant 1 : index
    %c0_84 = arith.constant 0 : index
    %c0_85 = arith.constant 0 : index
    %110 = vector.load %arg10[%c0_82, %c1_83, %c0_84, %c0_85] : memref<2x4x1x8xf32, #tpu.memory_space<vmem>>, vector<1x1x1x8xf32>
    %111 = vector.shape_cast %110 : vector<1x1x1x8xf32> to vector<1x8xf32>
    %112 = vector.broadcast %111 : vector<1x8xf32> to vector<16x8xf32>
    %113 = arith.addf %109, %112 : vector<16x8xf32>
    %cst_86 = arith.constant dense<0.000000e+00> : vector<16x16xf32>
    %114 = tpu.matmul %99, %106, %cst_86 {dimension_numbers = #tpu.dot_dimension_numbers<[1], [1], [0], [0], [0, 0, 1, 0], [], []>} : vector<16x8xf32>, vector<16x8xf32>, vector<16x16xf32> -> vector<16x16xf32>
    %cst_87 = arith.constant 0.353553385 : f32
    %115 = vector.broadcast %cst_87 : f32 to vector<16x16xf32>
    %116 = arith.mulf %114, %115 : vector<16x16xf32>
    %117 = arith.addf %116, %37 : vector<16x16xf32>
    %cst_88 = arith.constant dense<0xFF800000> : vector<16xf32>
    %118 = vector.multi_reduction <maximumf>, %117, %cst_88 [1] : vector<16x16xf32> to vector<16xf32>
    %119 = vector.shape_cast %118 : vector<16xf32> to vector<16x1xf32>
    %120 = vector.broadcast %119 : vector<16x1xf32> to vector<16x16xf32>
    %121 = arith.subf %117, %120 : vector<16x16xf32>
    %122 = math.exp %121 : vector<16x16xf32>
    %cst_89 = arith.constant dense<0.000000e+00> : vector<16xf32>
    %123 = vector.multi_reduction <add>, %122, %cst_89 [1] : vector<16x16xf32> to vector<16xf32>
    %124 = vector.shape_cast %123 : vector<16xf32> to vector<16x1xf32>
    %125 = vector.broadcast %124 : vector<16x1xf32> to vector<16x16xf32>
    %126 = arith.divf %122, %125 : vector<16x16xf32>
    %cst_90 = arith.constant dense<0.000000e+00> : vector<16x8xf32>
    %127 = tpu.matmul %126, %113, %cst_90 {dimension_numbers = #tpu.dot_dimension_numbers<[1], [0], [0], [1], [0, 0, 1, 1], [], []>} : vector<16x16xf32>, vector<16x8xf32>, vector<16x8xf32> -> vector<16x8xf32>
    %128 = arith.truncf %127 : vector<16x8xf32> to vector<16x8xbf16>
    %c0_91 = arith.constant 0 : index
    %c1_92 = arith.constant 1 : index
    %c0_93 = arith.constant 0 : index
    %c0_94 = arith.constant 0 : index
    %129 = vector.load %arg11[%c0_91, %c1_92, %c0_93, %c0_94] : memref<2x4x8x32xbf16, #tpu.memory_space<vmem>>, vector<1x1x8x32xbf16>
    %130 = vector.shape_cast %129 : vector<1x1x8x32xbf16> to vector<8x32xbf16>
    %cst_95 = arith.constant dense<0.000000e+00> : vector<16x32xf32>
    %131 = tpu.matmul %128, %130, %cst_95 {dimension_numbers = #tpu.dot_dimension_numbers<[1], [0], [0], [1], [0, 0, 1, 1], [], []>} : vector<16x8xbf16>, vector<8x32xbf16>, vector<16x32xf32> -> vector<16x32xf32>
    %132 = arith.addf %92, %131 : vector<16x32xf32>
    %c0_96 = arith.constant 0 : index
    %c2 = arith.constant 2 : index
    %c0_97 = arith.constant 0 : index
    %c0_98 = arith.constant 0 : index
    %133 = vector.load %arg5[%c0_96, %c2, %c0_97, %c0_98] : memref<2x4x32x8xbf16, #tpu.memory_space<vmem>>, vector<1x1x32x8xbf16>
    %134 = vector.shape_cast %133 : vector<1x1x32x8xbf16> to vector<32x8xbf16>
    %cst_99 = arith.constant dense<0.000000e+00> : vector<16x8xf32>
    %135 = tpu.matmul %51, %134, %cst_99 {dimension_numbers = #tpu.dot_dimension_numbers<[1], [0], [0], [1], [0, 0, 1, 1], [], []>} : vector<16x32xbf16>, vector<32x8xbf16>, vector<16x8xf32> -> vector<16x8xf32>
    %c0_100 = arith.constant 0 : index
    %c2_101 = arith.constant 2 : index
    %c0_102 = arith.constant 0 : index
    %c0_103 = arith.constant 0 : index
    %136 = vector.load %arg8[%c0_100, %c2_101, %c0_102, %c0_103] : memref<2x4x1x8xf32, #tpu.memory_space<vmem>>, vector<1x1x1x8xf32>
    %137 = vector.shape_cast %136 : vector<1x1x1x8xf32> to vector<1x8xf32>
    %138 = vector.broadcast %137 : vector<1x8xf32> to vector<16x8xf32>
    %139 = arith.addf %135, %138 : vector<16x8xf32>
    %c0_104 = arith.constant 0 : index
    %c2_105 = arith.constant 2 : index
    %c0_106 = arith.constant 0 : index
    %c0_107 = arith.constant 0 : index
    %140 = vector.load %arg6[%c0_104, %c2_105, %c0_106, %c0_107] : memref<2x4x32x8xbf16, #tpu.memory_space<vmem>>, vector<1x1x32x8xbf16>
    %141 = vector.shape_cast %140 : vector<1x1x32x8xbf16> to vector<32x8xbf16>
    %cst_108 = arith.constant dense<0.000000e+00> : vector<16x8xf32>
    %142 = tpu.matmul %51, %141, %cst_108 {dimension_numbers = #tpu.dot_dimension_numbers<[1], [0], [0], [1], [0, 0, 1, 1], [], []>} : vector<16x32xbf16>, vector<32x8xbf16>, vector<16x8xf32> -> vector<16x8xf32>
    %c0_109 = arith.constant 0 : index
    %c2_110 = arith.constant 2 : index
    %c0_111 = arith.constant 0 : index
    %c0_112 = arith.constant 0 : index
    %143 = vector.load %arg9[%c0_109, %c2_110, %c0_111, %c0_112] : memref<2x4x1x8xf32, #tpu.memory_space<vmem>>, vector<1x1x1x8xf32>
    %144 = vector.shape_cast %143 : vector<1x1x1x8xf32> to vector<1x8xf32>
    %145 = vector.broadcast %144 : vector<1x8xf32> to vector<16x8xf32>
    %146 = arith.addf %142, %145 : vector<16x8xf32>
    %c0_113 = arith.constant 0 : index
    %c2_114 = arith.constant 2 : index
    %c0_115 = arith.constant 0 : index
    %c0_116 = arith.constant 0 : index
    %147 = vector.load %arg7[%c0_113, %c2_114, %c0_115, %c0_116] : memref<2x4x32x8xbf16, #tpu.memory_space<vmem>>, vector<1x1x32x8xbf16>
    %148 = vector.shape_cast %147 : vector<1x1x32x8xbf16> to vector<32x8xbf16>
    %cst_117 = arith.constant dense<0.000000e+00> : vector<16x8xf32>
    %149 = tpu.matmul %51, %148, %cst_117 {dimension_numbers = #tpu.dot_dimension_numbers<[1], [0], [0], [1], [0, 0, 1, 1], [], []>} : vector<16x32xbf16>, vector<32x8xbf16>, vector<16x8xf32> -> vector<16x8xf32>
    %c0_118 = arith.constant 0 : index
    %c2_119 = arith.constant 2 : index
    %c0_120 = arith.constant 0 : index
    %c0_121 = arith.constant 0 : index
    %150 = vector.load %arg10[%c0_118, %c2_119, %c0_120, %c0_121] : memref<2x4x1x8xf32, #tpu.memory_space<vmem>>, vector<1x1x1x8xf32>
    %151 = vector.shape_cast %150 : vector<1x1x1x8xf32> to vector<1x8xf32>
    %152 = vector.broadcast %151 : vector<1x8xf32> to vector<16x8xf32>
    %153 = arith.addf %149, %152 : vector<16x8xf32>
    %cst_122 = arith.constant dense<0.000000e+00> : vector<16x16xf32>
    %154 = tpu.matmul %139, %146, %cst_122 {dimension_numbers = #tpu.dot_dimension_numbers<[1], [1], [0], [0], [0, 0, 1, 0], [], []>} : vector<16x8xf32>, vector<16x8xf32>, vector<16x16xf32> -> vector<16x16xf32>
    %cst_123 = arith.constant 0.353553385 : f32
    %155 = vector.broadcast %cst_123 : f32 to vector<16x16xf32>
    %156 = arith.mulf %154, %155 : vector<16x16xf32>
    %157 = arith.addf %156, %37 : vector<16x16xf32>
    %cst_124 = arith.constant dense<0xFF800000> : vector<16xf32>
    %158 = vector.multi_reduction <maximumf>, %157, %cst_124 [1] : vector<16x16xf32> to vector<16xf32>
    %159 = vector.shape_cast %158 : vector<16xf32> to vector<16x1xf32>
    %160 = vector.broadcast %159 : vector<16x1xf32> to vector<16x16xf32>
    %161 = arith.subf %157, %160 : vector<16x16xf32>
    %162 = math.exp %161 : vector<16x16xf32>
    %cst_125 = arith.constant dense<0.000000e+00> : vector<16xf32>
    %163 = vector.multi_reduction <add>, %162, %cst_125 [1] : vector<16x16xf32> to vector<16xf32>
    %164 = vector.shape_cast %163 : vector<16xf32> to vector<16x1xf32>
    %165 = vector.broadcast %164 : vector<16x1xf32> to vector<16x16xf32>
    %166 = arith.divf %162, %165 : vector<16x16xf32>
    %cst_126 = arith.constant dense<0.000000e+00> : vector<16x8xf32>
    %167 = tpu.matmul %166, %153, %cst_126 {dimension_numbers = #tpu.dot_dimension_numbers<[1], [0], [0], [1], [0, 0, 1, 1], [], []>} : vector<16x16xf32>, vector<16x8xf32>, vector<16x8xf32> -> vector<16x8xf32>
    %168 = arith.truncf %167 : vector<16x8xf32> to vector<16x8xbf16>
    %c0_127 = arith.constant 0 : index
    %c2_128 = arith.constant 2 : index
    %c0_129 = arith.constant 0 : index
    %c0_130 = arith.constant 0 : index
    %169 = vector.load %arg11[%c0_127, %c2_128, %c0_129, %c0_130] : memref<2x4x8x32xbf16, #tpu.memory_space<vmem>>, vector<1x1x8x32xbf16>
    %170 = vector.shape_cast %169 : vector<1x1x8x32xbf16> to vector<8x32xbf16>
    %cst_131 = arith.constant dense<0.000000e+00> : vector<16x32xf32>
    %171 = tpu.matmul %168, %170, %cst_131 {dimension_numbers = #tpu.dot_dimension_numbers<[1], [0], [0], [1], [0, 0, 1, 1], [], []>} : vector<16x8xbf16>, vector<8x32xbf16>, vector<16x32xf32> -> vector<16x32xf32>
    %172 = arith.addf %132, %171 : vector<16x32xf32>
    %c0_132 = arith.constant 0 : index
    %c3 = arith.constant 3 : index
    %c0_133 = arith.constant 0 : index
    %c0_134 = arith.constant 0 : index
    %173 = vector.load %arg5[%c0_132, %c3, %c0_133, %c0_134] : memref<2x4x32x8xbf16, #tpu.memory_space<vmem>>, vector<1x1x32x8xbf16>
    %174 = vector.shape_cast %173 : vector<1x1x32x8xbf16> to vector<32x8xbf16>
    %cst_135 = arith.constant dense<0.000000e+00> : vector<16x8xf32>
    %175 = tpu.matmul %51, %174, %cst_135 {dimension_numbers = #tpu.dot_dimension_numbers<[1], [0], [0], [1], [0, 0, 1, 1], [], []>} : vector<16x32xbf16>, vector<32x8xbf16>, vector<16x8xf32> -> vector<16x8xf32>
    %c0_136 = arith.constant 0 : index
    %c3_137 = arith.constant 3 : index
    %c0_138 = arith.constant 0 : index
    %c0_139 = arith.constant 0 : index
    %176 = vector.load %arg8[%c0_136, %c3_137, %c0_138, %c0_139] : memref<2x4x1x8xf32, #tpu.memory_space<vmem>>, vector<1x1x1x8xf32>
    %177 = vector.shape_cast %176 : vector<1x1x1x8xf32> to vector<1x8xf32>
    %178 = vector.broadcast %177 : vector<1x8xf32> to vector<16x8xf32>
    %179 = arith.addf %175, %178 : vector<16x8xf32>
    %c0_140 = arith.constant 0 : index
    %c3_141 = arith.constant 3 : index
    %c0_142 = arith.constant 0 : index
    %c0_143 = arith.constant 0 : index
    %180 = vector.load %arg6[%c0_140, %c3_141, %c0_142, %c0_143] : memref<2x4x32x8xbf16, #tpu.memory_space<vmem>>, vector<1x1x32x8xbf16>
    %181 = vector.shape_cast %180 : vector<1x1x32x8xbf16> to vector<32x8xbf16>
    %cst_144 = arith.constant dense<0.000000e+00> : vector<16x8xf32>
    %182 = tpu.matmul %51, %181, %cst_144 {dimension_numbers = #tpu.dot_dimension_numbers<[1], [0], [0], [1], [0, 0, 1, 1], [], []>} : vector<16x32xbf16>, vector<32x8xbf16>, vector<16x8xf32> -> vector<16x8xf32>
    %c0_145 = arith.constant 0 : index
    %c3_146 = arith.constant 3 : index
    %c0_147 = arith.constant 0 : index
    %c0_148 = arith.constant 0 : index
    %183 = vector.load %arg9[%c0_145, %c3_146, %c0_147, %c0_148] : memref<2x4x1x8xf32, #tpu.memory_space<vmem>>, vector<1x1x1x8xf32>
    %184 = vector.shape_cast %183 : vector<1x1x1x8xf32> to vector<1x8xf32>
    %185 = vector.broadcast %184 : vector<1x8xf32> to vector<16x8xf32>
    %186 = arith.addf %182, %185 : vector<16x8xf32>
    %c0_149 = arith.constant 0 : index
    %c3_150 = arith.constant 3 : index
    %c0_151 = arith.constant 0 : index
    %c0_152 = arith.constant 0 : index
    %187 = vector.load %arg7[%c0_149, %c3_150, %c0_151, %c0_152] : memref<2x4x32x8xbf16, #tpu.memory_space<vmem>>, vector<1x1x32x8xbf16>
    %188 = vector.shape_cast %187 : vector<1x1x32x8xbf16> to vector<32x8xbf16>
    %cst_153 = arith.constant dense<0.000000e+00> : vector<16x8xf32>
    %189 = tpu.matmul %51, %188, %cst_153 {dimension_numbers = #tpu.dot_dimension_numbers<[1], [0], [0], [1], [0, 0, 1, 1], [], []>} : vector<16x32xbf16>, vector<32x8xbf16>, vector<16x8xf32> -> vector<16x8xf32>
    %c0_154 = arith.constant 0 : index
    %c3_155 = arith.constant 3 : index
    %c0_156 = arith.constant 0 : index
    %c0_157 = arith.constant 0 : index
    %190 = vector.load %arg10[%c0_154, %c3_155, %c0_156, %c0_157] : memref<2x4x1x8xf32, #tpu.memory_space<vmem>>, vector<1x1x1x8xf32>
    %191 = vector.shape_cast %190 : vector<1x1x1x8xf32> to vector<1x8xf32>
    %192 = vector.broadcast %191 : vector<1x8xf32> to vector<16x8xf32>
    %193 = arith.addf %189, %192 : vector<16x8xf32>
    %cst_158 = arith.constant dense<0.000000e+00> : vector<16x16xf32>
    %194 = tpu.matmul %179, %186, %cst_158 {dimension_numbers = #tpu.dot_dimension_numbers<[1], [1], [0], [0], [0, 0, 1, 0], [], []>} : vector<16x8xf32>, vector<16x8xf32>, vector<16x16xf32> -> vector<16x16xf32>
    %cst_159 = arith.constant 0.353553385 : f32
    %195 = vector.broadcast %cst_159 : f32 to vector<16x16xf32>
    %196 = arith.mulf %194, %195 : vector<16x16xf32>
    %197 = arith.addf %196, %37 : vector<16x16xf32>
    %cst_160 = arith.constant dense<0xFF800000> : vector<16xf32>
    %198 = vector.multi_reduction <maximumf>, %197, %cst_160 [1] : vector<16x16xf32> to vector<16xf32>
    %199 = vector.shape_cast %198 : vector<16xf32> to vector<16x1xf32>
    %200 = vector.broadcast %199 : vector<16x1xf32> to vector<16x16xf32>
    %201 = arith.subf %197, %200 : vector<16x16xf32>
    %202 = math.exp %201 : vector<16x16xf32>
    %cst_161 = arith.constant dense<0.000000e+00> : vector<16xf32>
    %203 = vector.multi_reduction <add>, %202, %cst_161 [1] : vector<16x16xf32> to vector<16xf32>
    %204 = vector.shape_cast %203 : vector<16xf32> to vector<16x1xf32>
    %205 = vector.broadcast %204 : vector<16x1xf32> to vector<16x16xf32>
    %206 = arith.divf %202, %205 : vector<16x16xf32>
    %cst_162 = arith.constant dense<0.000000e+00> : vector<16x8xf32>
    %207 = tpu.matmul %206, %193, %cst_162 {dimension_numbers = #tpu.dot_dimension_numbers<[1], [0], [0], [1], [0, 0, 1, 1], [], []>} : vector<16x16xf32>, vector<16x8xf32>, vector<16x8xf32> -> vector<16x8xf32>
    %208 = arith.truncf %207 : vector<16x8xf32> to vector<16x8xbf16>
    %c0_163 = arith.constant 0 : index
    %c3_164 = arith.constant 3 : index
    %c0_165 = arith.constant 0 : index
    %c0_166 = arith.constant 0 : index
    %209 = vector.load %arg11[%c0_163, %c3_164, %c0_165, %c0_166] : memref<2x4x8x32xbf16, #tpu.memory_space<vmem>>, vector<1x1x8x32xbf16>
    %210 = vector.shape_cast %209 : vector<1x1x8x32xbf16> to vector<8x32xbf16>
    %cst_167 = arith.constant dense<0.000000e+00> : vector<16x32xf32>
    %211 = tpu.matmul %208, %210, %cst_167 {dimension_numbers = #tpu.dot_dimension_numbers<[1], [0], [0], [1], [0, 0, 1, 1], [], []>} : vector<16x8xbf16>, vector<8x32xbf16>, vector<16x32xf32> -> vector<16x32xf32>
    %212 = arith.addf %172, %211 : vector<16x32xf32>
    %213 = arith.addf %50, %212 : vector<16x32xf32>
    %c0_168 = arith.constant 0 : index
    %c0_169 = arith.constant 0 : index
    %c0_170 = arith.constant 0 : index
    %214 = vector.load %arg12[%c0_168, %c0_169, %c0_170] : memref<2x1x32xf32, #tpu.memory_space<vmem>>, vector<1x1x32xf32>
    %215 = vector.shape_cast %214 : vector<1x1x32xf32> to vector<1x32xf32>
    %216 = vector.broadcast %215 : vector<1x32xf32> to vector<16x32xf32>
    %217 = arith.addf %213, %216 : vector<16x32xf32>
    %c0_171 = arith.constant 0 : index
    %c0_172 = arith.constant 0 : index
    %c0_173 = arith.constant 0 : index
    %218 = vector.load %arg13[%c0_171, %c0_172, %c0_173] : memref<2x1x32xf32, #tpu.memory_space<vmem>>, vector<1x1x32xf32>
    %219 = vector.shape_cast %218 : vector<1x1x32xf32> to vector<1x32xf32>
    %c0_174 = arith.constant 0 : index
    %c0_175 = arith.constant 0 : index
    %c0_176 = arith.constant 0 : index
    %220 = vector.load %arg14[%c0_174, %c0_175, %c0_176] : memref<2x1x32xf32, #tpu.memory_space<vmem>>, vector<1x1x32xf32>
    %221 = vector.shape_cast %220 : vector<1x1x32xf32> to vector<1x32xf32>
    %cst_177 = arith.constant dense<0.000000e+00> : vector<16xf32>
    %222 = vector.multi_reduction <add>, %217, %cst_177 [1] : vector<16x32xf32> to vector<16xf32>
    %223 = vector.shape_cast %222 : vector<16xf32> to vector<16x1xf32>
    %cst_178 = arith.constant 3.200000e+01 : f32
    %224 = vector.broadcast %cst_178 : f32 to vector<16x1xf32>
    %225 = arith.divf %223, %224 : vector<16x1xf32>
    %226 = vector.broadcast %225 : vector<16x1xf32> to vector<16x32xf32>
    %227 = arith.subf %217, %226 : vector<16x32xf32>
    %228 = arith.mulf %227, %227 : vector<16x32xf32>
    %cst_179 = arith.constant dense<0.000000e+00> : vector<16xf32>
    %229 = vector.multi_reduction <add>, %228, %cst_179 [1] : vector<16x32xf32> to vector<16xf32>
    %230 = vector.shape_cast %229 : vector<16xf32> to vector<16x1xf32>
    %cst_180 = arith.constant 3.200000e+01 : f32
    %231 = vector.broadcast %cst_180 : f32 to vector<16x1xf32>
    %232 = arith.divf %230, %231 : vector<16x1xf32>
    %233 = vector.broadcast %225 : vector<16x1xf32> to vector<16x32xf32>
    %234 = arith.subf %217, %233 : vector<16x32xf32>
    %cst_181 = arith.constant 9.99999974E-6 : f32
    %235 = vector.broadcast %cst_181 : f32 to vector<16x1xf32>
    %236 = arith.addf %232, %235 : vector<16x1xf32>
    %237 = math.rsqrt %236 : vector<16x1xf32>
    %238 = vector.broadcast %237 : vector<16x1xf32> to vector<16x32xf32>
    %239 = arith.mulf %234, %238 : vector<16x32xf32>
    %240 = vector.broadcast %219 : vector<1x32xf32> to vector<16x32xf32>
    %241 = arith.mulf %239, %240 : vector<16x32xf32>
    %242 = vector.broadcast %221 : vector<1x32xf32> to vector<16x32xf32>
    %243 = arith.addf %241, %242 : vector<16x32xf32>
    %244 = arith.truncf %243 : vector<16x32xf32> to vector<16x32xbf16>
    %c0_182 = arith.constant 0 : index
    %c0_183 = arith.constant 0 : index
    %c0_184 = arith.constant 0 : index
    %245 = vector.load %arg15[%c0_182, %c0_183, %c0_184] : memref<2x32x2048xbf16, #tpu.memory_space<vmem>>, vector<1x32x2048xbf16>
    %246 = vector.shape_cast %245 : vector<1x32x2048xbf16> to vector<32x2048xbf16>
    %cst_185 = arith.constant dense<0.000000e+00> : vector<16x2048xf32>
    %247 = tpu.matmul %244, %246, %cst_185 {dimension_numbers = #tpu.dot_dimension_numbers<[1], [0], [0], [1], [0, 0, 1, 1], [], []>} : vector<16x32xbf16>, vector<32x2048xbf16>, vector<16x2048xf32> -> vector<16x2048xf32>
    %c0_186 = arith.constant 0 : index
    %c0_187 = arith.constant 0 : index
    %c0_188 = arith.constant 0 : index
    %248 = vector.load %arg16[%c0_186, %c0_187, %c0_188] : memref<2x1x2048xf32, #tpu.memory_space<vmem>>, vector<1x1x2048xf32>
    %249 = vector.shape_cast %248 : vector<1x1x2048xf32> to vector<1x2048xf32>
    %250 = vector.broadcast %249 : vector<1x2048xf32> to vector<16x2048xf32>
    %251 = arith.addf %247, %250 : vector<16x2048xf32>
    %cst_189 = arith.constant 0.000000e+00 : f32
    %252 = vector.broadcast %cst_189 : f32 to vector<16x2048xf32>
    %253 = arith.maximumf %251, %252 : vector<16x2048xf32>
    %254 = arith.truncf %253 : vector<16x2048xf32> to vector<16x2048xbf16>
    %c0_190 = arith.constant 0 : index
    %c0_191 = arith.constant 0 : index
    %c0_192 = arith.constant 0 : index
    %255 = vector.load %arg17[%c0_190, %c0_191, %c0_192] : memref<2x2048x32xbf16, #tpu.memory_space<vmem>>, vector<1x2048x32xbf16>
    %256 = vector.shape_cast %255 : vector<1x2048x32xbf16> to vector<2048x32xbf16>
    %cst_193 = arith.constant dense<0.000000e+00> : vector<16x32xf32>
    %257 = tpu.matmul %254, %256, %cst_193 {dimension_numbers = #tpu.dot_dimension_numbers<[1], [0], [0], [1], [0, 0, 1, 1], [], []>} : vector<16x2048xbf16>, vector<2048x32xbf16>, vector<16x32xf32> -> vector<16x32xf32>
    %c0_194 = arith.constant 0 : index
    %c0_195 = arith.constant 0 : index
    %c0_196 = arith.constant 0 : index
    %258 = vector.load %arg18[%c0_194, %c0_195, %c0_196] : memref<2x1x32xf32, #tpu.memory_space<vmem>>, vector<1x1x32xf32>
    %259 = vector.shape_cast %258 : vector<1x1x32xf32> to vector<1x32xf32>
    %260 = vector.broadcast %259 : vector<1x32xf32> to vector<16x32xf32>
    %261 = arith.addf %257, %260 : vector<16x32xf32>
    %262 = arith.addf %243, %261 : vector<16x32xf32>
    %c0_197 = arith.constant 0 : index
    %c0_198 = arith.constant 0 : index
    %c0_199 = arith.constant 0 : index
    %263 = vector.load %arg19[%c0_197, %c0_198, %c0_199] : memref<2x1x32xf32, #tpu.memory_space<vmem>>, vector<1x1x32xf32>
    %264 = vector.shape_cast %263 : vector<1x1x32xf32> to vector<1x32xf32>
    %c0_200 = arith.constant 0 : index
    %c0_201 = arith.constant 0 : index
    %c0_202 = arith.constant 0 : index
    %265 = vector.load %arg20[%c0_200, %c0_201, %c0_202] : memref<2x1x32xf32, #tpu.memory_space<vmem>>, vector<1x1x32xf32>
    %266 = vector.shape_cast %265 : vector<1x1x32xf32> to vector<1x32xf32>
    %cst_203 = arith.constant dense<0.000000e+00> : vector<16xf32>
    %267 = vector.multi_reduction <add>, %262, %cst_203 [1] : vector<16x32xf32> to vector<16xf32>
    %268 = vector.shape_cast %267 : vector<16xf32> to vector<16x1xf32>
    %cst_204 = arith.constant 3.200000e+01 : f32
    %269 = vector.broadcast %cst_204 : f32 to vector<16x1xf32>
    %270 = arith.divf %268, %269 : vector<16x1xf32>
    %271 = vector.broadcast %270 : vector<16x1xf32> to vector<16x32xf32>
    %272 = arith.subf %262, %271 : vector<16x32xf32>
    %273 = arith.mulf %272, %272 : vector<16x32xf32>
    %cst_205 = arith.constant dense<0.000000e+00> : vector<16xf32>
    %274 = vector.multi_reduction <add>, %273, %cst_205 [1] : vector<16x32xf32> to vector<16xf32>
    %275 = vector.shape_cast %274 : vector<16xf32> to vector<16x1xf32>
    %cst_206 = arith.constant 3.200000e+01 : f32
    %276 = vector.broadcast %cst_206 : f32 to vector<16x1xf32>
    %277 = arith.divf %275, %276 : vector<16x1xf32>
    %278 = vector.broadcast %270 : vector<16x1xf32> to vector<16x32xf32>
    %279 = arith.subf %262, %278 : vector<16x32xf32>
    %cst_207 = arith.constant 9.99999974E-6 : f32
    %280 = vector.broadcast %cst_207 : f32 to vector<16x1xf32>
    %281 = arith.addf %277, %280 : vector<16x1xf32>
    %282 = math.rsqrt %281 : vector<16x1xf32>
    %283 = vector.broadcast %282 : vector<16x1xf32> to vector<16x32xf32>
    %284 = arith.mulf %279, %283 : vector<16x32xf32>
    %285 = vector.broadcast %264 : vector<1x32xf32> to vector<16x32xf32>
    %286 = arith.mulf %284, %285 : vector<16x32xf32>
    %287 = vector.broadcast %266 : vector<1x32xf32> to vector<16x32xf32>
    %288 = arith.addf %286, %287 : vector<16x32xf32>
    %289 = arith.truncf %288 : vector<16x32xf32> to vector<16x32xbf16>
    %cst_208 = arith.constant 0.000000e+00 : f32
    %290 = vector.broadcast %cst_208 : f32 to vector<16x32xf32>
    %c1_209 = arith.constant 1 : index
    %c0_210 = arith.constant 0 : index
    %c0_211 = arith.constant 0 : index
    %c0_212 = arith.constant 0 : index
    %291 = vector.load %arg5[%c1_209, %c0_210, %c0_211, %c0_212] : memref<2x4x32x8xbf16, #tpu.memory_space<vmem>>, vector<1x1x32x8xbf16>
    %292 = vector.shape_cast %291 : vector<1x1x32x8xbf16> to vector<32x8xbf16>
    %cst_213 = arith.constant dense<0.000000e+00> : vector<16x8xf32>
    %293 = tpu.matmul %289, %292, %cst_213 {dimension_numbers = #tpu.dot_dimension_numbers<[1], [0], [0], [1], [0, 0, 1, 1], [], []>} : vector<16x32xbf16>, vector<32x8xbf16>, vector<16x8xf32> -> vector<16x8xf32>
    %c1_214 = arith.constant 1 : index
    %c0_215 = arith.constant 0 : index
    %c0_216 = arith.constant 0 : index
    %c0_217 = arith.constant 0 : index
    %294 = vector.load %arg8[%c1_214, %c0_215, %c0_216, %c0_217] : memref<2x4x1x8xf32, #tpu.memory_space<vmem>>, vector<1x1x1x8xf32>
    %295 = vector.shape_cast %294 : vector<1x1x1x8xf32> to vector<1x8xf32>
    %296 = vector.broadcast %295 : vector<1x8xf32> to vector<16x8xf32>
    %297 = arith.addf %293, %296 : vector<16x8xf32>
    %c1_218 = arith.constant 1 : index
    %c0_219 = arith.constant 0 : index
    %c0_220 = arith.constant 0 : index
    %c0_221 = arith.constant 0 : index
    %298 = vector.load %arg6[%c1_218, %c0_219, %c0_220, %c0_221] : memref<2x4x32x8xbf16, #tpu.memory_space<vmem>>, vector<1x1x32x8xbf16>
    %299 = vector.shape_cast %298 : vector<1x1x32x8xbf16> to vector<32x8xbf16>
    %cst_222 = arith.constant dense<0.000000e+00> : vector<16x8xf32>
    %300 = tpu.matmul %289, %299, %cst_222 {dimension_numbers = #tpu.dot_dimension_numbers<[1], [0], [0], [1], [0, 0, 1, 1], [], []>} : vector<16x32xbf16>, vector<32x8xbf16>, vector<16x8xf32> -> vector<16x8xf32>
    %c1_223 = arith.constant 1 : index
    %c0_224 = arith.constant 0 : index
    %c0_225 = arith.constant 0 : index
    %c0_226 = arith.constant 0 : index
    %301 = vector.load %arg9[%c1_223, %c0_224, %c0_225, %c0_226] : memref<2x4x1x8xf32, #tpu.memory_space<vmem>>, vector<1x1x1x8xf32>
    %302 = vector.shape_cast %301 : vector<1x1x1x8xf32> to vector<1x8xf32>
    %303 = vector.broadcast %302 : vector<1x8xf32> to vector<16x8xf32>
    %304 = arith.addf %300, %303 : vector<16x8xf32>
    %c1_227 = arith.constant 1 : index
    %c0_228 = arith.constant 0 : index
    %c0_229 = arith.constant 0 : index
    %c0_230 = arith.constant 0 : index
    %305 = vector.load %arg7[%c1_227, %c0_228, %c0_229, %c0_230] : memref<2x4x32x8xbf16, #tpu.memory_space<vmem>>, vector<1x1x32x8xbf16>
    %306 = vector.shape_cast %305 : vector<1x1x32x8xbf16> to vector<32x8xbf16>
    %cst_231 = arith.constant dense<0.000000e+00> : vector<16x8xf32>
    %307 = tpu.matmul %289, %306, %cst_231 {dimension_numbers = #tpu.dot_dimension_numbers<[1], [0], [0], [1], [0, 0, 1, 1], [], []>} : vector<16x32xbf16>, vector<32x8xbf16>, vector<16x8xf32> -> vector<16x8xf32>
    %c1_232 = arith.constant 1 : index
    %c0_233 = arith.constant 0 : index
    %c0_234 = arith.constant 0 : index
    %c0_235 = arith.constant 0 : index
    %308 = vector.load %arg10[%c1_232, %c0_233, %c0_234, %c0_235] : memref<2x4x1x8xf32, #tpu.memory_space<vmem>>, vector<1x1x1x8xf32>
    %309 = vector.shape_cast %308 : vector<1x1x1x8xf32> to vector<1x8xf32>
    %310 = vector.broadcast %309 : vector<1x8xf32> to vector<16x8xf32>
    %311 = arith.addf %307, %310 : vector<16x8xf32>
    %cst_236 = arith.constant dense<0.000000e+00> : vector<16x16xf32>
    %312 = tpu.matmul %297, %304, %cst_236 {dimension_numbers = #tpu.dot_dimension_numbers<[1], [1], [0], [0], [0, 0, 1, 0], [], []>} : vector<16x8xf32>, vector<16x8xf32>, vector<16x16xf32> -> vector<16x16xf32>
    %cst_237 = arith.constant 0.353553385 : f32
    %313 = vector.broadcast %cst_237 : f32 to vector<16x16xf32>
    %314 = arith.mulf %312, %313 : vector<16x16xf32>
    %315 = arith.addf %314, %37 : vector<16x16xf32>
    %cst_238 = arith.constant dense<0xFF800000> : vector<16xf32>
    %316 = vector.multi_reduction <maximumf>, %315, %cst_238 [1] : vector<16x16xf32> to vector<16xf32>
    %317 = vector.shape_cast %316 : vector<16xf32> to vector<16x1xf32>
    %318 = vector.broadcast %317 : vector<16x1xf32> to vector<16x16xf32>
    %319 = arith.subf %315, %318 : vector<16x16xf32>
    %320 = math.exp %319 : vector<16x16xf32>
    %cst_239 = arith.constant dense<0.000000e+00> : vector<16xf32>
    %321 = vector.multi_reduction <add>, %320, %cst_239 [1] : vector<16x16xf32> to vector<16xf32>
    %322 = vector.shape_cast %321 : vector<16xf32> to vector<16x1xf32>
    %323 = vector.broadcast %322 : vector<16x1xf32> to vector<16x16xf32>
    %324 = arith.divf %320, %323 : vector<16x16xf32>
    %cst_240 = arith.constant dense<0.000000e+00> : vector<16x8xf32>
    %325 = tpu.matmul %324, %311, %cst_240 {dimension_numbers = #tpu.dot_dimension_numbers<[1], [0], [0], [1], [0, 0, 1, 1], [], []>} : vector<16x16xf32>, vector<16x8xf32>, vector<16x8xf32> -> vector<16x8xf32>
    %326 = arith.truncf %325 : vector<16x8xf32> to vector<16x8xbf16>
    %c1_241 = arith.constant 1 : index
    %c0_242 = arith.constant 0 : index
    %c0_243 = arith.constant 0 : index
    %c0_244 = arith.constant 0 : index
    %327 = vector.load %arg11[%c1_241, %c0_242, %c0_243, %c0_244] : memref<2x4x8x32xbf16, #tpu.memory_space<vmem>>, vector<1x1x8x32xbf16>
    %328 = vector.shape_cast %327 : vector<1x1x8x32xbf16> to vector<8x32xbf16>
    %cst_245 = arith.constant dense<0.000000e+00> : vector<16x32xf32>
    %329 = tpu.matmul %326, %328, %cst_245 {dimension_numbers = #tpu.dot_dimension_numbers<[1], [0], [0], [1], [0, 0, 1, 1], [], []>} : vector<16x8xbf16>, vector<8x32xbf16>, vector<16x32xf32> -> vector<16x32xf32>
    %330 = arith.addf %290, %329 : vector<16x32xf32>
    %c1_246 = arith.constant 1 : index
    %c1_247 = arith.constant 1 : index
    %c0_248 = arith.constant 0 : index
    %c0_249 = arith.constant 0 : index
    %331 = vector.load %arg5[%c1_246, %c1_247, %c0_248, %c0_249] : memref<2x4x32x8xbf16, #tpu.memory_space<vmem>>, vector<1x1x32x8xbf16>
    %332 = vector.shape_cast %331 : vector<1x1x32x8xbf16> to vector<32x8xbf16>
    %cst_250 = arith.constant dense<0.000000e+00> : vector<16x8xf32>
    %333 = tpu.matmul %289, %332, %cst_250 {dimension_numbers = #tpu.dot_dimension_numbers<[1], [0], [0], [1], [0, 0, 1, 1], [], []>} : vector<16x32xbf16>, vector<32x8xbf16>, vector<16x8xf32> -> vector<16x8xf32>
    %c1_251 = arith.constant 1 : index
    %c1_252 = arith.constant 1 : index
    %c0_253 = arith.constant 0 : index
    %c0_254 = arith.constant 0 : index
    %334 = vector.load %arg8[%c1_251, %c1_252, %c0_253, %c0_254] : memref<2x4x1x8xf32, #tpu.memory_space<vmem>>, vector<1x1x1x8xf32>
    %335 = vector.shape_cast %334 : vector<1x1x1x8xf32> to vector<1x8xf32>
    %336 = vector.broadcast %335 : vector<1x8xf32> to vector<16x8xf32>
    %337 = arith.addf %333, %336 : vector<16x8xf32>
    %c1_255 = arith.constant 1 : index
    %c1_256 = arith.constant 1 : index
    %c0_257 = arith.constant 0 : index
    %c0_258 = arith.constant 0 : index
    %338 = vector.load %arg6[%c1_255, %c1_256, %c0_257, %c0_258] : memref<2x4x32x8xbf16, #tpu.memory_space<vmem>>, vector<1x1x32x8xbf16>
    %339 = vector.shape_cast %338 : vector<1x1x32x8xbf16> to vector<32x8xbf16>
    %cst_259 = arith.constant dense<0.000000e+00> : vector<16x8xf32>
    %340 = tpu.matmul %289, %339, %cst_259 {dimension_numbers = #tpu.dot_dimension_numbers<[1], [0], [0], [1], [0, 0, 1, 1], [], []>} : vector<16x32xbf16>, vector<32x8xbf16>, vector<16x8xf32> -> vector<16x8xf32>
    %c1_260 = arith.constant 1 : index
    %c1_261 = arith.constant 1 : index
    %c0_262 = arith.constant 0 : index
    %c0_263 = arith.constant 0 : index
    %341 = vector.load %arg9[%c1_260, %c1_261, %c0_262, %c0_263] : memref<2x4x1x8xf32, #tpu.memory_space<vmem>>, vector<1x1x1x8xf32>
    %342 = vector.shape_cast %341 : vector<1x1x1x8xf32> to vector<1x8xf32>
    %343 = vector.broadcast %342 : vector<1x8xf32> to vector<16x8xf32>
    %344 = arith.addf %340, %343 : vector<16x8xf32>
    %c1_264 = arith.constant 1 : index
    %c1_265 = arith.constant 1 : index
    %c0_266 = arith.constant 0 : index
    %c0_267 = arith.constant 0 : index
    %345 = vector.load %arg7[%c1_264, %c1_265, %c0_266, %c0_267] : memref<2x4x32x8xbf16, #tpu.memory_space<vmem>>, vector<1x1x32x8xbf16>
    %346 = vector.shape_cast %345 : vector<1x1x32x8xbf16> to vector<32x8xbf16>
    %cst_268 = arith.constant dense<0.000000e+00> : vector<16x8xf32>
    %347 = tpu.matmul %289, %346, %cst_268 {dimension_numbers = #tpu.dot_dimension_numbers<[1], [0], [0], [1], [0, 0, 1, 1], [], []>} : vector<16x32xbf16>, vector<32x8xbf16>, vector<16x8xf32> -> vector<16x8xf32>
    %c1_269 = arith.constant 1 : index
    %c1_270 = arith.constant 1 : index
    %c0_271 = arith.constant 0 : index
    %c0_272 = arith.constant 0 : index
    %348 = vector.load %arg10[%c1_269, %c1_270, %c0_271, %c0_272] : memref<2x4x1x8xf32, #tpu.memory_space<vmem>>, vector<1x1x1x8xf32>
    %349 = vector.shape_cast %348 : vector<1x1x1x8xf32> to vector<1x8xf32>
    %350 = vector.broadcast %349 : vector<1x8xf32> to vector<16x8xf32>
    %351 = arith.addf %347, %350 : vector<16x8xf32>
    %cst_273 = arith.constant dense<0.000000e+00> : vector<16x16xf32>
    %352 = tpu.matmul %337, %344, %cst_273 {dimension_numbers = #tpu.dot_dimension_numbers<[1], [1], [0], [0], [0, 0, 1, 0], [], []>} : vector<16x8xf32>, vector<16x8xf32>, vector<16x16xf32> -> vector<16x16xf32>
    %cst_274 = arith.constant 0.353553385 : f32
    %353 = vector.broadcast %cst_274 : f32 to vector<16x16xf32>
    %354 = arith.mulf %352, %353 : vector<16x16xf32>
    %355 = arith.addf %354, %37 : vector<16x16xf32>
    %cst_275 = arith.constant dense<0xFF800000> : vector<16xf32>
    %356 = vector.multi_reduction <maximumf>, %355, %cst_275 [1] : vector<16x16xf32> to vector<16xf32>
    %357 = vector.shape_cast %356 : vector<16xf32> to vector<16x1xf32>
    %358 = vector.broadcast %357 : vector<16x1xf32> to vector<16x16xf32>
    %359 = arith.subf %355, %358 : vector<16x16xf32>
    %360 = math.exp %359 : vector<16x16xf32>
    %cst_276 = arith.constant dense<0.000000e+00> : vector<16xf32>
    %361 = vector.multi_reduction <add>, %360, %cst_276 [1] : vector<16x16xf32> to vector<16xf32>
    %362 = vector.shape_cast %361 : vector<16xf32> to vector<16x1xf32>
    %363 = vector.broadcast %362 : vector<16x1xf32> to vector<16x16xf32>
    %364 = arith.divf %360, %363 : vector<16x16xf32>
    %cst_277 = arith.constant dense<0.000000e+00> : vector<16x8xf32>
    %365 = tpu.matmul %364, %351, %cst_277 {dimension_numbers = #tpu.dot_dimension_numbers<[1], [0], [0], [1], [0, 0, 1, 1], [], []>} : vector<16x16xf32>, vector<16x8xf32>, vector<16x8xf32> -> vector<16x8xf32>
    %366 = arith.truncf %365 : vector<16x8xf32> to vector<16x8xbf16>
    %c1_278 = arith.constant 1 : index
    %c1_279 = arith.constant 1 : index
    %c0_280 = arith.constant 0 : index
    %c0_281 = arith.constant 0 : index
    %367 = vector.load %arg11[%c1_278, %c1_279, %c0_280, %c0_281] : memref<2x4x8x32xbf16, #tpu.memory_space<vmem>>, vector<1x1x8x32xbf16>
    %368 = vector.shape_cast %367 : vector<1x1x8x32xbf16> to vector<8x32xbf16>
    %cst_282 = arith.constant dense<0.000000e+00> : vector<16x32xf32>
    %369 = tpu.matmul %366, %368, %cst_282 {dimension_numbers = #tpu.dot_dimension_numbers<[1], [0], [0], [1], [0, 0, 1, 1], [], []>} : vector<16x8xbf16>, vector<8x32xbf16>, vector<16x32xf32> -> vector<16x32xf32>
    %370 = arith.addf %330, %369 : vector<16x32xf32>
    %c1_283 = arith.constant 1 : index
    %c2_284 = arith.constant 2 : index
    %c0_285 = arith.constant 0 : index
    %c0_286 = arith.constant 0 : index
    %371 = vector.load %arg5[%c1_283, %c2_284, %c0_285, %c0_286] : memref<2x4x32x8xbf16, #tpu.memory_space<vmem>>, vector<1x1x32x8xbf16>
    %372 = vector.shape_cast %371 : vector<1x1x32x8xbf16> to vector<32x8xbf16>
    %cst_287 = arith.constant dense<0.000000e+00> : vector<16x8xf32>
    %373 = tpu.matmul %289, %372, %cst_287 {dimension_numbers = #tpu.dot_dimension_numbers<[1], [0], [0], [1], [0, 0, 1, 1], [], []>} : vector<16x32xbf16>, vector<32x8xbf16>, vector<16x8xf32> -> vector<16x8xf32>
    %c1_288 = arith.constant 1 : index
    %c2_289 = arith.constant 2 : index
    %c0_290 = arith.constant 0 : index
    %c0_291 = arith.constant 0 : index
    %374 = vector.load %arg8[%c1_288, %c2_289, %c0_290, %c0_291] : memref<2x4x1x8xf32, #tpu.memory_space<vmem>>, vector<1x1x1x8xf32>
    %375 = vector.shape_cast %374 : vector<1x1x1x8xf32> to vector<1x8xf32>
    %376 = vector.broadcast %375 : vector<1x8xf32> to vector<16x8xf32>
    %377 = arith.addf %373, %376 : vector<16x8xf32>
    %c1_292 = arith.constant 1 : index
    %c2_293 = arith.constant 2 : index
    %c0_294 = arith.constant 0 : index
    %c0_295 = arith.constant 0 : index
    %378 = vector.load %arg6[%c1_292, %c2_293, %c0_294, %c0_295] : memref<2x4x32x8xbf16, #tpu.memory_space<vmem>>, vector<1x1x32x8xbf16>
    %379 = vector.shape_cast %378 : vector<1x1x32x8xbf16> to vector<32x8xbf16>
    %cst_296 = arith.constant dense<0.000000e+00> : vector<16x8xf32>
    %380 = tpu.matmul %289, %379, %cst_296 {dimension_numbers = #tpu.dot_dimension_numbers<[1], [0], [0], [1], [0, 0, 1, 1], [], []>} : vector<16x32xbf16>, vector<32x8xbf16>, vector<16x8xf32> -> vector<16x8xf32>
    %c1_297 = arith.constant 1 : index
    %c2_298 = arith.constant 2 : index
    %c0_299 = arith.constant 0 : index
    %c0_300 = arith.constant 0 : index
    %381 = vector.load %arg9[%c1_297, %c2_298, %c0_299, %c0_300] : memref<2x4x1x8xf32, #tpu.memory_space<vmem>>, vector<1x1x1x8xf32>
    %382 = vector.shape_cast %381 : vector<1x1x1x8xf32> to vector<1x8xf32>
    %383 = vector.broadcast %382 : vector<1x8xf32> to vector<16x8xf32>
    %384 = arith.addf %380, %383 : vector<16x8xf32>
    %c1_301 = arith.constant 1 : index
    %c2_302 = arith.constant 2 : index
    %c0_303 = arith.constant 0 : index
    %c0_304 = arith.constant 0 : index
    %385 = vector.load %arg7[%c1_301, %c2_302, %c0_303, %c0_304] : memref<2x4x32x8xbf16, #tpu.memory_space<vmem>>, vector<1x1x32x8xbf16>
    %386 = vector.shape_cast %385 : vector<1x1x32x8xbf16> to vector<32x8xbf16>
    %cst_305 = arith.constant dense<0.000000e+00> : vector<16x8xf32>
    %387 = tpu.matmul %289, %386, %cst_305 {dimension_numbers = #tpu.dot_dimension_numbers<[1], [0], [0], [1], [0, 0, 1, 1], [], []>} : vector<16x32xbf16>, vector<32x8xbf16>, vector<16x8xf32> -> vector<16x8xf32>
    %c1_306 = arith.constant 1 : index
    %c2_307 = arith.constant 2 : index
    %c0_308 = arith.constant 0 : index
    %c0_309 = arith.constant 0 : index
    %388 = vector.load %arg10[%c1_306, %c2_307, %c0_308, %c0_309] : memref<2x4x1x8xf32, #tpu.memory_space<vmem>>, vector<1x1x1x8xf32>
    %389 = vector.shape_cast %388 : vector<1x1x1x8xf32> to vector<1x8xf32>
    %390 = vector.broadcast %389 : vector<1x8xf32> to vector<16x8xf32>
    %391 = arith.addf %387, %390 : vector<16x8xf32>
    %cst_310 = arith.constant dense<0.000000e+00> : vector<16x16xf32>
    %392 = tpu.matmul %377, %384, %cst_310 {dimension_numbers = #tpu.dot_dimension_numbers<[1], [1], [0], [0], [0, 0, 1, 0], [], []>} : vector<16x8xf32>, vector<16x8xf32>, vector<16x16xf32> -> vector<16x16xf32>
    %cst_311 = arith.constant 0.353553385 : f32
    %393 = vector.broadcast %cst_311 : f32 to vector<16x16xf32>
    %394 = arith.mulf %392, %393 : vector<16x16xf32>
    %395 = arith.addf %394, %37 : vector<16x16xf32>
    %cst_312 = arith.constant dense<0xFF800000> : vector<16xf32>
    %396 = vector.multi_reduction <maximumf>, %395, %cst_312 [1] : vector<16x16xf32> to vector<16xf32>
    %397 = vector.shape_cast %396 : vector<16xf32> to vector<16x1xf32>
    %398 = vector.broadcast %397 : vector<16x1xf32> to vector<16x16xf32>
    %399 = arith.subf %395, %398 : vector<16x16xf32>
    %400 = math.exp %399 : vector<16x16xf32>
    %cst_313 = arith.constant dense<0.000000e+00> : vector<16xf32>
    %401 = vector.multi_reduction <add>, %400, %cst_313 [1] : vector<16x16xf32> to vector<16xf32>
    %402 = vector.shape_cast %401 : vector<16xf32> to vector<16x1xf32>
    %403 = vector.broadcast %402 : vector<16x1xf32> to vector<16x16xf32>
    %404 = arith.divf %400, %403 : vector<16x16xf32>
    %cst_314 = arith.constant dense<0.000000e+00> : vector<16x8xf32>
    %405 = tpu.matmul %404, %391, %cst_314 {dimension_numbers = #tpu.dot_dimension_numbers<[1], [0], [0], [1], [0, 0, 1, 1], [], []>} : vector<16x16xf32>, vector<16x8xf32>, vector<16x8xf32> -> vector<16x8xf32>
    %406 = arith.truncf %405 : vector<16x8xf32> to vector<16x8xbf16>
    %c1_315 = arith.constant 1 : index
    %c2_316 = arith.constant 2 : index
    %c0_317 = arith.constant 0 : index
    %c0_318 = arith.constant 0 : index
    %407 = vector.load %arg11[%c1_315, %c2_316, %c0_317, %c0_318] : memref<2x4x8x32xbf16, #tpu.memory_space<vmem>>, vector<1x1x8x32xbf16>
    %408 = vector.shape_cast %407 : vector<1x1x8x32xbf16> to vector<8x32xbf16>
    %cst_319 = arith.constant dense<0.000000e+00> : vector<16x32xf32>
    %409 = tpu.matmul %406, %408, %cst_319 {dimension_numbers = #tpu.dot_dimension_numbers<[1], [0], [0], [1], [0, 0, 1, 1], [], []>} : vector<16x8xbf16>, vector<8x32xbf16>, vector<16x32xf32> -> vector<16x32xf32>
    %410 = arith.addf %370, %409 : vector<16x32xf32>
    %c1_320 = arith.constant 1 : index
    %c3_321 = arith.constant 3 : index
    %c0_322 = arith.constant 0 : index
    %c0_323 = arith.constant 0 : index
    %411 = vector.load %arg5[%c1_320, %c3_321, %c0_322, %c0_323] : memref<2x4x32x8xbf16, #tpu.memory_space<vmem>>, vector<1x1x32x8xbf16>
    %412 = vector.shape_cast %411 : vector<1x1x32x8xbf16> to vector<32x8xbf16>
    %cst_324 = arith.constant dense<0.000000e+00> : vector<16x8xf32>
    %413 = tpu.matmul %289, %412, %cst_324 {dimension_numbers = #tpu.dot_dimension_numbers<[1], [0], [0], [1], [0, 0, 1, 1], [], []>} : vector<16x32xbf16>, vector<32x8xbf16>, vector<16x8xf32> -> vector<16x8xf32>
    %c1_325 = arith.constant 1 : index
    %c3_326 = arith.constant 3 : index
    %c0_327 = arith.constant 0 : index
    %c0_328 = arith.constant 0 : index
    %414 = vector.load %arg8[%c1_325, %c3_326, %c0_327, %c0_328] : memref<2x4x1x8xf32, #tpu.memory_space<vmem>>, vector<1x1x1x8xf32>
    %415 = vector.shape_cast %414 : vector<1x1x1x8xf32> to vector<1x8xf32>
    %416 = vector.broadcast %415 : vector<1x8xf32> to vector<16x8xf32>
    %417 = arith.addf %413, %416 : vector<16x8xf32>
    %c1_329 = arith.constant 1 : index
    %c3_330 = arith.constant 3 : index
    %c0_331 = arith.constant 0 : index
    %c0_332 = arith.constant 0 : index
    %418 = vector.load %arg6[%c1_329, %c3_330, %c0_331, %c0_332] : memref<2x4x32x8xbf16, #tpu.memory_space<vmem>>, vector<1x1x32x8xbf16>
    %419 = vector.shape_cast %418 : vector<1x1x32x8xbf16> to vector<32x8xbf16>
    %cst_333 = arith.constant dense<0.000000e+00> : vector<16x8xf32>
    %420 = tpu.matmul %289, %419, %cst_333 {dimension_numbers = #tpu.dot_dimension_numbers<[1], [0], [0], [1], [0, 0, 1, 1], [], []>} : vector<16x32xbf16>, vector<32x8xbf16>, vector<16x8xf32> -> vector<16x8xf32>
    %c1_334 = arith.constant 1 : index
    %c3_335 = arith.constant 3 : index
    %c0_336 = arith.constant 0 : index
    %c0_337 = arith.constant 0 : index
    %421 = vector.load %arg9[%c1_334, %c3_335, %c0_336, %c0_337] : memref<2x4x1x8xf32, #tpu.memory_space<vmem>>, vector<1x1x1x8xf32>
    %422 = vector.shape_cast %421 : vector<1x1x1x8xf32> to vector<1x8xf32>
    %423 = vector.broadcast %422 : vector<1x8xf32> to vector<16x8xf32>
    %424 = arith.addf %420, %423 : vector<16x8xf32>
    %c1_338 = arith.constant 1 : index
    %c3_339 = arith.constant 3 : index
    %c0_340 = arith.constant 0 : index
    %c0_341 = arith.constant 0 : index
    %425 = vector.load %arg7[%c1_338, %c3_339, %c0_340, %c0_341] : memref<2x4x32x8xbf16, #tpu.memory_space<vmem>>, vector<1x1x32x8xbf16>
    %426 = vector.shape_cast %425 : vector<1x1x32x8xbf16> to vector<32x8xbf16>
    %cst_342 = arith.constant dense<0.000000e+00> : vector<16x8xf32>
    %427 = tpu.matmul %289, %426, %cst_342 {dimension_numbers = #tpu.dot_dimension_numbers<[1], [0], [0], [1], [0, 0, 1, 1], [], []>} : vector<16x32xbf16>, vector<32x8xbf16>, vector<16x8xf32> -> vector<16x8xf32>
    %c1_343 = arith.constant 1 : index
    %c3_344 = arith.constant 3 : index
    %c0_345 = arith.constant 0 : index
    %c0_346 = arith.constant 0 : index
    %428 = vector.load %arg10[%c1_343, %c3_344, %c0_345, %c0_346] : memref<2x4x1x8xf32, #tpu.memory_space<vmem>>, vector<1x1x1x8xf32>
    %429 = vector.shape_cast %428 : vector<1x1x1x8xf32> to vector<1x8xf32>
    %430 = vector.broadcast %429 : vector<1x8xf32> to vector<16x8xf32>
    %431 = arith.addf %427, %430 : vector<16x8xf32>
    %cst_347 = arith.constant dense<0.000000e+00> : vector<16x16xf32>
    %432 = tpu.matmul %417, %424, %cst_347 {dimension_numbers = #tpu.dot_dimension_numbers<[1], [1], [0], [0], [0, 0, 1, 0], [], []>} : vector<16x8xf32>, vector<16x8xf32>, vector<16x16xf32> -> vector<16x16xf32>
    %cst_348 = arith.constant 0.353553385 : f32
    %433 = vector.broadcast %cst_348 : f32 to vector<16x16xf32>
    %434 = arith.mulf %432, %433 : vector<16x16xf32>
    %435 = arith.addf %434, %37 : vector<16x16xf32>
    %cst_349 = arith.constant dense<0xFF800000> : vector<16xf32>
    %436 = vector.multi_reduction <maximumf>, %435, %cst_349 [1] : vector<16x16xf32> to vector<16xf32>
    %437 = vector.shape_cast %436 : vector<16xf32> to vector<16x1xf32>
    %438 = vector.broadcast %437 : vector<16x1xf32> to vector<16x16xf32>
    %439 = arith.subf %435, %438 : vector<16x16xf32>
    %440 = math.exp %439 : vector<16x16xf32>
    %cst_350 = arith.constant dense<0.000000e+00> : vector<16xf32>
    %441 = vector.multi_reduction <add>, %440, %cst_350 [1] : vector<16x16xf32> to vector<16xf32>
    %442 = vector.shape_cast %441 : vector<16xf32> to vector<16x1xf32>
    %443 = vector.broadcast %442 : vector<16x1xf32> to vector<16x16xf32>
    %444 = arith.divf %440, %443 : vector<16x16xf32>
    %cst_351 = arith.constant dense<0.000000e+00> : vector<16x8xf32>
    %445 = tpu.matmul %444, %431, %cst_351 {dimension_numbers = #tpu.dot_dimension_numbers<[1], [0], [0], [1], [0, 0, 1, 1], [], []>} : vector<16x16xf32>, vector<16x8xf32>, vector<16x8xf32> -> vector<16x8xf32>
    %446 = arith.truncf %445 : vector<16x8xf32> to vector<16x8xbf16>
    %c1_352 = arith.constant 1 : index
    %c3_353 = arith.constant 3 : index
    %c0_354 = arith.constant 0 : index
    %c0_355 = arith.constant 0 : index
    %447 = vector.load %arg11[%c1_352, %c3_353, %c0_354, %c0_355] : memref<2x4x8x32xbf16, #tpu.memory_space<vmem>>, vector<1x1x8x32xbf16>
    %448 = vector.shape_cast %447 : vector<1x1x8x32xbf16> to vector<8x32xbf16>
    %cst_356 = arith.constant dense<0.000000e+00> : vector<16x32xf32>
    %449 = tpu.matmul %446, %448, %cst_356 {dimension_numbers = #tpu.dot_dimension_numbers<[1], [0], [0], [1], [0, 0, 1, 1], [], []>} : vector<16x8xbf16>, vector<8x32xbf16>, vector<16x32xf32> -> vector<16x32xf32>
    %450 = arith.addf %410, %449 : vector<16x32xf32>
    %451 = arith.addf %288, %450 : vector<16x32xf32>
    %c1_357 = arith.constant 1 : index
    %c0_358 = arith.constant 0 : index
    %c0_359 = arith.constant 0 : index
    %452 = vector.load %arg12[%c1_357, %c0_358, %c0_359] : memref<2x1x32xf32, #tpu.memory_space<vmem>>, vector<1x1x32xf32>
    %453 = vector.shape_cast %452 : vector<1x1x32xf32> to vector<1x32xf32>
    %454 = vector.broadcast %453 : vector<1x32xf32> to vector<16x32xf32>
    %455 = arith.addf %451, %454 : vector<16x32xf32>
    %c1_360 = arith.constant 1 : index
    %c0_361 = arith.constant 0 : index
    %c0_362 = arith.constant 0 : index
    %456 = vector.load %arg13[%c1_360, %c0_361, %c0_362] : memref<2x1x32xf32, #tpu.memory_space<vmem>>, vector<1x1x32xf32>
    %457 = vector.shape_cast %456 : vector<1x1x32xf32> to vector<1x32xf32>
    %c1_363 = arith.constant 1 : index
    %c0_364 = arith.constant 0 : index
    %c0_365 = arith.constant 0 : index
    %458 = vector.load %arg14[%c1_363, %c0_364, %c0_365] : memref<2x1x32xf32, #tpu.memory_space<vmem>>, vector<1x1x32xf32>
    %459 = vector.shape_cast %458 : vector<1x1x32xf32> to vector<1x32xf32>
    %cst_366 = arith.constant dense<0.000000e+00> : vector<16xf32>
    %460 = vector.multi_reduction <add>, %455, %cst_366 [1] : vector<16x32xf32> to vector<16xf32>
    %461 = vector.shape_cast %460 : vector<16xf32> to vector<16x1xf32>
    %cst_367 = arith.constant 3.200000e+01 : f32
    %462 = vector.broadcast %cst_367 : f32 to vector<16x1xf32>
    %463 = arith.divf %461, %462 : vector<16x1xf32>
    %464 = vector.broadcast %463 : vector<16x1xf32> to vector<16x32xf32>
    %465 = arith.subf %455, %464 : vector<16x32xf32>
    %466 = arith.mulf %465, %465 : vector<16x32xf32>
    %cst_368 = arith.constant dense<0.000000e+00> : vector<16xf32>
    %467 = vector.multi_reduction <add>, %466, %cst_368 [1] : vector<16x32xf32> to vector<16xf32>
    %468 = vector.shape_cast %467 : vector<16xf32> to vector<16x1xf32>
    %cst_369 = arith.constant 3.200000e+01 : f32
    %469 = vector.broadcast %cst_369 : f32 to vector<16x1xf32>
    %470 = arith.divf %468, %469 : vector<16x1xf32>
    %471 = vector.broadcast %463 : vector<16x1xf32> to vector<16x32xf32>
    %472 = arith.subf %455, %471 : vector<16x32xf32>
    %cst_370 = arith.constant 9.99999974E-6 : f32
    %473 = vector.broadcast %cst_370 : f32 to vector<16x1xf32>
    %474 = arith.addf %470, %473 : vector<16x1xf32>
    %475 = math.rsqrt %474 : vector<16x1xf32>
    %476 = vector.broadcast %475 : vector<16x1xf32> to vector<16x32xf32>
    %477 = arith.mulf %472, %476 : vector<16x32xf32>
    %478 = vector.broadcast %457 : vector<1x32xf32> to vector<16x32xf32>
    %479 = arith.mulf %477, %478 : vector<16x32xf32>
    %480 = vector.broadcast %459 : vector<1x32xf32> to vector<16x32xf32>
    %481 = arith.addf %479, %480 : vector<16x32xf32>
    %482 = arith.truncf %481 : vector<16x32xf32> to vector<16x32xbf16>
    %c1_371 = arith.constant 1 : index
    %c0_372 = arith.constant 0 : index
    %c0_373 = arith.constant 0 : index
    %483 = vector.load %arg15[%c1_371, %c0_372, %c0_373] : memref<2x32x2048xbf16, #tpu.memory_space<vmem>>, vector<1x32x2048xbf16>
    %484 = vector.shape_cast %483 : vector<1x32x2048xbf16> to vector<32x2048xbf16>
    %cst_374 = arith.constant dense<0.000000e+00> : vector<16x2048xf32>
    %485 = tpu.matmul %482, %484, %cst_374 {dimension_numbers = #tpu.dot_dimension_numbers<[1], [0], [0], [1], [0, 0, 1, 1], [], []>} : vector<16x32xbf16>, vector<32x2048xbf16>, vector<16x2048xf32> -> vector<16x2048xf32>
    %c1_375 = arith.constant 1 : index
    %c0_376 = arith.constant 0 : index
    %c0_377 = arith.constant 0 : index
    %486 = vector.load %arg16[%c1_375, %c0_376, %c0_377] : memref<2x1x2048xf32, #tpu.memory_space<vmem>>, vector<1x1x2048xf32>
    %487 = vector.shape_cast %486 : vector<1x1x2048xf32> to vector<1x2048xf32>
    %488 = vector.broadcast %487 : vector<1x2048xf32> to vector<16x2048xf32>
    %489 = arith.addf %485, %488 : vector<16x2048xf32>
    %cst_378 = arith.constant 0.000000e+00 : f32
    %490 = vector.broadcast %cst_378 : f32 to vector<16x2048xf32>
    %491 = arith.maximumf %489, %490 : vector<16x2048xf32>
    %492 = arith.truncf %491 : vector<16x2048xf32> to vector<16x2048xbf16>
    %c1_379 = arith.constant 1 : index
    %c0_380 = arith.constant 0 : index
    %c0_381 = arith.constant 0 : index
    %493 = vector.load %arg17[%c1_379, %c0_380, %c0_381] : memref<2x2048x32xbf16, #tpu.memory_space<vmem>>, vector<1x2048x32xbf16>
    %494 = vector.shape_cast %493 : vector<1x2048x32xbf16> to vector<2048x32xbf16>
    %cst_382 = arith.constant dense<0.000000e+00> : vector<16x32xf32>
    %495 = tpu.matmul %492, %494, %cst_382 {dimension_numbers = #tpu.dot_dimension_numbers<[1], [0], [0], [1], [0, 0, 1, 1], [], []>} : vector<16x2048xbf16>, vector<2048x32xbf16>, vector<16x32xf32> -> vector<16x32xf32>
    %c1_383 = arith.constant 1 : index
    %c0_384 = arith.constant 0 : index
    %c0_385 = arith.constant 0 : index
    %496 = vector.load %arg18[%c1_383, %c0_384, %c0_385] : memref<2x1x32xf32, #tpu.memory_space<vmem>>, vector<1x1x32xf32>
    %497 = vector.shape_cast %496 : vector<1x1x32xf32> to vector<1x32xf32>
    %498 = vector.broadcast %497 : vector<1x32xf32> to vector<16x32xf32>
    %499 = arith.addf %495, %498 : vector<16x32xf32>
    %500 = arith.addf %481, %499 : vector<16x32xf32>
    %c1_386 = arith.constant 1 : index
    %c0_387 = arith.constant 0 : index
    %c0_388 = arith.constant 0 : index
    %501 = vector.load %arg19[%c1_386, %c0_387, %c0_388] : memref<2x1x32xf32, #tpu.memory_space<vmem>>, vector<1x1x32xf32>
    %502 = vector.shape_cast %501 : vector<1x1x32xf32> to vector<1x32xf32>
    %c1_389 = arith.constant 1 : index
    %c0_390 = arith.constant 0 : index
    %c0_391 = arith.constant 0 : index
    %503 = vector.load %arg20[%c1_389, %c0_390, %c0_391] : memref<2x1x32xf32, #tpu.memory_space<vmem>>, vector<1x1x32xf32>
    %504 = vector.shape_cast %503 : vector<1x1x32xf32> to vector<1x32xf32>
    %cst_392 = arith.constant dense<0.000000e+00> : vector<16xf32>
    %505 = vector.multi_reduction <add>, %500, %cst_392 [1] : vector<16x32xf32> to vector<16xf32>
    %506 = vector.shape_cast %505 : vector<16xf32> to vector<16x1xf32>
    %cst_393 = arith.constant 3.200000e+01 : f32
    %507 = vector.broadcast %cst_393 : f32 to vector<16x1xf32>
    %508 = arith.divf %506, %507 : vector<16x1xf32>
    %509 = vector.broadcast %508 : vector<16x1xf32> to vector<16x32xf32>
    %510 = arith.subf %500, %509 : vector<16x32xf32>
    %511 = arith.mulf %510, %510 : vector<16x32xf32>
    %cst_394 = arith.constant dense<0.000000e+00> : vector<16xf32>
    %512 = vector.multi_reduction <add>, %511, %cst_394 [1] : vector<16x32xf32> to vector<16xf32>
    %513 = vector.shape_cast %512 : vector<16xf32> to vector<16x1xf32>
    %cst_395 = arith.constant 3.200000e+01 : f32
    %514 = vector.broadcast %cst_395 : f32 to vector<16x1xf32>
    %515 = arith.divf %513, %514 : vector<16x1xf32>
    %516 = vector.broadcast %508 : vector<16x1xf32> to vector<16x32xf32>
    %517 = arith.subf %500, %516 : vector<16x32xf32>
    %cst_396 = arith.constant 9.99999974E-6 : f32
    %518 = vector.broadcast %cst_396 : f32 to vector<16x1xf32>
    %519 = arith.addf %515, %518 : vector<16x1xf32>
    %520 = math.rsqrt %519 : vector<16x1xf32>
    %521 = vector.broadcast %520 : vector<16x1xf32> to vector<16x32xf32>
    %522 = arith.mulf %517, %521 : vector<16x32xf32>
    %523 = vector.broadcast %502 : vector<1x32xf32> to vector<16x32xf32>
    %524 = arith.mulf %522, %523 : vector<16x32xf32>
    %525 = vector.broadcast %504 : vector<1x32xf32> to vector<16x32xf32>
    %526 = arith.addf %524, %525 : vector<16x32xf32>
    %c0_397 = arith.constant 0 : index
    %c0_398 = arith.constant 0 : index
    %527 = vector.load %arg21[%c0_397, %c0_398] : memref<32x32xf32, #tpu.memory_space<vmem>>, vector<32x32xf32>
    %cst_399 = arith.constant dense<0.000000e+00> : vector<16x32xf32>
    %528 = tpu.matmul %526, %527, %cst_399 {dimension_numbers = #tpu.dot_dimension_numbers<[1], [0], [0], [1], [0, 0, 1, 1], [], []>} : vector<16x32xf32>, vector<32x32xf32>, vector<16x32xf32> -> vector<16x32xf32>
    %c0_400 = arith.constant 0 : index
    %c0_401 = arith.constant 0 : index
    %529 = vector.load %arg22[%c0_400, %c0_401] : memref<1x32xf32, #tpu.memory_space<vmem>>, vector<1x32xf32>
    %530 = vector.broadcast %529 : vector<1x32xf32> to vector<16x32xf32>
    %531 = arith.addf %528, %530 : vector<16x32xf32>
    %cst_402 = arith.constant 0.000000e+00 : f32
    %532 = vector.broadcast %cst_402 : f32 to vector<16x32xf32>
    %533 = arith.maximumf %531, %532 : vector<16x32xf32>
    %c0_403 = arith.constant 0 : index
    %c0_404 = arith.constant 0 : index
    %534 = vector.load %arg23[%c0_403, %c0_404] : memref<32x2xf32, #tpu.memory_space<vmem>>, vector<32x2xf32>
    %cst_405 = arith.constant dense<0.000000e+00> : vector<16x2xf32>
    %535 = tpu.matmul %533, %534, %cst_405 {dimension_numbers = #tpu.dot_dimension_numbers<[1], [0], [0], [1], [0, 0, 1, 1], [], []>} : vector<16x32xf32>, vector<32x2xf32>, vector<16x2xf32> -> vector<16x2xf32>
    %c0_406 = arith.constant 0 : index
    %c0_407 = arith.constant 0 : index
    %536 = vector.load %arg24[%c0_406, %c0_407] : memref<1x2xf32, #tpu.memory_space<vmem>>, vector<1x2xf32>
    %537 = vector.broadcast %536 : vector<1x2xf32> to vector<16x2xf32>
    %538 = arith.addf %535, %537 : vector<16x2xf32>
    %cst_408 = arith.constant dense<0xFF800000> : vector<16xf32>
    %539 = vector.multi_reduction <maximumf>, %538, %cst_408 [1] : vector<16x2xf32> to vector<16xf32>
    %540 = vector.shape_cast %539 : vector<16xf32> to vector<16x1xf32>
    %541 = vector.broadcast %540 : vector<16x1xf32> to vector<16x2xf32>
    %542 = arith.subf %538, %541 : vector<16x2xf32>
    %543 = math.exp %542 : vector<16x2xf32>
    %cst_409 = arith.constant dense<0.000000e+00> : vector<16xf32>
    %544 = vector.multi_reduction <add>, %543, %cst_409 [1] : vector<16x2xf32> to vector<16xf32>
    %545 = vector.shape_cast %544 : vector<16xf32> to vector<16x1xf32>
    %546 = math.log %545 : vector<16x1xf32>
    %547 = vector.broadcast %546 : vector<16x1xf32> to vector<16x2xf32>
    %548 = arith.subf %542, %547 : vector<16x2xf32>
    %549 = math.exp %548 : vector<16x2xf32>
    %550 = arith.mulf %549, %548 : vector<16x2xf32>
    %cst_410 = arith.constant dense<0.000000e+00> : vector<16xf32>
    %551 = vector.multi_reduction <add>, %550, %cst_410 [1] : vector<16x2xf32> to vector<16xf32>
    %552 = vector.shape_cast %551 : vector<16xf32> to vector<16x1xf32>
    %cst_411 = arith.constant 0.000000e+00 : f32
    %553 = vector.broadcast %cst_411 : f32 to vector<16x1xf32>
    %554 = arith.subf %553, %552 : vector<16x1xf32>
    %c0_412 = arith.constant 0 : index
    %c0_413 = arith.constant 0 : index
    %555 = vector.load %arg28[%c0_412, %c0_413] : memref<16x1xf32, #tpu.memory_space<vmem>>, vector<16x1xf32>
    tpu.vector_store %arg28[%c0_412, %c0_413], %554 {strides = array<i32>} : memref<16x1xf32, #tpu.memory_space<vmem>>, vector<16x1xf32>,
    %556 = tpu.iota {dimensions = array<i32: 1>} : vector<16x2xi32>
    %c0_414 = arith.constant 0 : index
    %c0_415 = arith.constant 0 : index
    %557 = vector.load %arg25[%c0_414, %c0_415] : memref<16x2xf32, #tpu.memory_space<vmem>>, vector<16x2xf32>
    %558 = arith.addf %538, %557 : vector<16x2xf32>
    %cst_416 = arith.constant dense<0xFF800000> : vector<16xf32>
    %559 = vector.multi_reduction <maximumf>, %558, %cst_416 [1] : vector<16x2xf32> to vector<16xf32>
    %560 = vector.shape_cast %559 : vector<16xf32> to vector<16x1xf32>
    %561 = vector.broadcast %560 : vector<16x1xf32> to vector<16x2xf32>
    %562 = arith.cmpf oge, %558, %561 : vector<16x2xf32>
    %c2_i32_417 = arith.constant 2 : i32
    %563 = vector.broadcast %c2_i32_417 : i32 to vector<16x2xi32>
    %564 = arith.select %562, %556, %563 : vector<16x2xi1>, vector<16x2xi32>
    %cst_418 = arith.constant dense<2147483647> : vector<16xi32>
    %565 = vector.multi_reduction <minsi>, %564, %cst_418 [1] : vector<16x2xi32> to vector<16xi32>
    %566 = vector.shape_cast %565 : vector<16xi32> to vector<16x1xi32>
    %c0_419 = arith.constant 0 : index
    %c0_420 = arith.constant 0 : index
    %567 = vector.load %arg26[%c0_419, %c0_420] : memref<16x1xi32, #tpu.memory_space<vmem>>, vector<16x1xi32>
    tpu.vector_store %arg26[%c0_419, %c0_420], %566 {strides = array<i32>} : memref<16x1xi32, #tpu.memory_space<vmem>>, vector<16x1xi32>,
    %568 = vector.broadcast %566 : vector<16x1xi32> to vector<16x2xi32>
    %569 = arith.cmpi eq, %556, %568 : vector<16x2xi32>
    %570 = arith.extui %569 : vector<16x2xi1> to vector<16x2xi32>
    %571 = arith.sitofp %570 : vector<16x2xi32> to vector<16x2xf32>
    %572 = arith.mulf %548, %571 : vector<16x2xf32>
    %cst_421 = arith.constant dense<0.000000e+00> : vector<16xf32>
    %573 = vector.multi_reduction <add>, %572, %cst_421 [1] : vector<16x2xf32> to vector<16xf32>
    %574 = vector.shape_cast %573 : vector<16xf32> to vector<16x1xf32>
    %c0_422 = arith.constant 0 : index
    %c0_423 = arith.constant 0 : index
    %575 = vector.load %arg27[%c0_422, %c0_423] : memref<16x1xf32, #tpu.memory_space<vmem>>, vector<16x1xf32>
    tpu.vector_store %arg27[%c0_422, %c0_423], %574 {strides = array<i32>} : memref<16x1xf32, #tpu.memory_space<vmem>>, vector<16x1xf32>,
    return
  }
}

</mosaic_0001>

<bundles_post_ra>
// kernel: tpu_custom_call.1
= control target key start
LH: loop header
LB: loop body
LE: loop exit
PB: predicated region body
PF: predicated region fallthrough
CT: control target
= control target key end

     0   :  { %vm146_vm0 = vcmask 1043456   ;;  %vm139_vm1 = vcmask 31744   ;;  %vm183_vm2 = vcmask 261120   ;;  %vm319_vm3 = vcmask 64512   ;;  %s10778_s1 = inlined_call_operand.vmem [shape: f32[4,32], index: 1, kind: input, shape index: {}]   ;;  %s10779_s0 = inlined_call_operand.vmem [shape: f32[16,4], index: 0, kind: input, shape index: {}]   ;;  %s10780_s3 = inlined_call_operand.vmem [shape: f32[32,32], index: 3, kind: input, shape index: {}]   ;;  %s10781_s2 = inlined_call_operand.vmem [shape: f32[1,32], index: 2, kind: input, shape index: {}]   ;;  %s10782_s4 = inlined_call_operand.vmem [shape: f32[1,32], index: 4, kind: input, shape index: {}]   ;;  %s10783_s10 = inlined_call_operand.vmem [shape: f32[2,4,1,8], index: 10, kind: input, shape index: {}]   ;;  %s10784_s5 = inlined_call_operand.vmem [shape: bf16[2,4,32,8], index: 5, kind: input, shape index: {}]   ;;  %s10785_s6 = inlined_call_operand.vmem [shape: bf16[2,4,32,8], index: 6, kind: input, shape index: {}]   ;;  %s10786_s7 = inlined_call_operand.vmem [shape: bf16[2,4,32,8], index: 7, kind: input, shape index: {}]   ;;  %s10787_s8 = inlined_call_operand.vmem [shape: f32[2,4,1,8], index: 8, kind: input, shape index: {}]   ;;  %s10788_s9 = inlined_call_operand.vmem [shape: f32[2,4,1,8], index: 9, kind: input, shape index: {}]   ;;  %s10789_s11 = inlined_call_operand.vmem [shape: bf16[2,4,8,32], index: 11, kind: input, shape index: {}]   ;;  %s10790_s12 = inlined_call_operand.vmem [shape: f32[2,1,32], index: 12, kind: input, shape index: {}]   ;;  %s10791_s13 = inlined_call_operand.vmem [shape: f32[2,1,32], index: 13, kind: input, shape index: {}]   ;;  %s10792_s14 = inlined_call_operand.vmem [shape: f32[2,1,32], index: 14, kind: input, shape index: {}]   ;;  %s10793_s15 = inlined_call_operand.vmem [shape: bf16[2,32,2048], index: 15, kind: input, shape index: {}]   ;;  %s10794_s17 = inlined_call_operand.vmem [shape: bf16[2,2048,32], index: 17, kind: input, shape index: {}]   ;;  %s10795_s16 = inlined_call_operand.vmem [shape: f32[2,1,2048], index: 16, kind: input, shape index: {}]   ;;  %s10796_s18 = inlined_call_operand.vmem [shape: f32[2,1,32], index: 18, kind: input, shape index: {}]   ;;  %s10797_s19 = inlined_call_operand.vmem [shape: f32[2,1,32], index: 19, kind: input, shape index: {}]   ;;  %s10798_s20 = inlined_call_operand.vmem [shape: f32[2,1,32], index: 20, kind: input, shape index: {}]   ;;  %s10799_s22 = inlined_call_operand.vmem [shape: f32[1,32], index: 22, kind: input, shape index: {}]   ;;  %s10800_s21 = inlined_call_operand.vmem [shape: f32[32,32], index: 21, kind: input, shape index: {}]   ;;  %s10801_s23 = inlined_call_operand.vmem [shape: f32[32,2], index: 23, kind: input, shape index: {}]   ;;  %s10802_s24 = inlined_call_operand.vmem [shape: f32[1,2], index: 24, kind: input, shape index: {}]   ;;  %s10803_s25 = inlined_call_operand.vmem [shape: f32[16,2], index: 25, kind: input, shape index: {}]   ;;  %s10804_s26 = inlined_call_operand.vmem [shape: s32[16,1], index: 26, kind: output, shape index: {0}]   ;;  %s10805_s28 = inlined_call_operand.vmem [shape: f32[16,1], index: 28, kind: output, shape index: {2}]   ;;  %s10806_s27 = inlined_call_operand.vmem [shape: f32[16,1], index: 27, kind: output, shape index: {1}]  }
   0x1   :  { %10821 = sst [smem:[#allocation2_spill]] %s10778_s1  ;;  %v87_v52 = vlaneseq  ;;  %v8672_v59 = vmov -1e+30   ;;  %vm359_vm5 = vcmask 130048  }
   0x2   :  { %10822 = sst [smem:[#allocation3_spill]] %s10779_s0 }
   0x3   :  { %10823 = sst [smem:[#allocation4_spill]] %s10780_s3  ;;  %v88_v53 = vshrl.u32 %v87_v52, 7  ;;  %v8924_v54 = vand.u32 127, %v87_v52 }
   0x4   :  { %10824 = sst [smem:[#allocation5_spill]] %s10781_s2 }
   0x5   :  { %10825 = sst [smem:[#allocation6_spill]] %s10782_s4  ;;  %v94_v55 = vand.u32 1, %v88_v53  ;;  %v120_v56 = vand.u32 1, %v8924_v54  ;;  %v89_v57 = vadd.s32 8, %v88_v53 }
   0x6   :  { %10826 = sst [smem:[#allocation7_spill]] %s10783_s10 }
   0x7   :  { %10827 = sst [smem:[#allocation8_spill]] %s10784_s5  ;;  %vm128_vm4 = vcmp.eq.s32.totalorder %v94_v55, %v120_v56  ;;  %v101_v62 = vand.u32 1, %v89_v57 }
   0x8   :  { %10828 = sst [smem:[#allocation9_spill]] %s10785_s6  ;;  %v8927_v60 = vsel %vm128_vm4, 0.0, %v8672_v59 }
   0x9   :  { %10829 = sst [smem:[#allocation10_spill]] %s10786_s7  ;;  %vm129_vm6 = vcmp.eq.s32.totalorder %v101_v62, %v120_v56 }
   0xa   :  { %10830 = sst [smem:[#allocation11_spill]] %s10787_s8 }
   0xb   :  { %10831 = sst [smem:[#allocation12_spill]] %s10788_s9 }
   0xc   :  { %10832 = sst [smem:[#allocation13_spill]] %s10789_s11 }
   0xd   :  { %10833 = sst [smem:[#allocation14_spill]] %s10790_s12 }
   0xe   :  { %10834 = sst [smem:[#allocation15_spill]] %s10802_s24 }
   0xf   :  { %10835 = sst [smem:[#allocation16_spill]] %s10803_s25 }
  0x10   :  { %10836 = sst [smem:[#allocation17_spill]] %s10804_s26 }
  0x11   :  { %10837 = sst [smem:[#allocation18_spill]] %s10805_s28 }
  0x12   :  { %10838 = sst [smem:[#allocation19_spill]] %s10806_s27 }
  0x13   :  { %s10839_s10 = sld [smem:[#allocation2_spill]] }
  0x14   :  { %s10840_s5 = sld [smem:[#allocation3_spill]] }
  0x15   :  { %s10841_s11 = sld [smem:[#allocation4_spill]] }
  0x16   :  { %s10842_s2 = sld [smem:[#allocation5_spill]] }
  0x17   :  { %s10843_s0 = sld [smem:[#allocation8_spill]] }
  0x18   :  { %s10844_s3 = sld [smem:[#allocation9_spill]] }
  0x19   :  { %v134_v0 = vld [vmem:[%s10839_s10] sm:$0xf]  ;;  %s10845_s1 = sld [smem:[#allocation10_spill]] }
  0x1a   :  { %v132_v1 = vld [vmem:[%s10840_s5] sm:$0xff]  ;;  %6164 = vmatpush.msk.msra.mxu0 %vm146_vm0, %v134_v0  ;;  %v133_v3 = vld [vmem:[%s10840_s5 + $0x8] sm:$0xff]  ;;  %s10846_s30 = sld [smem:[#allocation6_spill]] }
  0x1b   :  { %v178_v2 = vld [vmem:[%s10841_s11 + $0x18] sm:$0xff]  ;;  %6165 = vmatmul.msk.f32.vlgmr.msra.gmra.mxu0 %vm139_vm1, %v132_v1  ;;  %v177_v4 = vld [vmem:[%s10841_s11 + $0x10] sm:$0xff]  ;;  %v176_v5 = vld [vmem:[%s10841_s11 + $0x8] sm:$0xff]  ;;  %s10847_s9 = sld [smem:[#allocation7_spill]] }
  0x1c   :  { %202 = vmatpush.msra.mxu1 %v178_v2  ;;  %v175_v6 = vld [vmem:[%s10841_s11] sm:$0xff]  ;;  %s10848_s6 = sld [smem:[#allocation12_spill]]  ;;  %v8931_v2 = vsel %vm129_vm6, 0.0, %v8672_v59 }
  0x1d   :  { %v8538_v7 = vld [vmem:[%s10842_s2] ss:$0 sm:$0xff]  ;;  %v8168_v14 = vld [vmem:[%s10843_s0 + $0x8] sm:$0xff]  ;;  %v8174_v20 = vld [vmem:[%s10843_s0 + $0x18] sm:$0xff]  ;;  %s10849_s7 = sld [smem:[#allocation11_spill]] }
  0x1e   :  { %203 = vmatpush.msra.mxu1 %v177_v4  ;;  %v8170_v15 = vld [vmem:[%s10844_s3 + $0x8] sm:$0xff]  ;;  %243 = vmatpush.bf16.msra.mxu2 %v8168_v14  ;;  %v8167_v17 = vld [vmem:[%s10843_s0] sm:$0xff]  ;;  %v8176_v21 = vld [vmem:[%s10844_s3 + $0x18] sm:$0xff]  ;;  %s10850_s12 = sld [smem:[#allocation13_spill]] }
  0x1f   :  { %v8172_v16 = vld [vmem:[%s10845_s1 + $0x8] sm:$0xff]  ;;  %277 = vmatpush.bf16.msra.mxu3 %v8170_v15  ;;  %v8169_v18 = vld [vmem:[%s10844_s3] sm:$0xff]  ;;  %v8173_v22 = vld [vmem:[%s10843_s0 + $0x10] sm:$0xff]  ;;  %s10851_s4 = sld [smem:[#allocation14_spill]] }
  0x20   :  { %204 = vmatpush.msra.mxu1 %v176_v5  ;;  %311 = vmatpush.bf16.msrb.mxu0 %v8172_v16  ;;  %v8171_v19 = vld [vmem:[%s10845_s1] sm:$0xff]  ;;  %v8175_v23 = vld [vmem:[%s10844_s3 + $0x10] sm:$0xff]  ;;  %v8178_v42 = vld [vmem:[%s10845_s1 + $0x18] sm:$0xff]  ;;  %s10852_s26 = sld [smem:[#allocation15_spill]] }
  0x21   :  { %v8539_v25 = vld [vmem:[%s10846_s30] ss:$0 sm:$0xff]  ;;  %v8177_v45 = vld [vmem:[%s10845_s1 + $0x10] sm:$0xff]  ;;  %s10853_s25 = sld [smem:[#allocation16_spill]] }
  0x22   :  { %205 = vmatpush.msra.mxu1 %v175_v6  ;;  %244 = vmatpush.bf16.msra.mxu2 %v8167_v17  ;;  %v8540_v32 = vld [vmem:[%s10847_s9] ss:$0 sm:$0xff]  ;;  %v8543_v46 = vld [vmem:[%s10848_s6 + $0x1] ss:$0 sm:$0xff]  ;;  %s10854_s27 = sld [smem:[#allocation17_spill]] }
  0x23   :  { %6166 = vmatmul.msk.f32.gmra.mxu0 %vm139_vm1, %v133_v3  ;;  %278 = vmatpush.bf16.msra.mxu3 %v8169_v18  ;;  %v8542_v36 = vld [vmem:[%s10848_s6] ss:$0 sm:$0xff]  ;;  %s10855_s11 = sld [smem:[#allocation18_spill]] }
  0x24   :  { %312 = vmatpush.bf16.msrb.mxu0 %v8171_v19  ;;  %v8541_v41 = vld [vmem:[%s10849_s7] ss:$0 sm:$0xff] }
  0x25   :  { %v438_v56 = vld [vmem:[%s10850_s12] sm:$0xf] }
  0x26   :  { %v690_v57 = vsel %vm146_vm0, %v438_v56, 0 }
  0x27   :  { %467 = vmatpush.bf16.msrb.mxu3 %v8174_v20 }
  0x28   :  { %503 = vmatpush.bf16.msra.mxu0 %v8176_v21 }
  0x2b   :  { %468 = vmatpush.bf16.msrb.mxu3 %v8173_v22 }
  0x2c   :  { %504 = vmatpush.bf16.msra.mxu0 %v8175_v23 }
  0x98   :  { %v167_v8 = vpop.f32.mrf.mxu0 }
  0x99   :  { %v168_v9 = vadd.f32 %v8538_v7, %v167_v8 }
  0x9b   :  { %v173_v10 = vmax.f32 %v168_v9, 0.0 }
  0x9d   :  { %6167 = vmatmul.msk.f32.vlgmr.msra.gmra.mxu1 %vm183_vm2, %v173_v10 }
  0xa0   :  { %v170_v11 = vpop.f32.mrf.mxu0 }
  0xa1   :  { %v171_v12 = vadd.f32 %v8538_v7, %v170_v11  ;;  %v8545_v7 = vld [vmem:[%s10847_s9 + $0x1] ss:$0 sm:$0xff] }
  0xa3   :  { %v174_v13 = vmax.f32 %v171_v12, 0.0 }
  0xa5   :  { %6168 = vmatmul.msk.f32.gmra.mxu1 %vm183_vm2, %v174_v13 }
 0x11a   :  { %v207_v24 = vpop.f32.mrf.mxu1 }
 0x11b   :  { %v8880_v27 = vadd.f32 %v8539_v25, %v207_v24 }
 0x122   :  { %v210_v26 = vpop.f32.mrf.mxu1 }
 0x123   :  { %v8882_v28 = vadd.f32 %v8539_v25, %v210_v26 }
 0x125   :  { %v8886_v29 = vpack.c.bf16 %v8882_v28, %v8880_v27 }
 0x127   :  { %6177 = vmatmul.msk.bf16.vlgmr.msra.gmra.mxu2 %vm183_vm2, %v8886_v29  ;;  %6186 = vmatmul.msk.bf16.vlgmr.msra.gmra.mxu3 %vm183_vm2, %v8886_v29 }
 0x128   :  { %6195 = vmatmul.msk.bf16.vlgmr.msrb.gmra.mxu0 %vm183_vm2, %v8886_v29 }
 0x137   :  { %6215 = vmatmul.msk.bf16.vlgmr.msrb.gmra.mxu3 %vm183_vm2, %v8886_v29 }
 0x138   :  { %6229 = vmatmul.msk.bf16.vlgmr.msra.gmra.mxu0 %vm183_vm2, %v8886_v29 }
 0x1a5   :  { %v314_v30 = vpop.f32.mrf.mxu0 }
 0x1a6   :  { %v315_v35 = vadd.f32 %v8540_v32, %v314_v30 }
 0x1aa   :  { %v280_v31 = vpop.f32.mrf.mxu3  ;;  %v246_v39 = vpop.f32.mrf.mxu2 }
 0x1ab   :  { %v281_v43 = vadd.f32 %v8542_v36, %v280_v31  ;;  %v247_v44 = vadd.f32 %v8541_v41, %v246_v39 }
 0x1ad   :  { %v316_v33 = vpop.f32.mrf.mxu0 }
 0x1ae   :  { %v317_v34 = vadd.f32 %v8540_v32, %v316_v33 }
 0x1b0   :  { %428 = vmatpush.msrb.mxu2 %v317_v34 }
 0x1b2   :  { %429 = vmatpush.msrb.mxu2 %v315_v35  ;;  %v282_v37 = vpop.f32.mrf.mxu3  ;;  %v248_v49 = vpop.f32.mrf.mxu2 }
 0x1b3   :  { %v283_v38 = vadd.f32 %v8542_v36, %v282_v37  ;;  %v249_v50 = vadd.f32 %v8541_v41, %v248_v49 }
 0x1b5   :  { %v506_v40 = vpop.f32.mrf.mxu0  ;;  %6196 = vmatpush.xpose.msk.msrb.mxu1 %vm319_vm3, %v283_v38  ;;  %v8180_v38 = vld [vmem:[%s10843_s0 + $0x28] sm:$0xff] }
 0x1b6   :  { %v507_v51 = vadd.f32 %v8543_v46, %v506_v40 }
 0x1b9   :  { %6197 = vmatpush.xpose.msk.msrb.mxu1 %vm319_vm3, %v281_v43 }
 0x1bc   :  { %6198 = vmatmul.msk.f32.vlgmr.msrb.gmra.mxu1 %vm319_vm3, %v247_v44  ;;  %v8179_v44 = vld [vmem:[%s10843_s0 + $0x20] sm:$0xff] }
 0x1bd   :  { %539 = vmatpush.bf16.msra.mxu1 %v8178_v42  ;;  %v508_v47 = vpop.f32.mrf.mxu0 }
 0x1be   :  { %v509_v48 = vadd.f32 %v8543_v46, %v508_v47 }
 0x1c0   :  { %6244 = vmatpush.xpose.msk.msra.mxu2 %vm319_vm3, %v509_v48 }
 0x1c1   :  { %540 = vmatpush.bf16.msra.mxu1 %v8177_v45 }
 0x1c4   :  { %6245 = vmatpush.xpose.msk.msra.mxu2 %vm319_vm3, %v507_v51  ;;  %6199 = vmatmul.msk.f32.gmra.mxu1 %vm319_vm3, %v249_v50  ;;  %v470_v50 = vpop.f32.mrf.mxu3  ;;  %v8544_v51 = vld [vmem:[%s10849_s7 + $0x1] ss:$0 sm:$0xff] }
 0x1c5   :  { %v471_v52 = vadd.f32 %v8544_v51, %v470_v50  ;;  %699 = vmatpush.bf16.msrb.mxu1 %v690_v57  ;;  %v8547_v57 = vld [vmem:[%s10848_s6 + $0x2] ss:$0 sm:$0xff] }
 0x1cc   :  { %6243 = vmatmul.msk.bf16.vlgmr.msra.gmra.mxu1 %vm183_vm2, %v8886_v29  ;;  %v472_v53 = vpop.f32.mrf.mxu3 }
 0x1cd   :  { %v473_v55 = vadd.f32 %v8544_v51, %v472_v53 }
 0x239   :  { %v349_v58 = vpop.f32.mrf.mxu1 }
 0x23a   :  { %v355_v61 = vmul.f32 0.35355338, %v349_v58 }
 0x23c   :  { %v357_v63 = vadd.f32 %v355_v61, %v8927_v60 }
 0x23e   :  { %v360_v0 = vsel %vm359_vm5, %v357_v63, -inf }
 0x23f   :  { %361 = vmax.xlane.f32.xlu0 %v360_v0 }
 0x241   :  { %v352_v1 = vpop.f32.mrf.mxu1 }
 0x242   :  { %v356_v3 = vmul.f32 0.35355338, %v352_v1 }
 0x244   :  { %v358_v4 = vadd.f32 %v356_v3, %v8931_v2 }
 0x246   :  { %v363_v5 = vsel %vm359_vm5, %v358_v4, -inf }
 0x247   :  { %364 = vmax.xlane.f32.xlu0 %v363_v5 }
 0x249   :  { %v542_v6 = vpop.f32.mrf.mxu1 }
 0x24a   :  { %v543_v10 = vadd.f32 %v8545_v7, %v542_v6 }
 0x251   :  { %v544_v8 = vpop.f32.mrf.mxu1 }
 0x252   :  { %v545_v9 = vadd.f32 %v8545_v7, %v544_v8 }
 0x254   :  { %654 = vmatpush.msra.mxu3 %v545_v9 }
 0x256   :  { %655 = vmatpush.msra.mxu3 %v543_v10 }
 0x2b2   :  { %v362_v11 = vpop.xlane.xlu0 %361 }
 0x2b3   :  { %v366_v12 = vsub.f32 %v357_v63, %v362_v11 }
 0x2b5   :  { %v368_v13 = vmul.f32 1.442695, %v366_v12 }
 0x2b7   :  { %8578 = vpow2.f32 %v368_v13 }
 0x2ba   :  { %v365_v14 = vpop.xlane.xlu0 %364 }
 0x2bb   :  { %v367_v15 = vsub.f32 %v358_v4, %v365_v14 }
 0x2bd   :  { %v8579_v16 = vpop.eup %8578  ;;  %v370_v17 = vmul.f32 1.442695, %v367_v15 }
 0x2be   :  { %v372_v18 = vsel %vm359_vm5, %v8579_v16, 0.0 }
 0x2bf   :  { %8580 = vpow2.f32 %v370_v17  ;;  %373 = vadd.xlane.f32.xlu1 %v372_v18  ;;  %v8182_v17 = vld [vmem:[%s10844_s3 + $0x28] sm:$0xff]  ;;  %v8181_v18 = vld [vmem:[%s10844_s3 + $0x20] sm:$0xff] }
 0x2c0   :  { %770 = vmatpush.bf16.msrb.mxu3 %v8182_v17 }
 0x2c4   :  { %771 = vmatpush.bf16.msrb.mxu3 %v8181_v18 }
 0x2c5   :  { %v8581_v19 = vpop.eup %8580 }
 0x2c6   :  { %v375_v20 = vsel %vm359_vm5, %v8581_v19, 0.0 }
 0x2c7   :  { %376 = vadd.xlane.f32.xlu1 %v375_v20 }
 0x332   :  { %v374_v21 = vpop.xlane.xlu1 %373 }
 0x333   :  { %8582 = vrcp.f32 %v374_v21  ;;  %v389_v26 = vand.u32 2147483648, %v374_v21  ;;  %v387_v31 = vand.u32 2147483647, %v374_v21  ;;  %vm383_vm8 = vweird.f32 %v374_v21 }
 0x335   :  { %v390_v34 = vor.u32 1.1754944e-38, %v389_v26  ;;  %vm388_vm10 = vcmp.eq.f32.partialorder %v387_v31, 8.507059e+37 }
 0x339   :  { %v8583_v22 = vpop.eup %8582 }
 0x33a   :  { %v379_v23 = vmul.f32 %v8583_v22, %v374_v21  ;;  %v377_v24 = vpop.xlane.xlu1 %376  ;;  %vm384_vm7 = vweird.f32 %v8583_v22 }
 0x33b   :  { %8584 = vrcp.f32 %v377_v24  ;;  %vm385_vm9 = vmor %vm383_vm8, %vm384_vm7  ;;  %v404_v41 = vand.u32 2147483648, %v377_v24  ;;  %v402_v43 = vand.u32 2147483647, %v377_v24  ;;  %vm398_vm12 = vweird.f32 %v377_v24 }
 0x33c   :  { %v380_v25 = vsub.f32 1.0, %v379_v23 }
 0x33d   :  { %v405_v46 = vor.u32 1.1754944e-38, %v404_v41  ;;  %vm403_vm14 = vcmp.eq.f32.partialorder %v402_v43, 8.507059e+37 }
 0x33e   :  { %v381_v30 = vmul.f32 %v8583_v22, %v380_v25 }
 0x340   :  { %v382_v32 = vadd.f32 %v8583_v22, %v381_v30 }
 0x341   :  { %v8585_v33 = vpop.eup %8584 }
 0x342   :  { %v394_v35 = vmul.f32 %v8585_v33, %v377_v24  ;;  %v386_v36 = vsel %vm385_vm9, %v8583_v22, %v382_v32  ;;  %vm399_vm11 = vweird.f32 %v8585_v33 }
 0x343   :  { %v391_v37 = vsel %vm388_vm10, %v390_v34, %v386_v36  ;;  %vm400_vm13 = vmor %vm398_vm12, %vm399_vm11 }
 0x344   :  { %v395_v39 = vsub.f32 1.0, %v394_v35  ;;  %v392_v40 = vmul.f32 %v8579_v16, %v391_v37 }
 0x346   :  { %v396_v42 = vmul.f32 %v8585_v33, %v395_v39  ;;  %6200 = vmatmul.msk.f32.vlgmr.msrb.gmra.mxu2 %vm359_vm5, %v392_v40 }
 0x347   :  { %734 = vmatpush.bf16.msrb.mxu2 %v8180_v38 }
 0x348   :  { %v397_v45 = vadd.f32 %v8585_v33, %v396_v42 }
 0x34a   :  { %v401_v47 = vsel %vm400_vm13, %v8585_v33, %v397_v45 }
 0x34b   :  { %v406_v48 = vsel %vm403_vm14, %v405_v46, %v401_v47  ;;  %735 = vmatpush.bf16.msrb.mxu2 %v8179_v44  ;;  %v6250_v46 = vld [vmem:[%s10850_s12 + $0x4] sm:$0xf] }
 0x34c   :  { %v407_v49 = vmul.f32 %v8581_v19, %v406_v48  ;;  %v670_v47 = vsel %vm146_vm0, %v6250_v46, 0  ;;  %v8184_v48 = vld [vmem:[%s10845_s1 + $0x28] sm:$0xff] }
 0x34d   :  { %679 = vmatpush.bf16.msrb.mxu0 %v670_v47 }
 0x34e   :  { %6201 = vmatmul.msk.f32.gmra.mxu2 %vm359_vm5, %v407_v49  ;;  %v8183_v49 = vld [vmem:[%s10845_s1 + $0x20] sm:$0xff] }
 0x351   :  { %806 = vmatpush.bf16.msra.mxu0 %v8184_v48 }
 0x355   :  { %807 = vmatpush.bf16.msra.mxu0 %v8183_v49 }
 0x356   :  { %6246 = vmatmul.msk.f32.vlgmr.msra.gmra.mxu2 %vm319_vm3, %v471_v52  ;;  %v8186_v52 = vld [vmem:[%s10843_s0 + $0x38] sm:$0xff] }
 0x35e   :  { %6247 = vmatmul.msk.f32.gmra.mxu2 %vm319_vm3, %v473_v55  ;;  %v8185_v55 = vld [vmem:[%s10843_s0 + $0x30] sm:$0xff] }
 0x366   :  { %6266 = vmatmul.msk.bf16.vlgmr.msrb.gmra.mxu2 %vm183_vm2, %v8886_v29 }
 0x3c9   :  { %v431_v58 = vpop.f32.mrf.mxu2 }
 0x3d1   :  { %v434_v59 = vpop.f32.mrf.mxu2 }
 0x3d2   :  { %v437_v61 = vpack.c.bf16 %v434_v59, %v431_v58 }
 0x3d4   :  { %6252 = vmatmul.msk.bf16.vlgmr.msrb.gmra.mxu1 %vm319_vm3, %v437_v61 }
 0x3d9   :  { %v576_v62 = vpop.f32.mrf.mxu2 }
 0x3da   :  { %v582_v63 = vmul.f32 0.35355338, %v576_v62  ;;  %v8546_v62 = vld [vmem:[%s10849_s7 + $0x2] ss:$0 sm:$0xff] }
 0x3dc   :  { %v584_v0 = vadd.f32 %v582_v63, %v8927_v60  ;;  %v8188_v63 = vld [vmem:[%s10844_s3 + $0x38] sm:$0xff] }
 0x3de   :  { %v586_v1 = vsel %vm359_vm5, %v584_v0, -inf }
 0x3df   :  { %587 = vmax.xlane.f32.xlu2 %v586_v1 }
 0x3e1   :  { %v579_v3 = vpop.f32.mrf.mxu2 }
 0x3e2   :  { %v583_v4 = vmul.f32 0.35355338, %v579_v3  ;;  %v8187_v3 = vld [vmem:[%s10844_s3 + $0x30] sm:$0xff] }
 0x3e4   :  { %v585_v5 = vadd.f32 %v583_v4, %v8931_v2 }
 0x3e6   :  { %v589_v6 = vsel %vm359_vm5, %v585_v5, -inf }
 0x3e7   :  { %590 = vmax.xlane.f32.xlu2 %v589_v6 }
 0x3e9   :  { %v737_v61 = vpop.f32.mrf.mxu2 }
 0x3ea   :  { %v738_v1 = vadd.f32 %v8546_v62, %v737_v61 }
 0x3f1   :  { %v739_v4 = vpop.f32.mrf.mxu2 }
 0x452   :  { %v588_v7 = vpop.xlane.xlu2 %587 }
 0x453   :  { %v592_v8 = vsub.f32 %v584_v0, %v588_v7  ;;  %v9017_v7 = vpop.f32.mrf.mxu1 }
 0x455   :  { %v594_v9 = vmul.f32 1.442695, %v592_v8 }
 0x457   :  { %8586 = vpow2.f32 %v594_v9 }
 0x45a   :  { %v591_v10 = vpop.xlane.xlu2 %590 }
 0x45b   :  { %v593_v11 = vsub.f32 %v585_v5, %v591_v10  ;;  %v740_v5 = vadd.f32 %v8546_v62, %v739_v4  ;;  %v9021_v9 = vpop.f32.mrf.mxu1 }
 0x45d   :  { %v8587_v12 = vpop.eup %8586  ;;  %v596_v13 = vmul.f32 1.442695, %v593_v11  ;;  %v6301_v11 = vld [vmem:[%s10850_s12 + $0x8] sm:$0xf] }
 0x45e   :  { %v598_v14 = vsel %vm359_vm5, %v8587_v12, 0.0 }
 0x45f   :  { %8588 = vpow2.f32 %v596_v13  ;;  %599 = vadd.xlane.f32.xlu0 %v598_v14  ;;  %v8548_v13 = vld [vmem:[%s10847_s9 + $0x2] ss:$0 sm:$0xff] }
 0x465   :  { %v8589_v15 = vpop.eup %8588 }
 0x466   :  { %v601_v16 = vsel %vm359_vm5, %v8589_v15, 0.0 }
 0x467   :  { %602 = vadd.xlane.f32.xlu1 %v601_v16 }
 0x4d2   :  { %v600_v19 = vpop.xlane.xlu0 %599 }
 0x4d3   :  { %8590 = vrcp.f32 %v600_v19  ;;  %v615_v24 = vand.u32 2147483648, %v600_v19  ;;  %v613_v26 = vand.u32 2147483647, %v600_v19  ;;  %vm609_vm1 = vweird.f32 %v600_v19 }
 0x4d5   :  { %v616_v32 = vor.u32 1.1754944e-38, %v615_v24  ;;  %vm614_vm6 = vcmp.eq.f32.partialorder %v613_v26, 8.507059e+37  ;;  %v8550_v26 = vld [vmem:[%s10848_s6 + $0x3] ss:$0 sm:$0xff] }
 0x4d9   :  { %v8591_v20 = vpop.eup %8590 }
 0x4da   :  { %v605_v21 = vmul.f32 %v8591_v20, %v600_v19  ;;  %v603_v22 = vpop.xlane.xlu1 %602  ;;  %vm610_vm15 = vweird.f32 %v8591_v20 }
 0x4db   :  { %8592 = vrcp.f32 %v603_v22  ;;  %vm611_vm4 = vmor %vm609_vm1, %vm610_vm15  ;;  %v630_v38 = vand.u32 2147483648, %v603_v22  ;;  %v628_v40 = vand.u32 2147483647, %v603_v22  ;;  %vm624_vm8 = vweird.f32 %v603_v22 }
 0x4dc   :  { %v606_v23 = vsub.f32 1.0, %v605_v21 }
 0x4dd   :  { %v631_v42 = vor.u32 1.1754944e-38, %v630_v38  ;;  %vm629_vm10 = vcmp.eq.f32.partialorder %v628_v40, 8.507059e+37 }
 0x4de   :  { %v607_v25 = vmul.f32 %v8591_v20, %v606_v23 }
 0x4e0   :  { %v608_v30 = vadd.f32 %v8591_v20, %v607_v25 }
 0x4e1   :  { %v8593_v31 = vpop.eup %8592 }
 0x4e2   :  { %v612_v33 = vsel %vm611_vm4, %v8591_v20, %v608_v30  ;;  %v620_v34 = vmul.f32 %v8593_v31, %v603_v22  ;;  %vm625_vm7 = vweird.f32 %v8593_v31 }
 0x4e3   :  { %v617_v35 = vsel %vm614_vm6, %v616_v32, %v612_v33  ;;  %vm626_vm9 = vmor %vm624_vm8, %vm625_vm7 }
 0x4e4   :  { %v621_v36 = vsub.f32 1.0, %v620_v34  ;;  %v618_v37 = vmul.f32 %v8587_v12, %v617_v35  ;;  %v937_v12 = vsel %vm146_vm0, %v6301_v11, 0 }
 0x4e6   :  { %v622_v39 = vmul.f32 %v8593_v31, %v621_v36  ;;  %6248 = vmatmul.msk.f32.vlgmr.msra.gmra.mxu3 %vm359_vm5, %v618_v37 }
 0x4e7   :  { %946 = vmatpush.bf16.msra.mxu3 %v937_v12 }
 0x4e8   :  { %v623_v41 = vadd.f32 %v8593_v31, %v622_v39 }
 0x4ea   :  { %v627_v43 = vsel %vm626_vm9, %v8593_v31, %v623_v41 }
 0x4eb   :  { %v632_v44 = vsel %vm629_vm10, %v631_v42, %v627_v43  ;;  %v8190_v43 = vld [vmem:[%s10845_s1 + $0x38] sm:$0xff] }
 0x4ec   :  { %v633_v45 = vmul.f32 %v8589_v15, %v632_v44  ;;  %v8189_v44 = vld [vmem:[%s10845_s1 + $0x30] sm:$0xff] }
 0x4ee   :  { %6249 = vmatmul.msk.f32.gmra.mxu3 %vm359_vm5, %v633_v45 }
 0x4f6   :  { %6280 = vmatmul.msk.bf16.vlgmr.msrb.gmra.mxu3 %vm183_vm2, %v8886_v29 }
 0x569   :  { %v657_v50 = vpop.f32.mrf.mxu3 }
 0x571   :  { %v660_v51 = vpop.f32.mrf.mxu3 }
 0x572   :  { %v663_v53 = vpack.c.bf16 %v660_v51, %v657_v50 }
 0x574   :  { %6251 = vmatmul.msk.bf16.vlgmr.msrb.gmra.mxu0 %vm319_vm3, %v663_v53 }
 0x575   :  { %983 = vmatpush.bf16.msrb.mxu0 %v8186_v52 }
 0x579   :  { %v773_v56 = vpop.f32.mrf.mxu3  ;;  %984 = vmatpush.bf16.msrb.mxu0 %v8185_v55 }
 0x57a   :  { %v774_v0 = vadd.f32 %v8547_v57, %v773_v56 }
 0x581   :  { %v775_v58 = vpop.f32.mrf.mxu3 }
 0x582   :  { %v776_v59 = vadd.f32 %v8547_v57, %v775_v58 }
 0x584   :  { %6294 = vmatmul.msk.bf16.vlgmr.msra.gmra.mxu0 %vm183_vm2, %v8886_v29  ;;  %6295 = vmatpush.xpose.msk.msra.mxu1 %vm319_vm3, %v776_v59 }
 0x588   :  { %6296 = vmatpush.xpose.msk.msra.mxu1 %vm319_vm3, %v774_v0 }
 0x58b   :  { %6297 = vmatmul.msk.f32.vlgmr.msra.gmra.mxu1 %vm319_vm3, %v738_v1 }
 0x58c   :  { %1019 = vmatpush.bf16.msrb.mxu1 %v8188_v63 }
 0x590   :  { %1020 = vmatpush.bf16.msrb.mxu1 %v8187_v3 }
 0x593   :  { %6298 = vmatmul.msk.f32.gmra.mxu1 %vm319_vm3, %v740_v5 }
 0x594   :  { %6316 = vmatmul.msk.bf16.vlgmr.msrb.gmra.mxu0 %vm183_vm2, %v8886_v29 }
 0x59b   :  { %6330 = vmatmul.msk.bf16.vlgmr.msrb.gmra.mxu1 %vm183_vm2, %v8886_v29 }
 0x5f1   :  { %v9015_v6 = vpop.f32.mrf.mxu0 }
 0x5f9   :  { %v9019_v8 = vpop.f32.mrf.mxu0 }
 0x601   :  { %v809_v10 = vpop.f32.mrf.mxu0 }
 0x602   :  { %v810_v19 = vadd.f32 %v8548_v13, %v809_v10 }
 0x608   :  { %v843_v14 = vpop.f32.mrf.mxu1 }
 0x609   :  { %v849_v15 = vmul.f32 0.35355338, %v843_v14  ;;  %v811_v16 = vpop.f32.mrf.mxu0 }
 0x60a   :  { %v812_v17 = vadd.f32 %v8548_v13, %v811_v16 }
 0x60b   :  { %v851_v18 = vadd.f32 %v849_v15, %v8927_v60 }
 0x60c   :  { %921 = vmatpush.msra.mxu2 %v812_v17  ;;  %v8549_v17 = vld [vmem:[%s10849_s7 + $0x3] ss:$0 sm:$0xff] }
 0x60d   :  { %v853_v20 = vsel %vm359_vm5, %v851_v18, -inf }
 0x60e   :  { %922 = vmatpush.msra.mxu2 %v810_v19  ;;  %854 = vmax.xlane.f32.xlu2 %v853_v20 }
 0x610   :  { %v846_v21 = vpop.f32.mrf.mxu1  ;;  %1055 = vmatpush.bf16.msrb.mxu2 %v8190_v43 }
 0x611   :  { %v850_v22 = vmul.f32 0.35355338, %v846_v21  ;;  %v986_v16 = vpop.f32.mrf.mxu0 }
 0x612   :  { %v987_v20 = vadd.f32 %v8549_v17, %v986_v16 }
 0x613   :  { %v852_v23 = vadd.f32 %v850_v22, %v8931_v2 }
 0x614   :  { %1056 = vmatpush.bf16.msrb.mxu2 %v8189_v44 }
 0x615   :  { %v856_v24 = vsel %vm359_vm5, %v852_v23, -inf }
 0x616   :  { %857 = vmax.xlane.f32.xlu0 %v856_v24 }
 0x618   :  { %v1022_v25 = vpop.f32.mrf.mxu1 }
 0x619   :  { %v1023_v32 = vadd.f32 %v8550_v26, %v1022_v25 }
 0x620   :  { %v1024_v30 = vpop.f32.mrf.mxu1 }
 0x621   :  { %v1025_v31 = vadd.f32 %v8550_v26, %v1024_v30 }
 0x623   :  { %6345 = vmatpush.xpose.msk.msrb.mxu3 %vm319_vm3, %v1025_v31 }
 0x627   :  { %6346 = vmatpush.xpose.msk.msrb.mxu3 %vm319_vm3, %v1023_v32 }
 0x681   :  { %v855_v33 = vpop.xlane.xlu2 %854 }
 0x682   :  { %v859_v34 = vsub.f32 %v851_v18, %v855_v33  ;;  %v8551_v18 = vld [vmem:[%s10847_s9 + $0x3] ss:$0 sm:$0xff] }
 0x684   :  { %v861_v35 = vmul.f32 1.442695, %v859_v34 }
 0x686   :  { %8594 = vpow2.f32 %v861_v35 }
 0x689   :  { %v858_v36 = vpop.xlane.xlu0 %857 }
 0x68a   :  { %v860_v37 = vsub.f32 %v852_v23, %v858_v36 }
 0x68c   :  { %v8595_v38 = vpop.eup %8594  ;;  %v863_v39 = vmul.f32 1.442695, %v860_v37 }
 0x68d   :  { %v865_v40 = vsel %vm359_vm5, %v8595_v38, 0.0 }
 0x68e   :  { %8596 = vpow2.f32 %v863_v39  ;;  %866 = vadd.xlane.f32.xlu1 %v865_v40 }
 0x694   :  { %v8597_v41 = vpop.eup %8596 }
 0x695   :  { %v868_v42 = vsel %vm359_vm5, %v8597_v41, 0.0 }
 0x696   :  { %869 = vadd.xlane.f32.xlu2 %v868_v42 }
 0x701   :  { %v867_v45 = vpop.xlane.xlu1 %866 }
 0x702   :  { %8598 = vrcp.f32 %v867_v45  ;;  %v882_v50 = vand.u32 2147483648, %v867_v45  ;;  %v880_v52 = vand.u32 2147483647, %v867_v45  ;;  %vm876_vm12 = vweird.f32 %v867_v45 }
 0x704   :  { %v883_v56 = vor.u32 1.1754944e-38, %v882_v50  ;;  %vm881_vm14 = vcmp.eq.f32.partialorder %v880_v52, 8.507059e+37 }
 0x708   :  { %v8599_v46 = vpop.eup %8598 }
 0x709   :  { %v872_v47 = vmul.f32 %v8599_v46, %v867_v45  ;;  %v870_v48 = vpop.xlane.xlu2 %869  ;;  %vm877_vm11 = vweird.f32 %v8599_v46 }
 0x70a   :  { %8600 = vrcp.f32 %v870_v48  ;;  %vm878_vm13 = vmor %vm876_vm12, %vm877_vm11  ;;  %v897_v63 = vand.u32 2147483648, %v870_v48  ;;  %v895_v1 = vand.u32 2147483647, %v870_v48  ;;  %vm891_vm1 = vweird.f32 %v870_v48 }
 0x70b   :  { %v873_v49 = vsub.f32 1.0, %v872_v47 }
 0x70c   :  { %v898_v4 = vor.u32 1.1754944e-38, %v897_v63  ;;  %vm896_vm6 = vcmp.eq.f32.partialorder %v895_v1, 8.507059e+37 }
 0x70d   :  { %v874_v51 = vmul.f32 %v8599_v46, %v873_v49 }
 0x70f   :  { %v875_v53 = vadd.f32 %v8599_v46, %v874_v51 }
 0x710   :  { %v8601_v55 = vpop.eup %8600 }
 0x711   :  { %v879_v57 = vsel %vm878_vm13, %v8599_v46, %v875_v53  ;;  %v887_v58 = vmul.f32 %v8601_v55, %v870_v48  ;;  %vm892_vm15 = vweird.f32 %v8601_v55 }
 0x712   :  { %v884_v59 = vsel %vm881_vm14, %v883_v56, %v879_v57  ;;  %vm893_vm4 = vmor %vm891_vm1, %vm892_vm15 }
 0x713   :  { %v888_v61 = vsub.f32 1.0, %v887_v58  ;;  %v885_v62 = vmul.f32 %v8595_v38, %v884_v59 }
 0x715   :  { %v889_v0 = vmul.f32 %v8601_v55, %v888_v61  ;;  %6299 = vmatmul.msk.f32.vlgmr.msra.gmra.mxu2 %vm359_vm5, %v885_v62 }
 0x717   :  { %v890_v3 = vadd.f32 %v8601_v55, %v889_v0 }
 0x719   :  { %v894_v5 = vsel %vm893_vm4, %v8601_v55, %v890_v3 }
 0x71a   :  { %v899_v10 = vsel %vm896_vm6, %v898_v4, %v894_v5 }
 0x71b   :  { %v900_v11 = vmul.f32 %v8597_v41, %v899_v10 }
 0x71d   :  { %6300 = vmatmul.msk.f32.gmra.mxu2 %vm359_vm5, %v900_v11 }
 0x725   :  { %6344 = vmatmul.msk.bf16.vlgmr.msrb.gmra.mxu2 %vm183_vm2, %v8886_v29  ;;  %v988_v29 = vpop.f32.mrf.mxu0 }
 0x726   :  { %v989_v23 = vadd.f32 %v8549_v17, %v988_v29  ;;  %v8552_v29 = vld [vmem:[%s10851_s4] ss:$0 sm:$0xff] }
 0x798   :  { %v924_v12 = vpop.f32.mrf.mxu2 }
 0x7a0   :  { %v927_v13 = vpop.f32.mrf.mxu2 }
 0x7a1   :  { %v930_v14 = vpack.c.bf16 %v927_v13, %v924_v12 }
 0x7a3   :  { %6302 = vmatmul.msk.bf16.vlgmr.msra.gmra.mxu3 %vm319_vm3, %v930_v14  ;;  %v6351_v14 = vld [vmem:[%s10850_s12 + $0xc] sm:$0xf] }
 0x7a8   :  { %v1058_v15 = vpop.f32.mrf.mxu2 }
 0x7a9   :  { %v1059_v22 = vadd.f32 %v8551_v18, %v1058_v15  ;;  %v1186_v15 = vsel %vm146_vm0, %v6351_v14, 0  ;;  %v6365_v14 = vld [vmem:[%s10793_s15 + $0x48] sm:$0xf0] }
 0x7aa   :  { %1195 = vmatpush.bf16.msra.mxu1 %v1186_v15 }
 0x7b0   :  { %v1060_v19 = vpop.f32.mrf.mxu2 }
 0x7b1   :  { %v1061_v21 = vadd.f32 %v8551_v18, %v1060_v19  ;;  %v702_v19 = vadd.f32 %v9017_v7, %v9015_v6 }
 0x7b3   :  { %6347 = vmatmul.msk.f32.vlgmr.msrb.gmra.mxu3 %vm319_vm3, %v987_v20  ;;  %1170 = vmatpush.msra.mxu0 %v1061_v21 }
 0x7b5   :  { %1171 = vmatpush.msra.mxu0 %v1059_v22 }
 0x7bb   :  { %6348 = vmatmul.msk.f32.gmra.mxu3 %vm319_vm3, %v989_v23 }
 0x826   :  { %v9060_v24 = vpop.f32.mrf.mxu3 }
 0x827   :  { %v953_v20 = vadd.f32 %v9060_v24, %v702_v19  ;;  %v8217_v19 = vld [vmem:[%s10793_s15 + $0xcc] sm:$0xf0] }
 0x82e   :  { %v9062_v25 = vpop.f32.mrf.mxu3 }
 0x836   :  { %v1092_v26 = vpop.f32.mrf.mxu3 }
 0x837   :  { %v1098_v30 = vmul.f32 0.35355338, %v1092_v26  ;;  %v704_v26 = vadd.f32 %v9021_v9, %v9019_v8 }
 0x839   :  { %v1100_v31 = vadd.f32 %v1098_v30, %v8927_v60 }
 0x83b   :  { %v1102_v32 = vsel %vm359_vm5, %v1100_v31, -inf }
 0x83c   :  { %1103 = vmax.xlane.f32.xlu0 %v1102_v32 }
 0x83e   :  { %v1095_v33 = vpop.f32.mrf.mxu3 }
 0x83f   :  { %v1099_v34 = vmul.f32 0.35355338, %v1095_v33 }
 0x841   :  { %v1101_v35 = vadd.f32 %v1099_v34, %v8931_v2 }
 0x843   :  { %v1105_v36 = vsel %vm359_vm5, %v1101_v35, -inf }
 0x844   :  { %1106 = vmax.xlane.f32.xlu1 %v1105_v36 }
 0x8af   :  { %v1104_v37 = vpop.xlane.xlu0 %1103 }
 0x8b0   :  { %v1108_v38 = vsub.f32 %v1100_v31, %v1104_v37  ;;  %v954_v31 = vadd.f32 %v9062_v25, %v704_v26  ;;  %v8218_v26 = vld [vmem:[%s10793_s15 + $0xd4] sm:$0xf0] }
 0x8b2   :  { %v1110_v39 = vmul.f32 1.442695, %v1108_v38 }
 0x8b4   :  { %8602 = vpow2.f32 %v1110_v39 }
 0x8b7   :  { %v1107_v40 = vpop.xlane.xlu1 %1106 }
 0x8b8   :  { %v1109_v41 = vsub.f32 %v1101_v35, %v1107_v40  ;;  %v8673_v35 = vmov 32.0  }
 0x8ba   :  { %v8603_v42 = vpop.eup %8602  ;;  %v1112_v43 = vmul.f32 1.442695, %v1109_v41 }
 0x8bb   :  { %v1114_v44 = vsel %vm359_vm5, %v8603_v42, 0.0 }
 0x8bc   :  { %8604 = vpow2.f32 %v1112_v43  ;;  %1115 = vadd.xlane.f32.xlu2 %v1114_v44 }
 0x8c2   :  { %v8605_v45 = vpop.eup %8604 }
 0x8c3   :  { %v1117_v46 = vsel %vm359_vm5, %v8605_v45, 0.0 }
 0x8c4   :  { %1118 = vadd.xlane.f32.xlu0 %v1117_v46 }
 0x92f   :  { %v1116_v47 = vpop.xlane.xlu2 %1115 }
 0x930   :  { %8606 = vrcp.f32 %v1116_v47  ;;  %v1131_v52 = vand.u32 2147483648, %v1116_v47  ;;  %v1129_v55 = vand.u32 2147483647, %v1116_v47  ;;  %vm1125_vm8 = vweird.f32 %v1116_v47 }
 0x932   :  { %v1132_v58 = vor.u32 1.1754944e-38, %v1131_v52  ;;  %vm1130_vm10 = vcmp.eq.f32.partialorder %v1129_v55, 8.507059e+37  ;;  %v6427_v52 = vld [vmem:[%s10793_s15 + $0x88] sm:$0xf] }
 0x936   :  { %v8607_v48 = vpop.eup %8606 }
 0x937   :  { %v1121_v49 = vmul.f32 %v8607_v48, %v1116_v47  ;;  %v1119_v50 = vpop.xlane.xlu0 %1118  ;;  %vm1126_vm7 = vweird.f32 %v8607_v48  ;;  %v6419_v47 = vld [vmem:[%s10793_s15 + $0x80] sm:$0xf] }
 0x938   :  { %8608 = vrcp.f32 %v1119_v50  ;;  %vm1127_vm9 = vmor %vm1125_vm8, %vm1126_vm7  ;;  %v1146_v1 = vand.u32 2147483648, %v1119_v50  ;;  %v1144_v4 = vand.u32 2147483647, %v1119_v50  ;;  %vm1140_vm12 = vweird.f32 %v1119_v50 }
 0x939   :  { %v1122_v51 = vsub.f32 1.0, %v1121_v49  ;;  %8610 = vrcp.f32 %v8673_v35  ;;  %v8207_v49 = vld [vmem:[%s10793_s15 + $0x84] sm:$0xf]  ;;  %v8201_v35 = vld [vmem:[%s10793_s15 + $0x4c] sm:$0xf0] }
 0x93a   :  { %v1147_v10 = vor.u32 1.1754944e-38, %v1146_v1  ;;  %vm1145_vm14 = vcmp.eq.f32.partialorder %v1144_v4, 8.507059e+37  ;;  %v8191_v1 = vld [vmem:[%s10793_s15 + $0x4] sm:$0xf] }
 0x93b   :  { %v1123_v53 = vmul.f32 %v8607_v48, %v1122_v51  ;;  %v6421_v51 = vld [vmem:[%s10793_s15 + $0xc0] sm:$0xf0] }
 0x93d   :  { %v1124_v56 = vadd.f32 %v8607_v48, %v1123_v53  ;;  %v8216_v53 = vld [vmem:[%s10793_s15 + $0xc4] sm:$0xf0] }
 0x93e   :  { %v8609_v57 = vpop.eup %8608 }
 0x93f   :  { %v1128_v59 = vsel %vm1127_vm9, %v8607_v48, %v1124_v56  ;;  %v1136_v61 = vmul.f32 %v8609_v57, %v1119_v50  ;;  %vm1141_vm11 = vweird.f32 %v8609_v57  ;;  %v8215_v48 = vld [vmem:[%s10793_s15 + $0xbc] sm:$0xf0]  ;;  %v6424_v56 = vor.u32 %v8207_v49, %v6421_v51 }
 0x940   :  { %v1133_v62 = vsel %vm1130_vm10, %v1132_v58, %v1128_v59  ;;  %vm1142_vm13 = vmor %vm1140_vm12, %vm1141_vm11  ;;  %v6420_v50 = vor.u32 %v8215_v48, %v6419_v47  ;;  %v8208_v58 = vld [vmem:[%s10793_s15 + $0x8c] sm:$0xf] }
 0x941   :  { %v1137_v63 = vsub.f32 1.0, %v1136_v61  ;;  %v1134_v0 = vmul.f32 %v8603_v42, %v1133_v62  ;;  %v6429_v59 = vld [vmem:[%s10793_s15 + $0xc8] sm:$0xf0]  ;;  %1527 = vmatpush.bf16.msra.mxu3 %v6424_v56  ;;  %v8553_v56 = vld [vmem:[%s10791_s13] ss:$0 sm:$0xff] }
 0x942   :  { %1513 = vmatpush.bf16.msra.mxu2 %v6420_v50  ;;  %v6432_v62 = vor.u32 %v8208_v58, %v6429_v59 }
 0x943   :  { %v1138_v3 = vmul.f32 %v8609_v57, %v1137_v63  ;;  %6349 = vmatmul.msk.f32.vlgmr.msra.gmra.mxu0 %vm359_vm5, %v1134_v0  ;;  %v6355_v63 = vld [vmem:[%s10793_s15] sm:$0xf] }
 0x944   :  { %v8199_v0 = vld [vmem:[%s10793_s15 + $0x3c] sm:$0xf0]  ;;  %1555 = vmatpush.bf16.msrb.mxu1 %v6432_v62 }
 0x945   :  { %v1139_v5 = vadd.f32 %v8609_v57, %v1138_v3  ;;  %v6356_v4 = vor.u32 %v8199_v0, %v6355_v63 }
 0x947   :  { %v1143_v11 = vsel %vm1142_vm13, %v8609_v57, %v1139_v5  ;;  %v6428_v57 = vor.u32 %v8216_v53, %v6427_v52  ;;  %v6357_v5 = vld [vmem:[%s10793_s15 + $0x40] sm:$0xf0]  ;;  %1514 = vmatpush.bf16.msra.mxu2 %v6356_v4 }
 0x948   :  { %v1148_v12 = vsel %vm1145_vm14, %v1147_v10, %v1143_v11  ;;  %v6363_v10 = vld [vmem:[%s10793_s15 + $0x8] sm:$0xf]  ;;  %v6360_v11 = vor.u32 %v8191_v1, %v6357_v5  ;;  %v6451_v1 = vld [vmem:[%s10793_s15 + $0xa0] sm:$0xf]  ;;  %v6453_v4 = vld [vmem:[%s10793_s15 + $0xe0] sm:$0xf0] }
 0x949   :  { %v1149_v13 = vmul.f32 %v8605_v45, %v1148_v12  ;;  %1541 = vmatpush.bf16.msrb.mxu0 %v6428_v57  ;;  %v8200_v12 = vld [vmem:[%s10793_s15 + $0x44] sm:$0xf0] }
 0x94a   :  { %v6364_v15 = vor.u32 %v8200_v12, %v6363_v10  ;;  %1528 = vmatpush.bf16.msra.mxu3 %v6360_v11  ;;  %v8220_v11 = vld [vmem:[%s10793_s15 + $0xe4] sm:$0xf0]  ;;  %v8212_v12 = vld [vmem:[%s10793_s15 + $0xac] sm:$0xf] }
 0x94b   :  { %6350 = vmatmul.msk.f32.gmra.mxu0 %vm359_vm5, %v1149_v13  ;;  %v8192_v13 = vld [vmem:[%s10793_s15 + $0xc] sm:$0xf] }
 0x94d   :  { %1542 = vmatpush.bf16.msrb.mxu0 %v6364_v15 }
 0x9c0   :  { %v1173_v16 = vpop.f32.mrf.mxu0 }
 0x9c8   :  { %v1176_v17 = vpop.f32.mrf.mxu0 }
 0x9c9   :  { %v1179_v18 = vpack.c.bf16 %v1176_v17, %v1173_v16  ;;  %v6368_v16 = vor.u32 %v8192_v13, %v6365_v14  ;;  %v6461_v13 = vld [vmem:[%s10793_s15 + $0xe8] sm:$0xf0] }
 0x9cb   :  { %6352 = vmatmul.msk.bf16.vlgmr.msra.gmra.mxu1 %vm319_vm3, %v1179_v18  ;;  %v6435_v18 = vld [vmem:[%s10793_s15 + $0x90] sm:$0xf] }
 0x9cc   :  { %1556 = vmatpush.bf16.msrb.mxu1 %v6368_v16 }
 0xa48   :  { %v1197_v21 = vpop.f32.mrf.mxu1 }
 0xa49   :  { %v1202_v22 = vadd.f32 %v1197_v21, %v953_v20  ;;  %v8209_v20 = vld [vmem:[%s10793_s15 + $0x94] sm:$0xf] }
 0xa4b   :  { %v1204_v23 = vadd.f32 %v1202_v22, %v8880_v27  ;;  %v8611_v27 = vpop.eup %8610  ;;  %v6436_v22 = vor.u32 %v8217_v19, %v6435_v18  ;;  %v8203_v18 = vld [vmem:[%s10793_s15 + $0x5c] sm:$0xf0] }
 0xa4c   :  { %v1221_v36 = vmul.f32 32.0, %v8611_v27  ;;  %vm1225_vm15 = vweird.f32 %v8611_v27 }
 0xa4d   :  { %v1210_v30 = vadd.f32 %v8552_v29, %v1204_v23  ;;  %v6443_v23 = vld [vmem:[%s10793_s15 + $0x98] sm:$0xf]  ;;  %1569 = vmatpush.bf16.msrb.mxu2 %v6436_v22  ;;  %v6389_v22 = vld [vmem:[%s10793_s15 + $0x60] sm:$0xf0] }
 0xa4e   :  { %v1222_v37 = vsub.f32 1.0, %v1221_v36 }
 0xa4f   :  { %v1214_v32 = vsel %vm183_vm2, %v1210_v30, 0.0 }
 0xa50   :  { %v1199_v33 = vpop.f32.mrf.mxu1  ;;  %1215 = vadd.xlane.f32.xlu1 %v1214_v32  ;;  %v1223_v8 = vmul.f32 %v8611_v27, %v1222_v37  ;;  %v8210_v32 = vld [vmem:[%s10793_s15 + $0x9c] sm:$0xf] }
 0xa51   :  { %v1203_v6 = vadd.f32 %v1199_v33, %v954_v31  ;;  %v6444_v31 = vor.u32 %v8218_v26, %v6443_v23  ;;  %v6445_v33 = vld [vmem:[%s10793_s15 + $0xd8] sm:$0xf0]  ;;  %v8204_v23 = vld [vmem:[%s10793_s15 + $0x64] sm:$0xf0]  ;;  %v8196_v26 = vld [vmem:[%s10793_s15 + $0x2c] sm:$0xf] }
 0xa52   :  { %v1224_v9 = vadd.f32 %v8611_v27, %v1223_v8  ;;  %v6373_v8 = vld [vmem:[%s10793_s15 + $0x50] sm:$0xf0] }
 0xa53   :  { %v1205_v7 = vadd.f32 %v1203_v6, %v8882_v28  ;;  %v6371_v6 = vld [vmem:[%s10793_s15 + $0x10] sm:$0xf]  ;;  %1597 = vmatpush.bf16.msra.mxu0 %v6444_v31 }
 0xa54   :  { %v9090_v25 = vsel %vm1225_vm15, %v8611_v27, %v1224_v9  ;;  %v8193_v27 = vld [vmem:[%s10793_s15 + $0x14] sm:$0xf]  ;;  %v6372_v37 = vor.u32 %v8201_v35, %v6371_v6  ;;  %v6379_v9 = vld [vmem:[%s10793_s15 + $0x18] sm:$0xf] }
 0xa55   :  { %v1211_v24 = vadd.f32 %v8552_v29, %v1205_v7  ;;  %v6437_v29 = vld [vmem:[%s10793_s15 + $0xd0] sm:$0xf0] }
 0xa56   :  { %1570 = vmatpush.bf16.msrb.mxu2 %v6372_v37  ;;  %v6469_v35 = vld [vmem:[%s10793_s15 + $0xf0] sm:$0xf0]  ;;  %v8214_v37 = vld [vmem:[%s10793_s15 + $0xbc] sm:$0xf] }
 0xa57   :  { %v1217_v34 = vsel %vm183_vm2, %v1211_v24, 0.0 }
 0xa58   :  { %1218 = vadd.xlane.f32.xlu2 %v1217_v34  ;;  %v6448_v34 = vor.u32 %v8210_v32, %v6445_v33 }
 0xa5a   :  { %1611 = vmatpush.bf16.msra.mxu1 %v6448_v34  ;;  %v8213_v34 = vld [vmem:[%s10793_s15 + $0xb4] sm:$0xf] }
 0xac3   :  { %v1216_v38 = vpop.xlane.xlu1 %1215 }
 0xac4   :  { %v1227_v39 = vmul.f32 %v9090_v25, %v1216_v38  ;;  %v8202_v38 = vld [vmem:[%s10793_s15 + $0x54] sm:$0xf0] }
 0xac6   :  { %v9093_v40 = vsub.f32 %v1210_v30, %v1227_v39  ;;  %v6440_v30 = vor.u32 %v8209_v20, %v6437_v29  ;;  %v6376_v39 = vor.u32 %v8193_v27, %v6373_v8  ;;  %v6464_v20 = vor.u32 %v8212_v12, %v6461_v13  ;;  %v6395_v29 = vld [vmem:[%s10793_s15 + $0x28] sm:$0xf]  ;;  %v6475_v27 = vld [vmem:[%s10793_s15 + $0xb8] sm:$0xf]  ;;  %v6477_v8 = vld [vmem:[%s10793_s15 + $0xf8] sm:$0xf0] }
 0xac7   :  { %v6396_v33 = vor.u32 %v8204_v23, %v6395_v29  ;;  %v8235_v12 = vld [vmem:[%s10794_s17 + $0x60] sm:$0xff]  ;;  %v8242_v13 = vld [vmem:[%s10794_s17 + $0x98] sm:$0xff]  ;;  %v8224_v29 = vld [vmem:[%s10794_s17 + $0x8] sm:$0xff] }
 0xac8   :  { %v1231_v28 = vmul.f32 %v9093_v40, %v9093_v40  ;;  %1583 = vmatpush.bf16.msrb.mxu3 %v6440_v30  ;;  %v6397_v30 = vld [vmem:[%s10793_s15 + $0x68] sm:$0xf0] }
 0xac9   :  { %v6400_v6 = vor.u32 %v8196_v26, %v6397_v30  ;;  %v8232_v23 = vld [vmem:[%s10794_s17 + $0x48] sm:$0xff]  ;;  %v8239_v26 = vld [vmem:[%s10794_s17 + $0x80] sm:$0xff] }
 0xaca   :  { %v1233_v41 = vsel %vm183_vm2, %v1231_v28, 0.0  ;;  %v6380_v28 = vor.u32 %v8202_v38, %v6379_v9  ;;  %v6472_v38 = vor.u32 %v8213_v34, %v6469_v35  ;;  %v8247_v30 = vld [vmem:[%s10794_s17 + $0xc0] sm:$0xff]  ;;  %v8277_v34 = vld [vmem:[%s10794_s17 + $0x1b0] sm:$0xff] }
 0xacb   :  { %v1219_v42 = vpop.xlane.xlu2 %1218  ;;  %1234 = vadd.xlane.f32.xlu0 %v1233_v41  ;;  %v8194_v41 = vld [vmem:[%s10793_s15 + $0x1c] sm:$0xf]  ;;  %v8285_v35 = vld [vmem:[%s10794_s17 + $0x1f0] sm:$0xff] }
 0xacc   :  { %v1228_v43 = vmul.f32 %v9090_v25, %v1219_v42  ;;  %v6381_v42 = vld [vmem:[%s10793_s15 + $0x58] sm:$0xf0]  ;;  %1584 = vmatpush.bf16.msrb.mxu3 %v6376_v39  ;;  %1598 = vmatpush.bf16.msra.mxu0 %v6380_v28  ;;  %v6403_v39 = vld [vmem:[%s10793_s15 + $0x30] sm:$0xf] }
 0xacd   :  { %v8205_v28 = vld [vmem:[%s10793_s15 + $0x6c] sm:$0xf0] }
 0xace   :  { %v9099_v44 = vsub.f32 %v1211_v24, %v1228_v43 }
 0xad0   :  { %v1232_v45 = vmul.f32 %v9099_v44, %v9099_v44 }
 0xad2   :  { %v1236_v46 = vsel %vm183_vm2, %v1232_v45, 0.0  ;;  %v6384_v45 = vor.u32 %v8194_v41, %v6381_v42  ;;  %v6480_v42 = vor.u32 %v8214_v37, %v6477_v8  ;;  %v8276_v37 = vld [vmem:[%s10794_s17 + $0x1a8] sm:$0xff] }
 0xad3   :  { %1237 = vadd.xlane.f32.xlu1 %v1236_v46  ;;  %v8284_v8 = vld [vmem:[%s10794_s17 + $0x1e8] sm:$0xff] }
 0xad4   :  { %1612 = vmatpush.bf16.msra.mxu1 %v6384_v45  ;;  %v6405_v45 = vld [vmem:[%s10793_s15 + $0x70] sm:$0xf0] }
 0xb3e   :  { %v1235_v55 = vpop.xlane.xlu0 %1234 }
 0xb3f   :  { %v1239_v61 = vmul.f32 %v1235_v55, %v9090_v25 }
 0xb41   :  { %v9138_v3 = vadd.f32 1e-05, %v1239_v61  ;;  %v8554_v61 = vld [vmem:[%s10792_s14] ss:$0 sm:$0xff] }
 0xb43   :  { %8612 = vrsqrt.f32 %v9138_v3  ;;  %vm1249_vm4 = vweird.f32 %v9138_v3 }
 0xb46   :  { %v1238_v17 = vpop.xlane.xlu1 %1237 }
 0xb47   :  { %v1240_v21 = vmul.f32 %v1238_v17, %v9090_v25  ;;  %v6387_v17 = vld [vmem:[%s10793_s15 + $0x20] sm:$0xf] }
 0xb48   :  { %v6388_v31 = vor.u32 %v8203_v18, %v6387_v17  ;;  %v8234_v17 = vld [vmem:[%s10794_s17 + $0x58] sm:$0xff]  ;;  %v8241_v18 = vld [vmem:[%s10794_s17 + $0x90] sm:$0xff] }
 0xb49   :  { %v8613_v7 = vpop.eup %8612  ;;  %v1242_v24 = vadd.f32 1e-05, %v1240_v21  ;;  %v8195_v21 = vld [vmem:[%s10793_s15 + $0x24] sm:$0xf] }
 0xb4a   :  { %v1244_v36 = vmul.f32 %v8613_v7, %v9138_v3  ;;  %vm1250_vm1 = vweird.f32 %v8613_v7  ;;  %v8211_v3 = vld [vmem:[%s10793_s15 + $0xa4] sm:$0xf]  ;;  %v6392_v32 = vor.u32 %v8195_v21, %v6389_v22  ;;  %v8240_v21 = vld [vmem:[%s10794_s17 + $0x88] sm:$0xff] }
 0xb4b   :  { %8614 = vrsqrt.f32 %v1242_v24  ;;  %vm1251_vm6 = vmor %vm1249_vm4, %vm1250_vm1  ;;  %vm1259_vm8 = vweird.f32 %v1242_v24  ;;  %v6456_v16 = vor.u32 %v8211_v3, %v6453_v4  ;;  %v8236_v3 = vld [vmem:[%s10794_s17 + $0x68] sm:$0xff]  ;;  %v8243_v4 = vld [vmem:[%s10794_s17 + $0xa0] sm:$0xff] }
 0xb4c   :  { %v1245_v43 = vmul.f32 %v8613_v7, %v1244_v36  ;;  %v8222_v36 = vld [vmem:[%s10793_s15 + $0xf4] sm:$0xf0]  ;;  %v8248_v22 = vld [vmem:[%s10794_s17 + $0xc8] sm:$0xff] }
 0xb4d   :  { %v6476_v41 = vor.u32 %v8222_v36, %v6475_v27  ;;  %v8261_v27 = vld [vmem:[%s10794_s17 + $0x130] sm:$0xff] }
 0xb4e   :  { %v1246_v46 = vmul.f32 0.5, %v1245_v43  ;;  %v8197_v43 = vld [vmem:[%s10793_s15 + $0x34] sm:$0xf] }
 0xb4f   :  { %v8269_v36 = vld [vmem:[%s10794_s17 + $0x170] sm:$0xff] }
 0xb50   :  { %v1247_v47 = vsub.f32 1.5, %v1246_v46  ;;  %v6411_v46 = vld [vmem:[%s10793_s15 + $0x38] sm:$0xf] }
 0xb51   :  { %v8615_v48 = vpop.eup %8614 }
 0xb52   :  { %v1248_v49 = vmul.f32 %v8613_v7, %v1247_v47  ;;  %v1254_v50 = vmul.f32 %v8615_v48, %v1242_v24  ;;  %vm1260_vm7 = vweird.f32 %v8615_v48  ;;  %v8221_v24 = vld [vmem:[%s10793_s15 + $0xec] sm:$0xf0]  ;;  %v8206_v47 = vld [vmem:[%s10793_s15 + $0x74] sm:$0xf0] }
 0xb53   :  { %vm1261_vm9 = vmor %vm1259_vm8, %vm1260_vm7 }
 0xb54   :  { %v1255_v51 = vmul.f32 %v8615_v48, %v1254_v50  ;;  %v1252_v52 = vsel %vm1251_vm6, %v8613_v7, %v1248_v49  ;;  %v6467_v7 = vld [vmem:[%s10793_s15 + $0xb0] sm:$0xf]  ;;  %v6413_v49 = vld [vmem:[%s10793_s15 + $0x78] sm:$0xf0]  ;;  %v6404_v50 = vor.u32 %v8205_v28, %v6403_v39  ;;  %v8260_v39 = vld [vmem:[%s10794_s17 + $0x128] sm:$0xff] }
 0xb55   :  { %v1263_v57 = vmul.f32 %v1252_v52, %v9093_v40  ;;  %v8219_v40 = vld [vmem:[%s10793_s15 + $0xdc] sm:$0xf0]  ;;  %v6468_v9 = vor.u32 %v8221_v24, %v6467_v7  ;;  %v6412_v52 = vor.u32 %v8206_v47, %v6411_v46  ;;  %v8262_v7 = vld [vmem:[%s10794_s17 + $0x138] sm:$0xff]  ;;  %v8268_v28 = vld [vmem:[%s10794_s17 + $0x168] sm:$0xff] }
 0xb56   :  { %v1256_v53 = vmul.f32 0.5, %v1255_v51  ;;  %v6452_v15 = vor.u32 %v8219_v40, %v6451_v1  ;;  %v6408_v51 = vor.u32 %v8197_v43, %v6405_v45  ;;  %v8252_v1 = vld [vmem:[%s10794_s17 + $0xe8] sm:$0xff]  ;;  %v8270_v24 = vld [vmem:[%s10794_s17 + $0x178] sm:$0xff]  ;;  %v8259_v43 = vld [vmem:[%s10794_s17 + $0x120] sm:$0xff] }
 0xb57   :  { %v1268_v62 = vmul.f32 %v8553_v56, %v1263_v57  ;;  %v8230_v57 = vld [vmem:[%s10794_s17 + $0x38] sm:$0xff]  ;;  %v8228_v40 = vld [vmem:[%s10794_s17 + $0x28] sm:$0xff]  ;;  %v8267_v45 = vld [vmem:[%s10794_s17 + $0x160] sm:$0xff] }
 0xb58   :  { %v1257_v55 = vsub.f32 1.5, %v1256_v53  ;;  %v8273_v46 = vld [vmem:[%s10794_s17 + $0x190] sm:$0xff] }
 0xb59   :  { %v9230_v5 = vadd.f32 %v8554_v61, %v1268_v62  ;;  %v8229_v62 = vld [vmem:[%s10794_s17 + $0x30] sm:$0xff] }
 0xb5a   :  { %v1258_v58 = vmul.f32 %v8615_v48, %v1257_v55  ;;  %v8246_v55 = vld [vmem:[%s10794_s17 + $0xb8] sm:$0xff]  ;;  %v8281_v47 = vld [vmem:[%s10794_s17 + $0x1d0] sm:$0xff] }
 0xb5c   :  { %v1262_v59 = vsel %vm1261_vm9, %v8615_v48, %v1258_v58  ;;  %v8198_v48 = vld [vmem:[%s10793_s15 + $0x3c] sm:$0xf] }
 0xb5d   :  { %v1264_v63 = vmul.f32 %v1262_v59, %v9099_v44  ;;  %v6459_v44 = vld [vmem:[%s10793_s15 + $0xa8] sm:$0xf]  ;;  %v6416_v53 = vor.u32 %v8198_v48, %v6413_v49  ;;  %v8238_v58 = vld [vmem:[%s10794_s17 + $0x78] sm:$0xff]  ;;  %v8245_v59 = vld [vmem:[%s10794_s17 + $0xb0] sm:$0xff] }
 0xb5e   :  { %v6460_v19 = vor.u32 %v8220_v11, %v6459_v44  ;;  %v8251_v44 = vld [vmem:[%s10794_s17 + $0xe0] sm:$0xff]  ;;  %v8258_v48 = vld [vmem:[%s10794_s17 + $0x118] sm:$0xff] }
 0xb5f   :  { %v1269_v0 = vmul.f32 %v8553_v56, %v1264_v63  ;;  %v8254_v56 = vld [vmem:[%s10794_s17 + $0xf8] sm:$0xff]  ;;  %v8237_v63 = vld [vmem:[%s10794_s17 + $0x70] sm:$0xff]  ;;  %v8227_v11 = vld [vmem:[%s10794_s17 + $0x20] sm:$0xff] }
 0xb60   :  { %v8266_v49 = vld [vmem:[%s10794_s17 + $0x158] sm:$0xff] }
 0xb61   :  { %v9232_v10 = vadd.f32 %v8554_v61, %v1269_v0  ;;  %v8253_v61 = vld [vmem:[%s10794_s17 + $0xf0] sm:$0xff]  ;;  %v8244_v0 = vld [vmem:[%s10794_s17 + $0xa8] sm:$0xff] }
 0xb63   :  { %v9245_v14 = vpack.c.bf16 %v9232_v10, %v9230_v5 }
 0xb65   :  { %6481 = vmatmul.msk.bf16.vlgmr.msra.gmra.mxu2 %vm183_vm2, %v9245_v14  ;;  %6482 = vmatmul.msk.bf16.vlgmr.msra.gmra.mxu3 %vm183_vm2, %v9245_v14 }
 0xb66   :  { %6483 = vmatmul.msk.bf16.vlgmr.msrb.gmra.mxu0 %vm183_vm2, %v9245_v14  ;;  %6484 = vmatmul.msk.bf16.vlgmr.msrb.gmra.mxu1 %vm183_vm2, %v9245_v14 }
 0xb67   :  { %1625 = vmatpush.bf16.msra.mxu2 %v6452_v15  ;;  %1639 = vmatpush.bf16.msra.mxu3 %v6456_v16  ;;  %v8250_v15 = vld [vmem:[%s10794_s17 + $0xd8] sm:$0xff] }
 0xb68   :  { %1653 = vmatpush.bf16.msrb.mxu0 %v6460_v19  ;;  %1667 = vmatpush.bf16.msrb.mxu1 %v6464_v20  ;;  %v8226_v16 = vld [vmem:[%s10794_s17 + $0x18] sm:$0xff]  ;;  %v8249_v19 = vld [vmem:[%s10794_s17 + $0xd0] sm:$0xff] }
 0xb69   :  { %v8225_v20 = vld [vmem:[%s10794_s17 + $0x10] sm:$0xff] }
 0xb6b   :  { %1626 = vmatpush.bf16.msra.mxu2 %v6388_v31  ;;  %1640 = vmatpush.bf16.msra.mxu3 %v6392_v32  ;;  %v8278_v31 = vld [vmem:[%s10794_s17 + $0x1b8] sm:$0xff] }
 0xb6c   :  { %1654 = vmatpush.bf16.msrb.mxu0 %v6396_v33  ;;  %1668 = vmatpush.bf16.msrb.mxu1 %v6400_v6  ;;  %v8286_v32 = vld [vmem:[%s10794_s17 + $0x1f8] sm:$0xff]  ;;  %v8223_v33 = vld [vmem:[%s10794_s17] sm:$0xff] }
 0xb6d   :  { %v8231_v6 = vld [vmem:[%s10794_s17 + $0x40] sm:$0xff] }
 0xb75   :  { %6485 = vmatmul.msk.bf16.vlgmr.msrb.gmra.mxu2 %vm183_vm2, %v9245_v14  ;;  %6486 = vmatmul.msk.bf16.vlgmr.msrb.gmra.mxu3 %vm183_vm2, %v9245_v14 }
 0xb76   :  { %6487 = vmatmul.msk.bf16.vlgmr.msra.gmra.mxu0 %vm183_vm2, %v9245_v14  ;;  %6488 = vmatmul.msk.bf16.vlgmr.msra.gmra.mxu1 %vm183_vm2, %v9245_v14 }
 0xb77   :  { %1681 = vmatpush.bf16.msrb.mxu2 %v6468_v9  ;;  %1695 = vmatpush.bf16.msrb.mxu3 %v6472_v38  ;;  %v8275_v9 = vld [vmem:[%s10794_s17 + $0x1a0] sm:$0xff] }
 0xb78   :  { %1709 = vmatpush.bf16.msra.mxu0 %v6476_v41  ;;  %1723 = vmatpush.bf16.msra.mxu1 %v6480_v42  ;;  %v8283_v38 = vld [vmem:[%s10794_s17 + $0x1e0] sm:$0xff]  ;;  %v8274_v41 = vld [vmem:[%s10794_s17 + $0x198] sm:$0xff] }
 0xb79   :  { %v8282_v42 = vld [vmem:[%s10794_s17 + $0x1d8] sm:$0xff] }
 0xb7b   :  { %1682 = vmatpush.bf16.msrb.mxu2 %v6404_v50  ;;  %1696 = vmatpush.bf16.msrb.mxu3 %v6408_v51  ;;  %v8272_v50 = vld [vmem:[%s10794_s17 + $0x188] sm:$0xff] }
 0xb7c   :  { %1710 = vmatpush.bf16.msra.mxu0 %v6412_v52  ;;  %1724 = vmatpush.bf16.msra.mxu1 %v6416_v53  ;;  %v8280_v51 = vld [vmem:[%s10794_s17 + $0x1c8] sm:$0xff]  ;;  %v8257_v52 = vld [vmem:[%s10794_s17 + $0x110] sm:$0xff] }
 0xb7d   :  { %v8265_v53 = vld [vmem:[%s10794_s17 + $0x150] sm:$0xff] }
 0xb85   :  { %6489 = vmatmul.msk.bf16.vlgmr.msra.gmra.mxu2 %vm183_vm2, %v9245_v14  ;;  %6490 = vmatmul.msk.bf16.vlgmr.msra.gmra.mxu3 %vm183_vm2, %v9245_v14 }
 0xb86   :  { %6491 = vmatmul.msk.bf16.vlgmr.msrb.gmra.mxu0 %vm183_vm2, %v9245_v14  ;;  %6492 = vmatmul.msk.bf16.vlgmr.msrb.gmra.mxu1 %vm183_vm2, %v9245_v14 }
 0xb87   :  { %2835 = vmatpush.bf16.msrb.mxu0 %v8246_v55  ;;  %2849 = vmatpush.bf16.msrb.mxu1 %v8254_v56  ;;  %v8271_v55 = vld [vmem:[%s10794_s17 + $0x180] sm:$0xff] }
 0xb88   :  { %2807 = vmatpush.bf16.msra.mxu2 %v8230_v57  ;;  %2821 = vmatpush.bf16.msra.mxu3 %v8238_v58  ;;  %v8279_v56 = vld [vmem:[%s10794_s17 + $0x1c0] sm:$0xff]  ;;  %v8256_v57 = vld [vmem:[%s10794_s17 + $0x108] sm:$0xff] }
 0xb89   :  { %v8264_v58 = vld [vmem:[%s10794_s17 + $0x148] sm:$0xff] }
 0xb8b   :  { %2836 = vmatpush.bf16.msrb.mxu0 %v8245_v59  ;;  %2850 = vmatpush.bf16.msrb.mxu1 %v8253_v61  ;;  %v8255_v59 = vld [vmem:[%s10794_s17 + $0x100] sm:$0xff] }
 0xb8c   :  { %2808 = vmatpush.bf16.msra.mxu2 %v8229_v62  ;;  %2822 = vmatpush.bf16.msra.mxu3 %v8237_v63  ;;  %v8263_v61 = vld [vmem:[%s10794_s17 + $0x140] sm:$0xff] }
 0xb8d   :  { %v9546_v62 = vld [vmem:[%s10795_s16] sm:$0xff] }
 0xb8f   :  { %2837 = vmatpush.bf16.msrb.mxu0 %v8244_v0  ;;  %2851 = vmatpush.bf16.msrb.mxu1 %v8252_v1  ;;  %v1314_v1 = vperm.slane %v9546_v62, 2 }
 0xb90   :  { %2809 = vmatpush.bf16.msra.mxu2 %v8228_v40  ;;  %2823 = vmatpush.bf16.msra.mxu3 %v8236_v3  ;;  %v1315_v40 = vperm.slane %v9546_v62, 3 }
 0xb93   :  { %2838 = vmatpush.bf16.msrb.mxu0 %v8243_v4  ;;  %2852 = vmatpush.bf16.msrb.mxu1 %v8251_v44 }
 0xb94   :  { %2810 = vmatpush.bf16.msra.mxu2 %v8227_v11  ;;  %2824 = vmatpush.bf16.msra.mxu3 %v8235_v12  ;;  %v1312_v12 = vperm.slane %v9546_v62, 0 }
 0xb95   :  { %6493 = vmatmul.msk.bf16.vlgmr.msrb.gmra.mxu2 %vm183_vm2, %v9245_v14  ;;  %6494 = vmatmul.msk.bf16.vlgmr.msrb.gmra.mxu3 %vm183_vm2, %v9245_v14 }
 0xb96   :  { %6495 = vmatmul.msk.bf16.vlgmr.msra.gmra.mxu0 %vm183_vm2, %v9245_v14  ;;  %6496 = vmatmul.msk.bf16.vlgmr.msra.gmra.mxu1 %vm183_vm2, %v9245_v14  ;;  %v8233_v14 = vld [vmem:[%s10794_s17 + $0x50] sm:$0xff] }
 0xb97   :  { %2839 = vmatpush.bf16.msrb.mxu0 %v8242_v13  ;;  %2853 = vmatpush.bf16.msrb.mxu1 %v8250_v15  ;;  %v1313_v13 = vperm.slane %v9546_v62, 1 }
 0xb98   :  { %2811 = vmatpush.bf16.msra.mxu2 %v8226_v16  ;;  %2825 = vmatpush.bf16.msra.mxu3 %v8234_v17 }
 0xb9b   :  { %2840 = vmatpush.bf16.msrb.mxu0 %v8241_v18  ;;  %2854 = vmatpush.bf16.msrb.mxu1 %v8249_v19 }
 0xb9c   :  { %2812 = vmatpush.bf16.msra.mxu2 %v8225_v20  ;;  %2826 = vmatpush.bf16.msra.mxu3 %v8233_v14 }
 0xb9f   :  { %2841 = vmatpush.bf16.msrb.mxu0 %v8240_v21  ;;  %2855 = vmatpush.bf16.msrb.mxu1 %v8248_v22 }
 0xba0   :  { %2813 = vmatpush.bf16.msra.mxu2 %v8224_v29  ;;  %2827 = vmatpush.bf16.msra.mxu3 %v8232_v23  ;;  %v8310_v23 = vld [vmem:[%s10794_s17 + $0x2b8] sm:$0xff] }
 0xba3   :  { %2842 = vmatpush.bf16.msrb.mxu0 %v8239_v26  ;;  %2856 = vmatpush.bf16.msrb.mxu1 %v8247_v30  ;;  %v8318_v26 = vld [vmem:[%s10794_s17 + $0x2f8] sm:$0xff] }
 0xba4   :  { %2814 = vmatpush.bf16.msra.mxu2 %v8223_v33  ;;  %2828 = vmatpush.bf16.msra.mxu3 %v8231_v6 }
 0xba7   :  { %2891 = vmatpush.bf16.msra.mxu0 %v8278_v31  ;;  %2905 = vmatpush.bf16.msra.mxu1 %v8286_v32 }
 0xba8   :  { %2863 = vmatpush.bf16.msrb.mxu2 %v8262_v7  ;;  %2877 = vmatpush.bf16.msrb.mxu3 %v8270_v24 }
 0xbab   :  { %2892 = vmatpush.bf16.msra.mxu0 %v8277_v34  ;;  %2906 = vmatpush.bf16.msra.mxu1 %v8285_v35 }
 0xbac   :  { %2864 = vmatpush.bf16.msrb.mxu2 %v8261_v27  ;;  %2878 = vmatpush.bf16.msrb.mxu3 %v8269_v36 }
 0xbaf   :  { %2893 = vmatpush.bf16.msra.mxu0 %v8276_v37  ;;  %2907 = vmatpush.bf16.msra.mxu1 %v8284_v8  ;;  %v8309_v8 = vld [vmem:[%s10794_s17 + $0x2b0] sm:$0xff] }
 0xbb0   :  { %2865 = vmatpush.bf16.msrb.mxu2 %v8260_v39  ;;  %2879 = vmatpush.bf16.msrb.mxu3 %v8268_v28  ;;  %v8294_v28 = vld [vmem:[%s10794_s17 + $0x238] sm:$0xff] }
 0xbb3   :  { %2894 = vmatpush.bf16.msra.mxu0 %v8275_v9  ;;  %2908 = vmatpush.bf16.msra.mxu1 %v8283_v38  ;;  %v8317_v9 = vld [vmem:[%s10794_s17 + $0x2f0] sm:$0xff] }
 0xbb4   :  { %2866 = vmatpush.bf16.msrb.mxu2 %v8259_v43  ;;  %2880 = vmatpush.bf16.msrb.mxu3 %v8267_v45  ;;  %v1319_v43 = vperm.slane %v9546_v62, 7  ;;  %v8308_v45 = vld [vmem:[%s10794_s17 + $0x2a8] sm:$0xff] }
 0xbb7   :  { %2895 = vmatpush.bf16.msra.mxu0 %v8274_v41  ;;  %2909 = vmatpush.bf16.msra.mxu1 %v8282_v42  ;;  %v8302_v41 = vld [vmem:[%s10794_s17 + $0x278] sm:$0xff]  ;;  %v1318_v42 = vperm.slane %v9546_v62, 6 }
 0xbb8   :  { %2867 = vmatpush.bf16.msrb.mxu2 %v8258_v48  ;;  %2881 = vmatpush.bf16.msrb.mxu3 %v8266_v49  ;;  %v8293_v49 = vld [vmem:[%s10794_s17 + $0x230] sm:$0xff] }
 0xbbb   :  { %2896 = vmatpush.bf16.msra.mxu0 %v8273_v46  ;;  %2910 = vmatpush.bf16.msra.mxu1 %v8281_v47  ;;  %v8316_v46 = vld [vmem:[%s10794_s17 + $0x2e8] sm:$0xff] }
 0xbbc   :  { %2868 = vmatpush.bf16.msrb.mxu2 %v8257_v52  ;;  %2882 = vmatpush.bf16.msrb.mxu3 %v8265_v53  ;;  %v1316_v53 = vperm.slane %v9546_v62, 4 }
 0xbbf   :  { %2897 = vmatpush.bf16.msra.mxu0 %v8272_v50  ;;  %2911 = vmatpush.bf16.msra.mxu1 %v8280_v51  ;;  %v8301_v50 = vld [vmem:[%s10794_s17 + $0x270] sm:$0xff] }
 0xbc0   :  { %2869 = vmatpush.bf16.msrb.mxu2 %v8256_v57  ;;  %2883 = vmatpush.bf16.msrb.mxu3 %v8264_v58  ;;  %v8307_v58 = vld [vmem:[%s10794_s17 + $0x2a0] sm:$0xff] }
 0xbc3   :  { %2898 = vmatpush.bf16.msra.mxu0 %v8271_v55  ;;  %2912 = vmatpush.bf16.msra.mxu1 %v8279_v56  ;;  %v1317_v55 = vperm.slane %v9546_v62, 5  ;;  %v8292_v62 = vld [vmem:[%s10794_s17 + $0x228] sm:$0xff] }
 0xbc4   :  { %2870 = vmatpush.bf16.msrb.mxu2 %v8255_v59  ;;  %2884 = vmatpush.bf16.msrb.mxu3 %v8263_v61  ;;  %v8315_v59 = vld [vmem:[%s10794_s17 + $0x2e0] sm:$0xff] }
 0xbe3   :  { %v1544_v63 = vpop.f32.mrf.mxu0  ;;  %v1558_v0 = vpop.f32.mrf.mxu1 }
 0xbe4   :  { %v1545_v44 = vadd.f32 %v1544_v63, %v1314_v1  ;;  %v1559_v11 = vadd.f32 %v1558_v0, %v1315_v40  ;;  %v8300_v0 = vld [vmem:[%s10794_s17 + $0x268] sm:$0xff] }
 0xbe6   :  { %v1733_v19 = vmax.f32 %v1545_v44, 0.0  ;;  %v1734_v20 = vmax.f32 %v1559_v11, 0.0 }
 0xbe8   :  { %v1516_v3 = vpop.f32.mrf.mxu2  ;;  %v1530_v4 = vpop.f32.mrf.mxu3 }
 0xbe9   :  { %v1517_v22 = vadd.f32 %v1516_v3, %v1312_v12  ;;  %v1531_v29 = vadd.f32 %v1530_v4, %v1313_v13 }
 0xbeb   :  { %v1546_v15 = vpop.f32.mrf.mxu0  ;;  %v1560_v16 = vpop.f32.mrf.mxu1  ;;  %v1731_v24 = vmax.f32 %v1517_v22, 0.0  ;;  %v1732_v34 = vmax.f32 %v1531_v29, 0.0  ;;  %v9613_v22 = vld [vmem:[%s10795_s16 + $0x8] sm:$0xff] }
 0xbec   :  { %v1547_v17 = vadd.f32 %v1546_v15, %v1314_v1  ;;  %v1561_v18 = vadd.f32 %v1560_v16, %v1315_v40 }
 0xbee   :  { %v1749_v14 = vmax.f32 %v1547_v17, 0.0  ;;  %v1750_v21 = vmax.f32 %v1561_v18, 0.0 }
 0xbf0   :  { %v1765_v30 = vpack.c.bf16 %v1749_v14, %v1733_v19  ;;  %v1766_v31 = vpack.c.bf16 %v1750_v21, %v1734_v20  ;;  %v1518_v32 = vpop.f32.mrf.mxu2  ;;  %v1532_v33 = vpop.f32.mrf.mxu3  ;;  %v8291_v14 = vld [vmem:[%s10794_s17 + $0x220] sm:$0xff] }
 0xbf1   :  { %v1519_v6 = vadd.f32 %v1518_v32, %v1312_v12  ;;  %v1533_v7 = vadd.f32 %v1532_v33, %v1313_v13  ;;  %v8306_v12 = vld [vmem:[%s10794_s17 + $0x298] sm:$0xff]  ;;  %v8299_v21 = vld [vmem:[%s10794_s17 + $0x260] sm:$0xff]  ;;  %v8305_v33 = vld [vmem:[%s10794_s17 + $0x290] sm:$0xff] }
 0xbf2   :  { %2843 = vmatmul.bf16.vlgmr.msrb.gmra.mxu0 %v1765_v30  ;;  %2857 = vmatmul.bf16.vlgmr.msrb.gmra.mxu1 %v1766_v31  ;;  %v8314_v13 = vld [vmem:[%s10794_s17 + $0x2d8] sm:$0xff] }
 0xbf3   :  { %v1747_v35 = vmax.f32 %v1519_v6, 0.0  ;;  %v1748_v27 = vmax.f32 %v1533_v7, 0.0  ;;  %2947 = vmatpush.bf16.msrb.mxu0 %v8310_v23  ;;  %2961 = vmatpush.bf16.msrb.mxu1 %v8318_v26  ;;  %v1600_v36 = vpop.f32.mrf.mxu0  ;;  %v1614_v37 = vpop.f32.mrf.mxu1  ;;  %v8313_v6 = vld [vmem:[%s10794_s17 + $0x2d0] sm:$0xff] }
 0xbf4   :  { %v1601_v51 = vadd.f32 %v1600_v36, %v1318_v42  ;;  %v1615_v52 = vadd.f32 %v1614_v37, %v1319_v43  ;;  %v1323_v36 = vperm.slane %v9613_v22, 3  ;;  %v8304_v37 = vld [vmem:[%s10794_s17 + $0x288] sm:$0xff] }
 0xbf5   :  { %v1763_v38 = vpack.c.bf16 %v1747_v35, %v1731_v24  ;;  %v1764_v39 = vpack.c.bf16 %v1748_v27, %v1732_v34  ;;  %v8290_v34 = vld [vmem:[%s10794_s17 + $0x218] sm:$0xff]  ;;  %v1322_v27 = vperm.slane %v9613_v22, 2 }
 0xbf6   :  { %v1737_v1 = vmax.f32 %v1601_v51, 0.0  ;;  %v1738_v40 = vmax.f32 %v1615_v52, 0.0  ;;  %v8298_v35 = vld [vmem:[%s10794_s17 + $0x258] sm:$0xff] }
 0xbf7   :  { %2948 = vmatpush.bf16.msrb.mxu0 %v8309_v8  ;;  %2962 = vmatpush.bf16.msrb.mxu1 %v8317_v9  ;;  %v8312_v8 = vld [vmem:[%s10794_s17 + $0x2c8] sm:$0xff]  ;;  %v8342_v52 = vld [vmem:[%s10794_s17 + $0x3b8] sm:$0xff] }
 0xbf8   :  { %2815 = vmatmul.bf16.vlgmr.msra.gmra.mxu2 %v1763_v38  ;;  %2829 = vmatmul.bf16.vlgmr.msra.gmra.mxu3 %v1764_v39  ;;  %v1572_v47 = vpop.f32.mrf.mxu2  ;;  %v1586_v48 = vpop.f32.mrf.mxu3  ;;  %v8289_v39 = vld [vmem:[%s10794_s17 + $0x210] sm:$0xff] }
 0xbf9   :  { %2919 = vmatpush.bf16.msra.mxu2 %v8294_v28  ;;  %2933 = vmatpush.bf16.msra.mxu3 %v8302_v41  ;;  %v1573_v44 = vadd.f32 %v1572_v47, %v1316_v53  ;;  %v1587_v11 = vadd.f32 %v1586_v48, %v1317_v55  ;;  %v8297_v28 = vld [vmem:[%s10794_s17 + $0x250] sm:$0xff]  ;;  %v8303_v48 = vld [vmem:[%s10794_s17 + $0x280] sm:$0xff] }
 0xbfb   :  { %2949 = vmatpush.bf16.msrb.mxu0 %v8308_v45  ;;  %2963 = vmatpush.bf16.msrb.mxu1 %v8316_v46  ;;  %v1602_v56 = vpop.f32.mrf.mxu0  ;;  %v1616_v57 = vpop.f32.mrf.mxu1  ;;  %v1735_v29 = vmax.f32 %v1573_v44, 0.0  ;;  %v1736_v23 = vmax.f32 %v1587_v11, 0.0  ;;  %v1321_v45 = vperm.slane %v9613_v22, 1  ;;  %v8349_v44 = vld [vmem:[%s10794_s17 + $0x3f0] sm:$0xff] }
 0xbfc   :  { %v1603_v61 = vadd.f32 %v1602_v56, %v1318_v42  ;;  %v1617_v63 = vadd.f32 %v1616_v57, %v1319_v43  ;;  %v1320_v43 = vperm.slane %v9613_v22, 0  ;;  %v8296_v56 = vld [vmem:[%s10794_s17 + $0x248] sm:$0xff] }
 0xbfd   :  { %2920 = vmatpush.bf16.msra.mxu2 %v8293_v49  ;;  %2934 = vmatpush.bf16.msra.mxu3 %v8301_v50  ;;  %v8311_v49 = vld [vmem:[%s10794_s17 + $0x2c0] sm:$0xff] }
 0xbfe   :  { %v1753_v3 = vmax.f32 %v1603_v61, 0.0  ;;  %v1754_v4 = vmax.f32 %v1617_v63, 0.0 }
 0xbff   :  { %2950 = vmatpush.bf16.msrb.mxu0 %v8307_v58  ;;  %2964 = vmatpush.bf16.msrb.mxu1 %v8315_v59 }
 0xc00   :  { %v1769_v15 = vpack.c.bf16 %v1753_v3, %v1737_v1  ;;  %v1770_v16 = vpack.c.bf16 %v1754_v4, %v1738_v40  ;;  %v1574_v17 = vpop.f32.mrf.mxu2  ;;  %v1588_v18 = vpop.f32.mrf.mxu3  ;;  %v8341_v4 = vld [vmem:[%s10794_s17 + $0x3b0] sm:$0xff] }
 0xc01   :  { %2921 = vmatpush.bf16.msra.mxu2 %v8292_v62  ;;  %2935 = vmatpush.bf16.msra.mxu3 %v8300_v0  ;;  %v1575_v19 = vadd.f32 %v1574_v17, %v1316_v53  ;;  %v1589_v20 = vadd.f32 %v1588_v18, %v1317_v55  ;;  %v8350_v53 = vld [vmem:[%s10794_s17 + $0x3f8] sm:$0xff]  ;;  %v8288_v55 = vld [vmem:[%s10794_s17 + $0x208] sm:$0xff] }
 0xc02   :  { %2899 = vmatmul.bf16.vlgmr.msra.gmra.mxu0 %v1769_v15  ;;  %2913 = vmatmul.bf16.vlgmr.msra.gmra.mxu1 %v1770_v16  ;;  %v8295_v15 = vld [vmem:[%s10794_s17 + $0x240] sm:$0xff]  ;;  %v8326_v16 = vld [vmem:[%s10794_s17 + $0x338] sm:$0xff] }
 0xc03   :  { %v1751_v26 = vmax.f32 %v1575_v19, 0.0  ;;  %v1752_v30 = vmax.f32 %v1589_v20, 0.0  ;;  %2951 = vmatpush.bf16.msrb.mxu0 %v8306_v12  ;;  %2965 = vmatpush.bf16.msrb.mxu1 %v8314_v13  ;;  %v1656_v31 = vpop.f32.mrf.mxu0  ;;  %v1670_v32 = vpop.f32.mrf.mxu1  ;;  %v8287_v13 = vld [vmem:[%s10794_s17 + $0x200] sm:$0xff]  ;;  %v8334_v17 = vld [vmem:[%s10794_s17 + $0x378] sm:$0xff] }
 0xc04   :  { %v1657_v41 = vadd.f32 %v1656_v31, %v1322_v27  ;;  %v1671_v42 = vadd.f32 %v1670_v32, %v1323_v36  ;;  %v8333_v31 = vld [vmem:[%s10794_s17 + $0x370] sm:$0xff] }
 0xc05   :  { %v1767_v7 = vpack.c.bf16 %v1751_v26, %v1735_v29  ;;  %v1768_v24 = vpack.c.bf16 %v1752_v30, %v1736_v23  ;;  %2922 = vmatpush.bf16.msra.mxu2 %v8291_v14  ;;  %2936 = vmatpush.bf16.msra.mxu3 %v8299_v21  ;;  %v8340_v21 = vld [vmem:[%s10794_s17 + $0x3a8] sm:$0xff]  ;;  %v8325_v30 = vld [vmem:[%s10794_s17 + $0x330] sm:$0xff] }
 0xc06   :  { %v1741_v57 = vmax.f32 %v1657_v41, 0.0  ;;  %v1742_v58 = vmax.f32 %v1671_v42, 0.0  ;;  %v8348_v29 = vld [vmem:[%s10794_s17 + $0x3e8] sm:$0xff]  ;;  %v8322_v42 = vld [vmem:[%s10794_s17 + $0x318] sm:$0xff] }
 0xc07   :  { %2952 = vmatpush.bf16.msrb.mxu0 %v8305_v33  ;;  %2966 = vmatpush.bf16.msrb.mxu1 %v8313_v6  ;;  %v8339_v6 = vld [vmem:[%s10794_s17 + $0x3a0] sm:$0xff] }
 0xc08   :  { %2871 = vmatmul.bf16.vlgmr.msrb.gmra.mxu2 %v1767_v7  ;;  %2885 = vmatmul.bf16.vlgmr.msrb.gmra.mxu3 %v1768_v24  ;;  %v1628_v9 = vpop.f32.mrf.mxu2  ;;  %v1642_v38 = vpop.f32.mrf.mxu3  ;;  %v8347_v7 = vld [vmem:[%s10794_s17 + $0x3e0] sm:$0xff]  ;;  %v8324_v24 = vld [vmem:[%s10794_s17 + $0x328] sm:$0xff] }
 0xc09   :  { %2923 = vmatpush.bf16.msra.mxu2 %v8290_v34  ;;  %2937 = vmatpush.bf16.msra.mxu3 %v8298_v35  ;;  %v1629_v63 = vadd.f32 %v1628_v9, %v1320_v43  ;;  %v1643_v62 = vadd.f32 %v1642_v38, %v1321_v45  ;;  %v8332_v34 = vld [vmem:[%s10794_s17 + $0x368] sm:$0xff]  ;;  %v8338_v35 = vld [vmem:[%s10794_s17 + $0x398] sm:$0xff]  ;;  %v8331_v9 = vld [vmem:[%s10794_s17 + $0x360] sm:$0xff] }
 0xc0a   :  { %v8337_v38 = vld [vmem:[%s10794_s17 + $0x390] sm:$0xff] }
 0xc0b   :  { %2953 = vmatpush.bf16.msrb.mxu0 %v8304_v37  ;;  %2967 = vmatpush.bf16.msrb.mxu1 %v8312_v8  ;;  %v1658_v46 = vpop.f32.mrf.mxu0  ;;  %v1672_v47 = vpop.f32.mrf.mxu1  ;;  %v1739_v18 = vmax.f32 %v1629_v63, 0.0  ;;  %v1740_v19 = vmax.f32 %v1643_v62, 0.0  ;;  %v8323_v8 = vld [vmem:[%s10794_s17 + $0x320] sm:$0xff]  ;;  %v1325_v63 = vperm.slane %v9613_v22, 5 }
 0xc0c   :  { %v1659_v50 = vadd.f32 %v1658_v46, %v1322_v27  ;;  %v1673_v51 = vadd.f32 %v1672_v47, %v1323_v36  ;;  %v8346_v27 = vld [vmem:[%s10794_s17 + $0x3d8] sm:$0xff]  ;;  %v1327_v46 = vperm.slane %v9613_v22, 7  ;;  %v8336_v47 = vld [vmem:[%s10794_s17 + $0x388] sm:$0xff] }
 0xc0d   :  { %2924 = vmatpush.bf16.msra.mxu2 %v8289_v39  ;;  %2938 = vmatpush.bf16.msra.mxu3 %v8297_v28  ;;  %v8345_v39 = vld [vmem:[%s10794_s17 + $0x3d0] sm:$0xff] }
 0xc0e   :  { %v1757_v59 = vmax.f32 %v1659_v50, 0.0  ;;  %v1758_v61 = vmax.f32 %v1673_v51, 0.0  ;;  %v8321_v51 = vld [vmem:[%s10794_s17 + $0x310] sm:$0xff] }
 0xc0f   :  { %2954 = vmatpush.bf16.msrb.mxu0 %v8303_v48  ;;  %2968 = vmatpush.bf16.msrb.mxu1 %v8311_v49  ;;  %v8344_v48 = vld [vmem:[%s10794_s17 + $0x3c8] sm:$0xff] }
 0xc10   :  { %v1773_v0 = vpack.c.bf16 %v1757_v59, %v1741_v57  ;;  %v1774_v1 = vpack.c.bf16 %v1758_v61, %v1742_v58  ;;  %v1630_v40 = vpop.f32.mrf.mxu2  ;;  %v1644_v3 = vpop.f32.mrf.mxu3  ;;  %v8335_v58 = vld [vmem:[%s10794_s17 + $0x380] sm:$0xff]  ;;  %v1324_v61 = vperm.slane %v9613_v22, 4 }
 0xc11   :  { %2925 = vmatpush.bf16.msra.mxu2 %v8288_v55  ;;  %2939 = vmatpush.bf16.msra.mxu3 %v8296_v56  ;;  %v1631_v11 = vadd.f32 %v1630_v40, %v1320_v43  ;;  %v1645_v12 = vadd.f32 %v1644_v3, %v1321_v45  ;;  %v8330_v43 = vld [vmem:[%s10794_s17 + $0x358] sm:$0xff]  ;;  %v1326_v45 = vperm.slane %v9613_v22, 6  ;;  %v8343_v59 = vld [vmem:[%s10794_s17 + $0x3c0] sm:$0xff]  ;;  %v8328_v40 = vld [vmem:[%s10794_s17 + $0x348] sm:$0xff] }
 0xc12   :  { %2955 = vmatmul.bf16.vlgmr.msrb.gmra.mxu0 %v1773_v0  ;;  %2969 = vmatmul.bf16.vlgmr.msrb.gmra.mxu1 %v1774_v1  ;;  %v8320_v1 = vld [vmem:[%s10794_s17 + $0x308] sm:$0xff] }
 0xc13   :  { %3003 = vmatpush.bf16.msra.mxu0 %v8342_v52  ;;  %3017 = vmatpush.bf16.msra.mxu1 %v8350_v53  ;;  %v1755_v20 = vmax.f32 %v1631_v11, 0.0  ;;  %v1756_v14 = vmax.f32 %v1645_v12, 0.0  ;;  %v1712_v32 = vpop.f32.mrf.mxu0  ;;  %v1726_v33 = vpop.f32.mrf.mxu1  ;;  %v8329_v52 = vld [vmem:[%s10794_s17 + $0x350] sm:$0xff] }
 0xc14   :  { %v1713_v53 = vadd.f32 %v1712_v32, %v1326_v45  ;;  %v1727_v55 = vadd.f32 %v1726_v33, %v1327_v46 }
 0xc15   :  { %v1771_v23 = vpack.c.bf16 %v1755_v20, %v1739_v18  ;;  %v1772_v26 = vpack.c.bf16 %v1756_v14, %v1740_v19  ;;  %2926 = vmatpush.bf16.msra.mxu2 %v8287_v13  ;;  %2940 = vmatpush.bf16.msra.mxu3 %v8295_v15 }
 0xc16   :  { %v1745_v3 = vmax.f32 %v1713_v53, 0.0 }
 0xc17   :  { %3004 = vmatpush.bf16.msra.mxu0 %v8341_v4  ;;  %3018 = vmatpush.bf16.msra.mxu1 %v8349_v44  ;;  %v1746_v4 = vmax.f32 %v1727_v55, 0.0 }
 0xc18   :  { %2927 = vmatmul.bf16.vlgmr.msra.gmra.mxu2 %v1771_v23  ;;  %2941 = vmatmul.bf16.vlgmr.msra.gmra.mxu3 %v1772_v26  ;;  %v1684_v36 = vpop.f32.mrf.mxu2  ;;  %v1698_v37 = vpop.f32.mrf.mxu3 }
 0xc19   :  { %2975 = vmatpush.bf16.msrb.mxu2 %v8326_v16  ;;  %2989 = vmatpush.bf16.msrb.mxu3 %v8334_v17  ;;  %v1685_v12 = vadd.f32 %v1684_v36, %v1324_v61  ;;  %v1699_v22 = vadd.f32 %v1698_v37, %v1325_v63  ;;  %v8319_v16 = vld [vmem:[%s10794_s17 + $0x300] sm:$0xff] }
 0xc1a   :  { %v8327_v17 = vld [vmem:[%s10794_s17 + $0x340] sm:$0xff] }
 0xc1b   :  { %3005 = vmatpush.bf16.msra.mxu0 %v8340_v21  ;;  %3019 = vmatpush.bf16.msra.mxu1 %v8348_v29  ;;  %v1714_v28 = vpop.f32.mrf.mxu0  ;;  %v1728_v41 = vpop.f32.mrf.mxu1  ;;  %v1743_v20 = vmax.f32 %v1685_v12, 0.0  ;;  %v1744_v14 = vmax.f32 %v1699_v22, 0.0 }
 0xc1c   :  { %v1715_v49 = vadd.f32 %v1714_v28, %v1326_v45  ;;  %v1729_v50 = vadd.f32 %v1728_v41, %v1327_v46 }
 0xc1d   :  { %2976 = vmatpush.bf16.msrb.mxu2 %v8325_v30  ;;  %2990 = vmatpush.bf16.msrb.mxu3 %v8333_v31 }
 0xc1e   :  { %v1761_v62 = vmax.f32 %v1715_v49, 0.0  ;;  %v1762_v0 = vmax.f32 %v1729_v50, 0.0 }
 0xc1f   :  { %3006 = vmatpush.bf16.msra.mxu0 %v8339_v6  ;;  %3020 = vmatpush.bf16.msra.mxu1 %v8347_v7  ;;  %v8555_v7 = vld [vmem:[%s10796_s18] ss:$0 sm:$0xff] }
 0xc20   :  { %v1686_v56 = vpop.f32.mrf.mxu2  ;;  %v1700_v57 = vpop.f32.mrf.mxu3  ;;  %v1777_v13 = vpack.c.bf16 %v1761_v62, %v1745_v3  ;;  %v1778_v15 = vpack.c.bf16 %v1762_v0, %v1746_v4 }
 0xc21   :  { %2977 = vmatpush.bf16.msrb.mxu2 %v8324_v24  ;;  %2991 = vmatpush.bf16.msrb.mxu3 %v8332_v34  ;;  %v1687_v44 = vadd.f32 %v1686_v56, %v1324_v61  ;;  %v1701_v11 = vadd.f32 %v1700_v57, %v1325_v63 }
 0xc23   :  { %3007 = vmatpush.bf16.msra.mxu0 %v8338_v35  ;;  %3021 = vmatpush.bf16.msra.mxu1 %v8346_v27  ;;  %v1759_v18 = vmax.f32 %v1687_v44, 0.0  ;;  %v1760_v19 = vmax.f32 %v1701_v11, 0.0 }
 0xc25   :  { %2978 = vmatpush.bf16.msrb.mxu2 %v8323_v8  ;;  %2992 = vmatpush.bf16.msrb.mxu3 %v8331_v9  ;;  %v1775_v21 = vpack.c.bf16 %v1759_v18, %v1743_v20  ;;  %v1776_v29 = vpack.c.bf16 %v1760_v19, %v1744_v14 }
 0xc27   :  { %3008 = vmatpush.bf16.msra.mxu0 %v8337_v38  ;;  %3022 = vmatpush.bf16.msra.mxu1 %v8345_v39 }
 0xc29   :  { %2979 = vmatpush.bf16.msrb.mxu2 %v8322_v42  ;;  %2993 = vmatpush.bf16.msrb.mxu3 %v8330_v43 }
 0xc2b   :  { %3009 = vmatpush.bf16.msra.mxu0 %v8336_v47  ;;  %3023 = vmatpush.bf16.msra.mxu1 %v8344_v48 }
 0xc2d   :  { %2980 = vmatpush.bf16.msrb.mxu2 %v8321_v51  ;;  %2994 = vmatpush.bf16.msrb.mxu3 %v8329_v52 }
 0xc2f   :  { %3010 = vmatpush.bf16.msra.mxu0 %v8335_v58  ;;  %3024 = vmatpush.bf16.msra.mxu1 %v8343_v59 }
 0xc31   :  { %2981 = vmatpush.bf16.msrb.mxu2 %v8320_v1  ;;  %2995 = vmatpush.bf16.msrb.mxu3 %v8328_v40 }
 0xc32   :  { %3011 = vmatmul.bf16.vlgmr.msra.gmra.mxu0 %v1777_v13  ;;  %3025 = vmatmul.bf16.vlgmr.msra.gmra.mxu1 %v1778_v15 }
 0xc35   :  { %2982 = vmatpush.bf16.msrb.mxu2 %v8319_v16  ;;  %2996 = vmatpush.bf16.msrb.mxu3 %v8327_v17 }
 0xc38   :  { %2983 = vmatmul.bf16.vlgmr.msrb.gmra.mxu2 %v1775_v21  ;;  %2997 = vmatmul.bf16.vlgmr.msrb.gmra.mxu3 %v1776_v29 }
 0xc6f   :  { %v2844_v30 = vpop.f32.mrf.mxu0  ;;  %v2858_v31 = vpop.f32.mrf.mxu1 }
 0xc77   :  { %v2846_v6 = vpop.f32.mrf.mxu0  ;;  %v2860_v24 = vpop.f32.mrf.mxu1 }
 0xc7b   :  { %v2816_v23 = vpop.f32.mrf.mxu2  ;;  %v2830_v26 = vpop.f32.mrf.mxu3 }
 0xc7c   :  { %v2817_v34 = vadd.f32 %v8555_v7, %v2816_v23 }
 0xc7e   :  { %v2831_v36 = vadd.f32 %v2830_v26, %v2817_v34 }
 0xc7f   :  { %v2900_v37 = vpop.f32.mrf.mxu0  ;;  %v2914_v8 = vpop.f32.mrf.mxu1 }
 0xc80   :  { %v2845_v9 = vadd.f32 %v2844_v30, %v2831_v36 }
 0xc82   :  { %v2859_v28 = vadd.f32 %v2858_v31, %v2845_v9 }
 0xc83   :  { %v2818_v32 = vpop.f32.mrf.mxu2  ;;  %v2832_v33 = vpop.f32.mrf.mxu3 }
 0xc84   :  { %v2819_v38 = vadd.f32 %v8555_v7, %v2818_v32 }
 0xc86   :  { %v2833_v39 = vadd.f32 %v2832_v33, %v2819_v38 }
 0xc87   :  { %v2902_v45 = vpop.f32.mrf.mxu0  ;;  %v2916_v47 = vpop.f32.mrf.mxu1 }
 0xc88   :  { %v2847_v46 = vadd.f32 %v2846_v6, %v2833_v39 }
 0xc8a   :  { %v2861_v49 = vadd.f32 %v2860_v24, %v2847_v46 }
 0xc8b   :  { %v2872_v35 = vpop.f32.mrf.mxu2  ;;  %v2886_v27 = vpop.f32.mrf.mxu3 }
 0xc8c   :  { %v2873_v43 = vadd.f32 %v2872_v35, %v2859_v28 }
 0xc8e   :  { %v2887_v48 = vadd.f32 %v2886_v27, %v2873_v43  ;;  %v8356_v43 = vld [vmem:[%s10845_s1 + $0x48] sm:$0xff] }
 0xc8f   :  { %v2956_v55 = vpop.f32.mrf.mxu0  ;;  %v2970_v58 = vpop.f32.mrf.mxu1  ;;  %3193 = vmatpush.bf16.msrb.mxu0 %v8356_v43 }
 0xc90   :  { %v2901_v50 = vadd.f32 %v2900_v37, %v2887_v48  ;;  %v8353_v48 = vld [vmem:[%s10844_s3 + $0x40] sm:$0xff] }
 0xc92   :  { %v2915_v57 = vadd.f32 %v2914_v8, %v2901_v50 }
 0xc93   :  { %v2874_v41 = vpop.f32.mrf.mxu2  ;;  %v2888_v42 = vpop.f32.mrf.mxu3 }
 0xc94   :  { %v2875_v51 = vadd.f32 %v2874_v41, %v2861_v49  ;;  %v8355_v49 = vld [vmem:[%s10845_s1 + $0x40] sm:$0xff] }
 0xc95   :  { %3194 = vmatpush.bf16.msrb.mxu0 %v8355_v49 }
 0xc96   :  { %v2889_v56 = vadd.f32 %v2888_v42, %v2875_v51  ;;  %v8354_v42 = vld [vmem:[%s10844_s3 + $0x48] sm:$0xff] }
 0xc97   :  { %v2958_v40 = vpop.f32.mrf.mxu0  ;;  %v2972_v44 = vpop.f32.mrf.mxu1  ;;  %3157 = vmatpush.bf16.msra.mxu3 %v8354_v42 }
 0xc98   :  { %v2903_v61 = vadd.f32 %v2902_v45, %v2889_v56  ;;  %v8357_v56 = vld [vmem:[%s10843_s0 + $0x50] sm:$0xff] }
 0xc9a   :  { %v2917_v1 = vadd.f32 %v2916_v47, %v2903_v61  ;;  %v8351_v47 = vld [vmem:[%s10843_s0 + $0x40] sm:$0xff] }
 0xc9b   :  { %v2928_v52 = vpop.f32.mrf.mxu2  ;;  %v2942_v53 = vpop.f32.mrf.mxu3  ;;  %3158 = vmatpush.bf16.msra.mxu3 %v8353_v48 }
 0xc9c   :  { %v2929_v59 = vadd.f32 %v2928_v52, %v2915_v57  ;;  %v8358_v52 = vld [vmem:[%s10843_s0 + $0x58] sm:$0xff]  ;;  %v8359_v57 = vld [vmem:[%s10844_s3 + $0x50] sm:$0xff] }
 0xc9e   :  { %v2943_v63 = vadd.f32 %v2942_v53, %v2929_v59  ;;  %v8360_v53 = vld [vmem:[%s10844_s3 + $0x58] sm:$0xff] }
 0xc9f   :  { %3348 = vmatpush.bf16.msrb.mxu3 %v8358_v52  ;;  %3384 = vmatpush.bf16.msra.mxu0 %v8360_v53  ;;  %v8563_v52 = vld [vmem:[%s10847_s9 + $0x5] ss:$0 sm:$0xff] }
 0xca0   :  { %v2957_v3 = vadd.f32 %v2956_v55, %v2943_v63 }
 0xca2   :  { %v2971_v12 = vadd.f32 %v2970_v58, %v2957_v3 }
 0xca3   :  { %v2930_v62 = vpop.f32.mrf.mxu2  ;;  %v2944_v0 = vpop.f32.mrf.mxu3  ;;  %3349 = vmatpush.bf16.msrb.mxu3 %v8357_v56  ;;  %3385 = vmatpush.bf16.msra.mxu0 %v8359_v57 }
 0xca4   :  { %v2931_v4 = vadd.f32 %v2930_v62, %v2917_v1 }
 0xca6   :  { %v2945_v11 = vadd.f32 %v2944_v0, %v2931_v4 }
 0xca8   :  { %v2959_v17 = vadd.f32 %v2958_v40, %v2945_v11 }
 0xcaa   :  { %v2973_v14 = vadd.f32 %v2972_v44, %v2959_v17  ;;  %v8557_v17 = vld [vmem:[%s10798_s20] ss:$0 sm:$0xff] }
 0xcaf   :  { %v3012_v16 = vpop.f32.mrf.mxu0  ;;  %v3026_v19 = vpop.f32.mrf.mxu1 }
 0xcb7   :  { %v3014_v33 = vpop.f32.mrf.mxu0  ;;  %v3028_v7 = vpop.f32.mrf.mxu1 }
 0xcbb   :  { %v2984_v22 = vpop.f32.mrf.mxu2  ;;  %v2998_v13 = vpop.f32.mrf.mxu3 }
 0xcbc   :  { %v2985_v15 = vadd.f32 %v2984_v22, %v2971_v12  ;;  %v8556_v22 = vld [vmem:[%s10797_s19] ss:$0 sm:$0xff] }
 0xcbe   :  { %v2999_v18 = vadd.f32 %v2998_v13, %v2985_v15 }
 0xcc0   :  { %v3013_v20 = vadd.f32 %v3012_v16, %v2999_v18 }
 0xcc2   :  { %v3027_v21 = vadd.f32 %v3026_v19, %v3013_v20 }
 0xcc3   :  { %v2986_v29 = vpop.f32.mrf.mxu2  ;;  %v3000_v30 = vpop.f32.mrf.mxu3 }
 0xcc4   :  { %v2987_v23 = vadd.f32 %v2986_v29, %v2973_v14  ;;  %v3031_v26 = vadd.f32 %v3027_v21, %v9230_v5 }
 0xcc6   :  { %v3001_v31 = vadd.f32 %v3000_v30, %v2987_v23  ;;  %v3035_v32 = vsel %vm183_vm2, %v3031_v26, 0.0  ;;  %v8558_v30 = vld [vmem:[%s10847_s9 + $0x4] ss:$0 sm:$0xff] }
 0xcc7   :  { %3036 = vadd.xlane.f32.xlu2 %v3035_v32 }
 0xcc8   :  { %v3015_v6 = vadd.f32 %v3014_v33, %v3001_v31 }
 0xcca   :  { %v3029_v24 = vadd.f32 %v3028_v7, %v3015_v6  ;;  %v8560_v6 = vld [vmem:[%s10848_s6 + $0x4] ss:$0 sm:$0xff] }
 0xccc   :  { %v3032_v34 = vadd.f32 %v3029_v24, %v9232_v10  ;;  %v8352_v10 = vld [vmem:[%s10843_s0 + $0x48] sm:$0xff] }
 0xccd   :  { %3121 = vmatpush.bf16.msra.mxu2 %v8352_v10 }
 0xcce   :  { %v3038_v35 = vsel %vm183_vm2, %v3032_v34, 0.0 }
 0xccf   :  { %3039 = vadd.xlane.f32.xlu0 %v3038_v35 }
 0xcd1   :  { %3122 = vmatpush.bf16.msra.mxu2 %v8351_v47 }
 0xd3a   :  { %v3037_v27 = vpop.xlane.xlu2 %3036 }
 0xd3b   :  { %v3041_v36 = vmul.f32 %v3037_v27, %v9090_v25  ;;  %v8559_v27 = vld [vmem:[%s10849_s7 + $0x4] ss:$0 sm:$0xff] }
 0xd3d   :  { %v3043_v37 = vsub.f32 %v3031_v26, %v3041_v36  ;;  %v8362_v36 = vld [vmem:[%s10845_s1 + $0x58] sm:$0xff] }
 0xd3f   :  { %v3045_v8 = vmul.f32 %v3043_v37, %v3043_v37 }
 0xd41   :  { %v3047_v5 = vsel %vm183_vm2, %v3045_v8, 0.0 }
 0xd42   :  { %v3040_v9 = vpop.xlane.xlu0 %3039  ;;  %3048 = vadd.xlane.f32.xlu1 %v3047_v5  ;;  %v8361_v5 = vld [vmem:[%s10845_s1 + $0x50] sm:$0xff] }
 0xd43   :  { %v3042_v38 = vmul.f32 %v3040_v9, %v9090_v25  ;;  %v8561_v9 = vld [vmem:[%s10848_s6 + $0x5] ss:$0 sm:$0xff] }
 0xd45   :  { %v3044_v39 = vsub.f32 %v3032_v34, %v3042_v38 }
 0xd47   :  { %v3046_v28 = vmul.f32 %v3044_v39, %v3044_v39 }
 0xd49   :  { %v3050_v41 = vsel %vm183_vm2, %v3046_v28, 0.0 }
 0xd4a   :  { %3051 = vadd.xlane.f32.xlu2 %v3050_v41 }
 0xdb5   :  { %v3049_v45 = vpop.xlane.xlu1 %3048 }
 0xdb6   :  { %v3053_v46 = vmul.f32 %v3049_v45, %v9090_v25 }
 0xdb8   :  { %v3055_v50 = vadd.f32 1e-05, %v3053_v46 }
 0xdba   :  { %8616 = vrsqrt.f32 %v3055_v50  ;;  %vm3063_vm11 = vweird.f32 %v3055_v50 }
 0xdbd   :  { %v3052_v51 = vpop.xlane.xlu2 %3051 }
 0xdbe   :  { %v3054_v55 = vmul.f32 %v3052_v51, %v9090_v25 }
 0xdc0   :  { %v8617_v58 = vpop.eup %8616  ;;  %v3056_v59 = vadd.f32 1e-05, %v3054_v55 }
 0xdc1   :  { %v3058_v61 = vmul.f32 %v8617_v58, %v3055_v50  ;;  %vm3064_vm10 = vweird.f32 %v8617_v58 }
 0xdc2   :  { %8618 = vrsqrt.f32 %v3056_v59  ;;  %vm3065_vm12 = vmor %vm3063_vm11, %vm3064_vm10  ;;  %vm3073_vm14 = vweird.f32 %v3056_v59 }
 0xdc3   :  { %v3059_v63 = vmul.f32 %v8617_v58, %v3058_v61 }
 0xdc5   :  { %v3060_v62 = vmul.f32 0.5, %v3059_v63 }
 0xdc7   :  { %v3061_v0 = vsub.f32 1.5, %v3060_v62 }
 0xdc8   :  { %v8619_v1 = vpop.eup %8618 }
 0xdc9   :  { %v3062_v40 = vmul.f32 %v8617_v58, %v3061_v0  ;;  %v3068_v3 = vmul.f32 %v8619_v1, %v3056_v59  ;;  %vm3074_vm13 = vweird.f32 %v8619_v1 }
 0xdca   :  { %vm3075_vm15 = vmor %vm3073_vm14, %vm3074_vm13 }
 0xdcb   :  { %v3069_v4 = vmul.f32 %v8619_v1, %v3068_v3  ;;  %v3066_v44 = vsel %vm3065_vm12, %v8617_v58, %v3062_v40 }
 0xdcc   :  { %v3077_v13 = vmul.f32 %v3066_v44, %v3043_v37 }
 0xdcd   :  { %v3070_v11 = vmul.f32 0.5, %v3069_v4 }
 0xdce   :  { %v3082_v18 = vmul.f32 %v8556_v22, %v3077_v13 }
 0xdcf   :  { %v3071_v12 = vsub.f32 1.5, %v3070_v11 }
 0xdd0   :  { %v9810_v14 = vadd.f32 %v8557_v17, %v3082_v18 }
 0xdd1   :  { %v3072_v15 = vmul.f32 %v8619_v1, %v3071_v12 }
 0xdd3   :  { %v3076_v16 = vsel %vm3075_vm15, %v8619_v1, %v3072_v15 }
 0xdd4   :  { %v3078_v19 = vmul.f32 %v3076_v16, %v3044_v39 }
 0xdd6   :  { %v3083_v20 = vmul.f32 %v8556_v22, %v3078_v19 }
 0xdd8   :  { %v9812_v21 = vadd.f32 %v8557_v17, %v3083_v20 }
 0xdda   :  { %v9816_v29 = vpack.c.bf16 %v9812_v21, %v9810_v14 }
 0xddc   :  { %7022 = vmatmul.msk.bf16.vlgmr.msra.gmra.mxu2 %vm183_vm2, %v9816_v29  ;;  %7036 = vmatmul.msk.bf16.vlgmr.msra.gmra.mxu3 %vm183_vm2, %v9816_v29 }
 0xddd   :  { %7050 = vmatmul.msk.bf16.vlgmr.msrb.gmra.mxu0 %vm183_vm2, %v9816_v29 }
 0xdec   :  { %7071 = vmatmul.msk.bf16.vlgmr.msrb.gmra.mxu3 %vm183_vm2, %v9816_v29 }
 0xded   :  { %7085 = vmatmul.msk.bf16.vlgmr.msra.gmra.mxu0 %vm183_vm2, %v9816_v29 }
 0xe5a   :  { %v3196_v23 = vpop.f32.mrf.mxu0 }
 0xe5b   :  { %v3197_v33 = vadd.f32 %v8558_v30, %v3196_v23 }
 0xe5f   :  { %v3160_v26 = vpop.f32.mrf.mxu3  ;;  %v3124_v34 = vpop.f32.mrf.mxu2 }
 0xe60   :  { %v3161_v37 = vadd.f32 %v8560_v6, %v3160_v26  ;;  %v3125_v8 = vadd.f32 %v8559_v27, %v3124_v34 }
 0xe62   :  { %v3198_v31 = vpop.f32.mrf.mxu0 }
 0xe63   :  { %v3199_v32 = vadd.f32 %v8558_v30, %v3198_v31  ;;  %v8364_v30 = vld [vmem:[%s10843_s0 + $0x68] sm:$0xff] }
 0xe65   :  { %3308 = vmatpush.msrb.mxu2 %v3199_v32 }
 0xe67   :  { %3309 = vmatpush.msrb.mxu2 %v3197_v33  ;;  %v3162_v7 = vpop.f32.mrf.mxu3  ;;  %v3126_v28 = vpop.f32.mrf.mxu2 }
 0xe68   :  { %v3163_v24 = vadd.f32 %v8560_v6, %v3162_v7  ;;  %v3127_v41 = vadd.f32 %v8559_v27, %v3126_v28  ;;  %v7057_v28 = vld [vmem:[%s10850_s12 + $0x10] sm:$0xf] }
 0xe6a   :  { %v3387_v35 = vpop.f32.mrf.mxu0  ;;  %7051 = vmatpush.xpose.msk.msrb.mxu1 %vm319_vm3, %v3163_v24  ;;  %v8363_v24 = vld [vmem:[%s10843_s0 + $0x60] sm:$0xff] }
 0xe6b   :  { %v3388_v10 = vadd.f32 %v8561_v9, %v3387_v35 }
 0xe6e   :  { %7052 = vmatpush.xpose.msk.msrb.mxu1 %vm319_vm3, %v3161_v37 }
 0xe71   :  { %7053 = vmatmul.msk.f32.vlgmr.msrb.gmra.mxu1 %vm319_vm3, %v3125_v8  ;;  %v3351_v8 = vpop.f32.mrf.mxu3 }
 0xe72   :  { %3420 = vmatpush.bf16.msra.mxu1 %v8362_v36  ;;  %v3389_v38 = vpop.f32.mrf.mxu0 }
 0xe73   :  { %v3390_v39 = vadd.f32 %v8561_v9, %v3389_v38 }
 0xe75   :  { %7100 = vmatpush.xpose.msk.msra.mxu2 %vm319_vm3, %v3390_v39 }
 0xe76   :  { %3421 = vmatpush.bf16.msra.mxu1 %v8361_v5  ;;  %v8562_v5 = vld [vmem:[%s10849_s7 + $0x5] ss:$0 sm:$0xff] }
 0xe77   :  { %v3352_v9 = vadd.f32 %v8562_v5, %v3351_v8  ;;  %v8367_v8 = vld [vmem:[%s10845_s1 + $0x60] sm:$0xff] }
 0xe79   :  { %7101 = vmatpush.xpose.msk.msra.mxu2 %vm319_vm3, %v3388_v10  ;;  %7054 = vmatmul.msk.f32.gmra.mxu1 %vm319_vm3, %v3127_v41  ;;  %v3353_v38 = vpop.f32.mrf.mxu3  ;;  %v3571_v41 = vsel %vm146_vm0, %v7057_v28, 0  ;;  %v8369_v28 = vld [vmem:[%s10843_s0 + $0x70] sm:$0xff] }
 0xe7a   :  { %v3354_v39 = vadd.f32 %v8562_v5, %v3353_v38  ;;  %3580 = vmatpush.bf16.msrb.mxu1 %v3571_v41  ;;  %v8370_v38 = vld [vmem:[%s10843_s0 + $0x78] sm:$0xff] }
 0xe81   :  { %7099 = vmatmul.msk.bf16.vlgmr.msra.gmra.mxu1 %vm183_vm2, %v9816_v29 }
 0xeee   :  { %v3230_v42 = vpop.f32.mrf.mxu1 }
 0xeef   :  { %v3236_v43 = vmul.f32 0.35355338, %v3230_v42 }
 0xef1   :  { %v3238_v45 = vadd.f32 %v3236_v43, %v8927_v60 }
 0xef3   :  { %v3240_v46 = vsel %vm359_vm5, %v3238_v45, -inf }
 0xef4   :  { %3241 = vmax.xlane.f32.xlu0 %v3240_v46 }
 0xef6   :  { %v3233_v47 = vpop.f32.mrf.mxu1 }
 0xef7   :  { %v3237_v48 = vmul.f32 0.35355338, %v3233_v47 }
 0xef9   :  { %v3239_v49 = vadd.f32 %v3237_v48, %v8931_v2 }
 0xefb   :  { %v3243_v50 = vsel %vm359_vm5, %v3239_v49, -inf }
 0xefc   :  { %3244 = vmax.xlane.f32.xlu1 %v3243_v50 }
 0xefe   :  { %v3423_v51 = vpop.f32.mrf.mxu1 }
 0xeff   :  { %v3424_v56 = vadd.f32 %v8563_v52, %v3423_v51 }
 0xf06   :  { %v3425_v53 = vpop.f32.mrf.mxu1 }
 0xf07   :  { %v3426_v55 = vadd.f32 %v8563_v52, %v3425_v53 }
 0xf09   :  { %3535 = vmatpush.msra.mxu3 %v3426_v55 }
 0xf0b   :  { %3536 = vmatpush.msra.mxu3 %v3424_v56 }
 0xf67   :  { %v3242_v57 = vpop.xlane.xlu0 %3241 }
 0xf68   :  { %v3246_v58 = vsub.f32 %v3238_v45, %v3242_v57 }
 0xf6a   :  { %v3248_v59 = vmul.f32 1.442695, %v3246_v58 }
 0xf6c   :  { %8620 = vpow2.f32 %v3248_v59 }
 0xf6f   :  { %v3245_v61 = vpop.xlane.xlu1 %3244 }
 0xf70   :  { %v3247_v63 = vsub.f32 %v3239_v49, %v3245_v61 }
 0xf72   :  { %v8621_v62 = vpop.eup %8620  ;;  %v3250_v0 = vmul.f32 1.442695, %v3247_v63 }
 0xf73   :  { %v3252_v1 = vsel %vm359_vm5, %v8621_v62, 0.0 }
 0xf74   :  { %8622 = vpow2.f32 %v3250_v0  ;;  %3253 = vadd.xlane.f32.xlu2 %v3252_v1  ;;  %v8366_v1 = vld [vmem:[%s10844_s3 + $0x68] sm:$0xff] }
 0xf75   :  { %3651 = vmatpush.bf16.msrb.mxu3 %v8366_v1 }
 0xf7a   :  { %v8623_v40 = vpop.eup %8622 }
 0xf7b   :  { %v3255_v3 = vsel %vm359_vm5, %v8623_v40, 0.0 }
 0xf7c   :  { %3256 = vadd.xlane.f32.xlu0 %v3255_v3 }
 0xfe7   :  { %v3254_v4 = vpop.xlane.xlu2 %3253 }
 0xfe8   :  { %8624 = vrcp.f32 %v3254_v4  ;;  %v3269_v13 = vand.u32 2147483648, %v3254_v4  ;;  %v3267_v16 = vand.u32 2147483647, %v3254_v4  ;;  %vm3263_vm4 = vweird.f32 %v3254_v4 }
 0xfea   :  { %v3270_v19 = vor.u32 1.1754944e-38, %v3269_v13  ;;  %vm3268_vm7 = vcmp.eq.f32.partialorder %v3267_v16, 8.507059e+37 }
 0xfee   :  { %v8625_v44 = vpop.eup %8624 }
 0xfef   :  { %v3259_v11 = vmul.f32 %v8625_v44, %v3254_v4  ;;  %v3257_v12 = vpop.xlane.xlu0 %3256  ;;  %vm3264_vm1 = vweird.f32 %v8625_v44 }
 0xff0   :  { %8626 = vrcp.f32 %v3257_v12  ;;  %vm3265_vm6 = vmor %vm3263_vm4, %vm3264_vm1  ;;  %v3284_v33 = vand.u32 2147483648, %v3257_v12  ;;  %v3282_v7 = vand.u32 2147483647, %v3257_v12  ;;  %vm3278_vm9 = vweird.f32 %v3257_v12 }
 0xff1   :  { %v3260_v22 = vsub.f32 1.0, %v3259_v11 }
 0xff2   :  { %v3285_v35 = vor.u32 1.1754944e-38, %v3284_v33  ;;  %vm3283_vm11 = vcmp.eq.f32.partialorder %v3282_v7, 8.507059e+37 }
 0xff3   :  { %v3261_v15 = vmul.f32 %v8625_v44, %v3260_v22 }
 0xff5   :  { %v3262_v17 = vadd.f32 %v8625_v44, %v3261_v15 }
 0xff6   :  { %v8627_v18 = vpop.eup %8626 }
 0xff7   :  { %v3266_v20 = vsel %vm3265_vm6, %v8625_v44, %v3262_v17  ;;  %v3274_v23 = vmul.f32 %v8627_v18, %v3257_v12  ;;  %vm3279_vm8 = vweird.f32 %v8627_v18 }
 0xff8   :  { %v3271_v26 = vsel %vm3268_vm7, %v3270_v19, %v3266_v20  ;;  %vm3280_vm10 = vmor %vm3278_vm9, %vm3279_vm8 }
 0xff9   :  { %v3272_v31 = vmul.f32 %v8621_v62, %v3271_v26  ;;  %v3275_v32 = vsub.f32 1.0, %v3274_v23 }
 0xffb   :  { %v3276_v6 = vmul.f32 %v8627_v18, %v3275_v32  ;;  %7055 = vmatmul.msk.f32.vlgmr.msrb.gmra.mxu2 %vm359_vm5, %v3272_v31 }
 0xffc   :  { %3615 = vmatpush.bf16.msrb.mxu2 %v8364_v30 }
 0xffd   :  { %v3277_v34 = vadd.f32 %v8627_v18, %v3276_v6 }
 0xfff   :  { %v3281_v27 = vsel %vm3280_vm10, %v8627_v18, %v3277_v34 }
0x1000   :  { %v3286_v36 = vsel %vm3283_vm11, %v3285_v35, %v3281_v27  ;;  %3616 = vmatpush.bf16.msrb.mxu2 %v8363_v24  ;;  %v7106_v27 = vld [vmem:[%s10850_s12 + $0x14] sm:$0xf] }
0x1001   :  { %v3287_v37 = vmul.f32 %v8623_v40, %v3286_v36  ;;  %v8365_v40 = vld [vmem:[%s10844_s3 + $0x60] sm:$0xff]  ;;  %v3551_v36 = vsel %vm146_vm0, %v7106_v27, 0  ;;  %v8373_v27 = vld [vmem:[%s10845_s1 + $0x70] sm:$0xff] }
0x1002   :  { %3652 = vmatpush.bf16.msrb.mxu3 %v8365_v40  ;;  %3560 = vmatpush.bf16.msrb.mxu0 %v3551_v36 }
0x1003   :  { %7056 = vmatmul.msk.f32.gmra.mxu2 %vm359_vm5, %v3287_v37  ;;  %v8368_v37 = vld [vmem:[%s10845_s1 + $0x68] sm:$0xff] }
0x1006   :  { %3687 = vmatpush.bf16.msra.mxu0 %v8368_v37 }
0x100a   :  { %3688 = vmatpush.bf16.msra.mxu0 %v8367_v8 }
0x100b   :  { %7102 = vmatmul.msk.f32.vlgmr.msra.gmra.mxu2 %vm319_vm3, %v3352_v9 }
0x1013   :  { %7103 = vmatmul.msk.f32.gmra.mxu2 %vm319_vm3, %v3354_v39 }
0x101b   :  { %7122 = vmatmul.msk.bf16.vlgmr.msrb.gmra.mxu2 %vm183_vm2, %v9816_v29 }
0x107e   :  { %v3311_v10 = vpop.f32.mrf.mxu2 }
0x1086   :  { %v3314_v42 = vpop.f32.mrf.mxu2 }
0x1087   :  { %v3317_v43 = vpack.c.bf16 %v3314_v42, %v3311_v10  ;;  %v8565_v10 = vld [vmem:[%s10848_s6 + $0x6] ss:$0 sm:$0xff] }
0x1089   :  { %7108 = vmatmul.msk.bf16.vlgmr.msrb.gmra.mxu1 %vm319_vm3, %v3317_v43 }
0x108e   :  { %v3457_v45 = vpop.f32.mrf.mxu2 }
0x108f   :  { %v3463_v46 = vmul.f32 0.35355338, %v3457_v45 }
0x1091   :  { %v3465_v47 = vadd.f32 %v3463_v46, %v8927_v60  ;;  %v8564_v46 = vld [vmem:[%s10849_s7 + $0x6] ss:$0 sm:$0xff] }
0x1093   :  { %v3467_v48 = vsel %vm359_vm5, %v3465_v47, -inf }
0x1094   :  { %3468 = vmax.xlane.f32.xlu1 %v3467_v48 }
0x1096   :  { %v3460_v49 = vpop.f32.mrf.mxu2 }
0x1097   :  { %v3464_v50 = vmul.f32 0.35355338, %v3460_v49 }
0x1099   :  { %v3466_v51 = vadd.f32 %v3464_v50, %v8931_v2  ;;  %v8371_v50 = vld [vmem:[%s10844_s3 + $0x70] sm:$0xff] }
0x109b   :  { %v3470_v52 = vsel %vm359_vm5, %v3466_v51, -inf }
0x109c   :  { %3471 = vmax.xlane.f32.xlu2 %v3470_v52 }
0x109e   :  { %v3618_v45 = vpop.f32.mrf.mxu2 }
0x109f   :  { %v3619_v49 = vadd.f32 %v8564_v46, %v3618_v45 }
0x1107   :  { %v3469_v53 = vpop.xlane.xlu1 %3468 }
0x1108   :  { %v3473_v55 = vsub.f32 %v3465_v47, %v3469_v53  ;;  %v8372_v47 = vld [vmem:[%s10844_s3 + $0x78] sm:$0xff]  ;;  %v9938_v53 = vpop.f32.mrf.mxu1 }
0x110a   :  { %v3475_v56 = vmul.f32 1.442695, %v3473_v55 }
0x110c   :  { %8628 = vpow2.f32 %v3475_v56 }
0x110f   :  { %v3472_v57 = vpop.xlane.xlu2 %3471 }
0x1110   :  { %v3474_v58 = vsub.f32 %v3466_v51, %v3472_v57  ;;  %v3620_v51 = vpop.f32.mrf.mxu2  ;;  %v3584_v56 = vpop.f32.mrf.mxu1 }
0x1111   :  { %v3621_v52 = vadd.f32 %v8564_v46, %v3620_v51 }
0x1112   :  { %v8629_v59 = vpop.eup %8628  ;;  %v3477_v61 = vmul.f32 1.442695, %v3474_v58 }
0x1113   :  { %v3479_v63 = vsel %vm359_vm5, %v8629_v59, 0.0 }
0x1114   :  { %8630 = vpow2.f32 %v3477_v61  ;;  %3480 = vadd.xlane.f32.xlu0 %v3479_v63  ;;  %v7157_v61 = vld [vmem:[%s10850_s12 + $0x18] sm:$0xf] }
0x1115   :  { %v3818_v63 = vsel %vm146_vm0, %v7157_v61, 0 }
0x111a   :  { %v8631_v62 = vpop.eup %8630 }
0x111b   :  { %v3482_v0 = vsel %vm359_vm5, %v8631_v62, 0.0 }
0x111c   :  { %3483 = vadd.xlane.f32.xlu1 %v3482_v0 }
0x1187   :  { %v3481_v3 = vpop.xlane.xlu0 %3480 }
0x1188   :  { %8632 = vrcp.f32 %v3481_v3  ;;  %v3496_v22 = vand.u32 2147483648, %v3481_v3  ;;  %v3494_v15 = vand.u32 2147483647, %v3481_v3  ;;  %vm3490_vm13 = vweird.f32 %v3481_v3 }
0x118a   :  { %v3497_v18 = vor.u32 1.1754944e-38, %v3496_v22  ;;  %vm3495_vm15 = vcmp.eq.f32.partialorder %v3494_v15, 8.507059e+37 }
0x118e   :  { %v8633_v4 = vpop.eup %8632 }
0x118f   :  { %v3486_v44 = vmul.f32 %v8633_v4, %v3481_v3  ;;  %v3484_v11 = vpop.xlane.xlu1 %3483  ;;  %vm3491_vm12 = vweird.f32 %v8633_v4 }
0x1190   :  { %8634 = vrcp.f32 %v3484_v11  ;;  %vm3492_vm14 = vmor %vm3490_vm13, %vm3491_vm12  ;;  %v3511_v31 = vand.u32 2147483648, %v3484_v11  ;;  %v3509_v33 = vand.u32 2147483647, %v3484_v11  ;;  %vm3505_vm4 = vweird.f32 %v3484_v11 }
0x1191   :  { %v3487_v12 = vsub.f32 1.0, %v3486_v44 }
0x1192   :  { %v3512_v7 = vor.u32 1.1754944e-38, %v3511_v31  ;;  %vm3510_vm7 = vcmp.eq.f32.partialorder %v3509_v33, 8.507059e+37 }
0x1193   :  { %v3488_v13 = vmul.f32 %v8633_v4, %v3487_v12 }
0x1195   :  { %v3489_v16 = vadd.f32 %v8633_v4, %v3488_v13 }
0x1196   :  { %v8635_v17 = vpop.eup %8634 }
0x1197   :  { %v3493_v19 = vsel %vm3492_vm14, %v8633_v4, %v3489_v16  ;;  %v3501_v20 = vmul.f32 %v8635_v17, %v3484_v11  ;;  %vm3506_vm1 = vweird.f32 %v8635_v17 }
0x1198   :  { %v3498_v23 = vsel %vm3495_vm15, %v3497_v18, %v3493_v19  ;;  %vm3507_vm6 = vmor %vm3505_vm4, %vm3506_vm1 }
0x1199   :  { %v3499_v26 = vmul.f32 %v8629_v59, %v3498_v23  ;;  %v3502_v30 = vsub.f32 1.0, %v3501_v20 }
0x119b   :  { %v3503_v32 = vmul.f32 %v8635_v17, %v3502_v30  ;;  %7104 = vmatmul.msk.f32.vlgmr.msra.gmra.mxu3 %vm359_vm5, %v3499_v26 }
0x119c   :  { %3827 = vmatpush.bf16.msra.mxu3 %v3818_v63 }
0x119d   :  { %v3504_v6 = vadd.f32 %v8635_v17, %v3503_v32 }
0x119f   :  { %v3508_v24 = vsel %vm3507_vm6, %v8635_v17, %v3504_v6  ;;  %v8568_v17 = vld [vmem:[%s10848_s6 + $0x7] ss:$0 sm:$0xff] }
0x11a0   :  { %v3513_v34 = vsel %vm3510_vm7, %v3512_v7, %v3508_v24 }
0x11a1   :  { %v3514_v35 = vmul.f32 %v8631_v62, %v3513_v34  ;;  %v8566_v62 = vld [vmem:[%s10847_s9 + $0x6] ss:$0 sm:$0xff] }
0x11a3   :  { %7105 = vmatmul.msk.f32.gmra.mxu3 %vm359_vm5, %v3514_v35  ;;  %v8374_v35 = vld [vmem:[%s10845_s1 + $0x78] sm:$0xff] }
0x11ab   :  { %7136 = vmatmul.msk.bf16.vlgmr.msrb.gmra.mxu3 %vm183_vm2, %v9816_v29 }
0x121e   :  { %v3538_v5 = vpop.f32.mrf.mxu3 }
0x1226   :  { %v3541_v9 = vpop.f32.mrf.mxu3 }
0x1227   :  { %v3544_v39 = vpack.c.bf16 %v3541_v9, %v3538_v5 }
0x1229   :  { %7107 = vmatmul.msk.bf16.vlgmr.msrb.gmra.mxu0 %vm319_vm3, %v3544_v39 }
0x122a   :  { %3864 = vmatpush.bf16.msrb.mxu0 %v8370_v38 }
0x122e   :  { %v3654_v41 = vpop.f32.mrf.mxu3  ;;  %3865 = vmatpush.bf16.msrb.mxu0 %v8369_v28 }
0x122f   :  { %v3655_v48 = vadd.f32 %v8565_v10, %v3654_v41 }
0x1236   :  { %v3656_v42 = vpop.f32.mrf.mxu3 }
0x1237   :  { %v3657_v43 = vadd.f32 %v8565_v10, %v3656_v42 }
0x1239   :  { %7150 = vmatmul.msk.bf16.vlgmr.msra.gmra.mxu0 %vm183_vm2, %v9816_v29  ;;  %7151 = vmatpush.xpose.msk.msra.mxu1 %vm319_vm3, %v3657_v43 }
0x123d   :  { %7152 = vmatpush.xpose.msk.msra.mxu1 %vm319_vm3, %v3655_v48 }
0x1240   :  { %7153 = vmatmul.msk.f32.vlgmr.msra.gmra.mxu1 %vm319_vm3, %v3619_v49 }
0x1241   :  { %3900 = vmatpush.bf16.msrb.mxu1 %v8372_v47 }
0x1245   :  { %3901 = vmatpush.bf16.msrb.mxu1 %v8371_v50 }
0x1248   :  { %7154 = vmatmul.msk.f32.gmra.mxu1 %vm319_vm3, %v3621_v52 }
0x1249   :  { %7172 = vmatmul.msk.bf16.vlgmr.msrb.gmra.mxu0 %vm183_vm2, %v9816_v29 }
0x1250   :  { %7186 = vmatmul.msk.bf16.vlgmr.msrb.gmra.mxu1 %vm183_vm2, %v9816_v29 }
0x12a6   :  { %v9940_v55 = vpop.f32.mrf.mxu0 }
0x12ae   :  { %v3564_v57 = vpop.f32.mrf.mxu0 }
0x12af   :  { %v9942_v58 = vadd.f32 %v3584_v56, %v3564_v57 }
0x12b6   :  { %v3690_v59 = vpop.f32.mrf.mxu0 }
0x12b7   :  { %v3691_v44 = vadd.f32 %v8566_v62, %v3690_v59 }
0x12bd   :  { %v3724_v0 = vpop.f32.mrf.mxu1 }
0x12be   :  { %v3730_v1 = vmul.f32 0.35355338, %v3724_v0  ;;  %v3692_v40 = vpop.f32.mrf.mxu0 }
0x12bf   :  { %v3693_v3 = vadd.f32 %v8566_v62, %v3692_v40 }
0x12c0   :  { %v3732_v4 = vadd.f32 %v3730_v1, %v8927_v60 }
0x12c1   :  { %3802 = vmatpush.msra.mxu2 %v3693_v3  ;;  %v8567_v3 = vld [vmem:[%s10849_s7 + $0x7] ss:$0 sm:$0xff] }
0x12c2   :  { %v3734_v11 = vsel %vm359_vm5, %v3732_v4, -inf }
0x12c3   :  { %3803 = vmatpush.msra.mxu2 %v3691_v44  ;;  %3735 = vmax.xlane.f32.xlu2 %v3734_v11 }
0x12c5   :  { %v3727_v12 = vpop.f32.mrf.mxu1  ;;  %3936 = vmatpush.bf16.msrb.mxu2 %v8374_v35 }
0x12c6   :  { %v3731_v22 = vmul.f32 0.35355338, %v3727_v12  ;;  %v3867_v40 = vpop.f32.mrf.mxu0 }
0x12c7   :  { %v3868_v11 = vadd.f32 %v8567_v3, %v3867_v40 }
0x12c8   :  { %v3733_v13 = vadd.f32 %v3731_v22, %v8931_v2 }
0x12c9   :  { %3937 = vmatpush.bf16.msrb.mxu2 %v8373_v27 }
0x12ca   :  { %v3737_v15 = vsel %vm359_vm5, %v3733_v13, -inf }
0x12cb   :  { %3738 = vmax.xlane.f32.xlu0 %v3737_v15  ;;  %v3583_v15 = vadd.f32 %v9938_v53, %v9940_v55 }
0x12cd   :  { %v3903_v16 = vpop.f32.mrf.mxu1 }
0x12ce   :  { %v3904_v20 = vadd.f32 %v8568_v17, %v3903_v16 }
0x12d5   :  { %v3905_v18 = vpop.f32.mrf.mxu1 }
0x12d6   :  { %v3906_v19 = vadd.f32 %v8568_v17, %v3905_v18 }
0x12d8   :  { %7201 = vmatpush.xpose.msk.msrb.mxu3 %vm319_vm3, %v3906_v19 }
0x12dc   :  { %7202 = vmatpush.xpose.msk.msrb.mxu3 %vm319_vm3, %v3904_v20 }
0x1336   :  { %v3736_v23 = vpop.xlane.xlu2 %3735 }
0x1337   :  { %v3740_v26 = vsub.f32 %v3732_v4, %v3736_v23  ;;  %v8569_v4 = vld [vmem:[%s10847_s9 + $0x7] ss:$0 sm:$0xff]  ;;  %s10856_s9 = sld [smem:[#allocation19_spill]] }
0x1339   :  { %v3742_v30 = vmul.f32 1.442695, %v3740_v26 }
0x133b   :  { %8636 = vpow2.f32 %v3742_v30 }
0x133e   :  { %v3739_v31 = vpop.xlane.xlu0 %3738 }
0x133f   :  { %v3741_v32 = vsub.f32 %v3733_v13, %v3739_v31 }
0x1341   :  { %v8637_v33 = vpop.eup %8636  ;;  %v3744_v6 = vmul.f32 1.442695, %v3741_v32 }
0x1342   :  { %v3746_v7 = vsel %vm359_vm5, %v8637_v33, 0.0 }
0x1343   :  { %8638 = vpow2.f32 %v3744_v6  ;;  %3747 = vadd.xlane.f32.xlu1 %v3746_v7 }
0x1349   :  { %v8639_v24 = vpop.eup %8638 }
0x134a   :  { %v3749_v34 = vsel %vm359_vm5, %v8639_v24, 0.0 }
0x134b   :  { %3750 = vadd.xlane.f32.xlu2 %v3749_v34 }
0x13b6   :  { %v3748_v36 = vpop.xlane.xlu1 %3747 }
0x13b7   :  { %8640 = vrcp.f32 %v3748_v36  ;;  %v3763_v38 = vand.u32 2147483648, %v3748_v36  ;;  %v3761_v28 = vand.u32 2147483647, %v3748_v36  ;;  %vm3757_vm9 = vweird.f32 %v3748_v36 }
0x13b9   :  { %v3764_v42 = vor.u32 1.1754944e-38, %v3763_v38  ;;  %vm3762_vm11 = vcmp.eq.f32.partialorder %v3761_v28, 8.507059e+37 }
0x13bd   :  { %v8641_v37 = vpop.eup %8640 }
0x13be   :  { %v3753_v8 = vmul.f32 %v8641_v37, %v3748_v36  ;;  %v3751_v5 = vpop.xlane.xlu2 %3750  ;;  %vm3758_vm8 = vweird.f32 %v8641_v37 }
0x13bf   :  { %8642 = vrcp.f32 %v3751_v5  ;;  %vm3759_vm10 = vmor %vm3757_vm9, %vm3758_vm8  ;;  %v3778_v49 = vand.u32 2147483648, %v3751_v5  ;;  %v3776_v51 = vand.u32 2147483647, %v3751_v5  ;;  %vm3772_vm13 = vweird.f32 %v3751_v5 }
0x13c0   :  { %v3754_v9 = vsub.f32 1.0, %v3753_v8 }
0x13c1   :  { %v3779_v56 = vor.u32 1.1754944e-38, %v3778_v49  ;;  %vm3777_vm15 = vcmp.eq.f32.partialorder %v3776_v51, 8.507059e+37 }
0x13c2   :  { %v3755_v39 = vmul.f32 %v8641_v37, %v3754_v9 }
0x13c4   :  { %v3756_v41 = vadd.f32 %v8641_v37, %v3755_v39 }
0x13c5   :  { %v8643_v10 = vpop.eup %8642 }
0x13c6   :  { %v3760_v43 = vsel %vm3759_vm10, %v8641_v37, %v3756_v41  ;;  %v3768_v45 = vmul.f32 %v8643_v10, %v3751_v5  ;;  %vm3773_vm12 = vweird.f32 %v8643_v10 }
0x13c7   :  { %v3765_v46 = vsel %vm3762_vm11, %v3764_v42, %v3760_v43  ;;  %vm3774_vm14 = vmor %vm3772_vm13, %vm3773_vm12 }
0x13c8   :  { %v3766_v47 = vmul.f32 %v8637_v33, %v3765_v46  ;;  %v3769_v48 = vsub.f32 1.0, %v3768_v45 }
0x13ca   :  { %v3770_v50 = vmul.f32 %v8643_v10, %v3769_v48  ;;  %7155 = vmatmul.msk.f32.vlgmr.msra.gmra.mxu2 %vm359_vm5, %v3766_v47 }
0x13cc   :  { %v3771_v52 = vadd.f32 %v8643_v10, %v3770_v50 }
0x13ce   :  { %v3775_v57 = vsel %vm3774_vm14, %v8643_v10, %v3771_v52 }
0x13cf   :  { %v3780_v59 = vsel %vm3777_vm15, %v3779_v56, %v3775_v57 }
0x13d0   :  { %v3781_v61 = vmul.f32 %v8639_v24, %v3780_v59 }
0x13d2   :  { %7156 = vmatmul.msk.f32.gmra.mxu2 %vm359_vm5, %v3781_v61 }
0x13da   :  { %7200 = vmatmul.msk.bf16.vlgmr.msrb.gmra.mxu2 %vm183_vm2, %v9816_v29  ;;  %v3869_v29 = vpop.f32.mrf.mxu0 }
0x13db   :  { %v3870_v13 = vadd.f32 %v8567_v3, %v3869_v29 }
0x144d   :  { %v3805_v63 = vpop.f32.mrf.mxu2 }
0x1455   :  { %v3808_v62 = vpop.f32.mrf.mxu2 }
0x1456   :  { %v3811_v0 = vpack.c.bf16 %v3808_v62, %v3805_v63  ;;  %v7207_v63 = vld [vmem:[%s10850_s12 + $0x1c] sm:$0xf] }
0x1457   :  { %v4067_v62 = vsel %vm146_vm0, %v7207_v63, 0 }
0x1458   :  { %7158 = vmatmul.msk.bf16.vlgmr.msra.gmra.mxu3 %vm319_vm3, %v3811_v0  ;;  %4076 = vmatpush.bf16.msra.mxu1 %v4067_v62 }
0x145d   :  { %v3939_v1 = vpop.f32.mrf.mxu2 }
0x145e   :  { %v3940_v22 = vadd.f32 %v8569_v4, %v3939_v1 }
0x1465   :  { %v3941_v44 = vpop.f32.mrf.mxu2 }
0x1466   :  { %v3942_v12 = vadd.f32 %v8569_v4, %v3941_v44  ;;  %v8570_v44 = vld [vmem:[%s10851_s4 + $0x1] ss:$0 sm:$0xff] }
0x1468   :  { %7203 = vmatmul.msk.f32.vlgmr.msrb.gmra.mxu3 %vm319_vm3, %v3868_v11  ;;  %4051 = vmatpush.msra.mxu0 %v3942_v12 }
0x146a   :  { %4052 = vmatpush.msra.mxu0 %v3940_v22 }
0x1470   :  { %7204 = vmatmul.msk.f32.gmra.mxu3 %vm319_vm3, %v3870_v13 }
0x14db   :  { %v3829_v16 = vpop.f32.mrf.mxu3 }
0x14dc   :  { %v9983_v17 = vadd.f32 %v3829_v16, %v3583_v15 }
0x14e3   :  { %v3831_v18 = vpop.f32.mrf.mxu3 }
0x14e4   :  { %v9986_v19 = vadd.f32 %v3831_v18, %v9942_v58 }
0x14eb   :  { %v3973_v20 = vpop.f32.mrf.mxu3 }
0x14ec   :  { %v3979_v23 = vmul.f32 0.35355338, %v3973_v20 }
0x14ee   :  { %v3981_v26 = vadd.f32 %v3979_v23, %v8927_v60 }
0x14f0   :  { %v3983_v30 = vsel %vm359_vm5, %v3981_v26, -inf }
0x14f1   :  { %3984 = vmax.xlane.f32.xlu0 %v3983_v30 }
0x14f3   :  { %v3976_v31 = vpop.f32.mrf.mxu3 }
0x14f4   :  { %v3980_v32 = vmul.f32 0.35355338, %v3976_v31 }
0x14f6   :  { %v3982_v33 = vadd.f32 %v3980_v32, %v8931_v2 }
0x14f8   :  { %v3986_v53 = vsel %vm359_vm5, %v3982_v33, -inf }
0x14f9   :  { %3987 = vmax.xlane.f32.xlu1 %v3986_v53  ;;  %v8399_v53 = vld [vmem:[%s10793_s15 + $0x1bc] sm:$0xf0] }
0x1564   :  { %v3985_v55 = vpop.xlane.xlu0 %3984 }
0x1565   :  { %v3989_v6 = vsub.f32 %v3981_v26, %v3985_v55  ;;  %v8391_v55 = vld [vmem:[%s10793_s15 + $0x184] sm:$0xf] }
0x1567   :  { %v3991_v7 = vmul.f32 1.442695, %v3989_v6 }
0x1569   :  { %8644 = vpow2.f32 %v3991_v7  ;;  %v7314_v7 = vld [vmem:[%s10793_s15 + $0x1c0] sm:$0xf0] }
0x156c   :  { %v3988_v58 = vpop.xlane.xlu1 %3987 }
0x156d   :  { %v3990_v24 = vsub.f32 %v3982_v33, %v3988_v58  ;;  %v7312_v33 = vld [vmem:[%s10793_s15 + $0x180] sm:$0xf]  ;;  %v7320_v58 = vld [vmem:[%s10793_s15 + $0x188] sm:$0xf] }
0x156e   :  { %v7313_v6 = vor.u32 %v8399_v53, %v7312_v33 }
0x156f   :  { %v8645_v34 = vpop.eup %8644  ;;  %v3993_v35 = vmul.f32 1.442695, %v3990_v24  ;;  %v8400_v24 = vld [vmem:[%s10793_s15 + $0x1c4] sm:$0xf0] }
0x1570   :  { %v3995_v60 = vsel %vm359_vm5, %v8645_v34, 0.0  ;;  %4392 = vmatpush.bf16.msra.mxu2 %v7313_v6 }
0x1571   :  { %8646 = vpow2.f32 %v3993_v35  ;;  %3996 = vadd.xlane.f32.xlu2 %v3995_v60  ;;  %v7317_v35 = vor.u32 %v8391_v55, %v7314_v7  ;;  %v7321_v60 = vor.u32 %v8400_v24, %v7320_v58  ;;  %v8571_v24 = vld [vmem:[%s10791_s13 + $0x1] ss:$0 sm:$0xff] }
0x1573   :  { %4406 = vmatpush.bf16.msra.mxu3 %v7317_v35  ;;  %4420 = vmatpush.bf16.msrb.mxu0 %v7321_v60 }
0x1577   :  { %v8647_v27 = vpop.eup %8646 }
0x1578   :  { %v3998_v36 = vsel %vm359_vm5, %v8647_v27, 0.0 }
0x1579   :  { %3999 = vadd.xlane.f32.xlu0 %v3998_v36  ;;  %v7322_v36 = vld [vmem:[%s10793_s15 + $0x1c8] sm:$0xf0] }
0x15e4   :  { %v3997_v2 = vpop.xlane.xlu2 %3996 }
0x15e5   :  { %8648 = vrcp.f32 %v3997_v2  ;;  %v4012_v38 = vand.u32 2147483648, %v3997_v2  ;;  %v4010_v28 = vand.u32 2147483647, %v3997_v2  ;;  %vm4006_vm4 = vweird.f32 %v3997_v2 }
0x15e7   :  { %v4013_v42 = vor.u32 1.1754944e-38, %v4012_v38  ;;  %vm4011_vm7 = vcmp.eq.f32.partialorder %v4010_v28, 8.507059e+37  ;;  %v7250_v28 = vld [vmem:[%s10793_s15 + $0x140] sm:$0xf0] }
0x15eb   :  { %v8649_v37 = vpop.eup %8648 }
0x15ec   :  { %v4002_v8 = vmul.f32 %v8649_v37, %v3997_v2  ;;  %v4000_v5 = vpop.xlane.xlu0 %3999  ;;  %vm4007_vm1 = vweird.f32 %v8649_v37 }
0x15ed   :  { %8650 = vrcp.f32 %v4000_v5  ;;  %vm4008_vm6 = vmor %vm4006_vm4, %vm4007_vm1  ;;  %v4027_v49 = vand.u32 2147483648, %v4000_v5  ;;  %v4025_v51 = vand.u32 2147483647, %v4000_v5  ;;  %vm4021_vm9 = vweird.f32 %v4000_v5 }
0x15ee   :  { %v4003_v9 = vsub.f32 1.0, %v4002_v8  ;;  %v7248_v8 = vld [vmem:[%s10793_s15 + $0x100] sm:$0xf] }
0x15ef   :  { %v4028_v56 = vor.u32 1.1754944e-38, %v4027_v49  ;;  %vm4026_vm11 = vcmp.eq.f32.partialorder %v4025_v51, 8.507059e+37  ;;  %v7328_v49 = vld [vmem:[%s10793_s15 + $0x190] sm:$0xf]  ;;  %v8393_v51 = vld [vmem:[%s10793_s15 + $0x194] sm:$0xf] }
0x15f0   :  { %v4004_v39 = vmul.f32 %v8649_v37, %v4003_v9  ;;  %v8375_v9 = vld [vmem:[%s10793_s15 + $0x104] sm:$0xf] }
0x15f2   :  { %v4005_v41 = vadd.f32 %v8649_v37, %v4004_v39 }
0x15f3   :  { %v8651_v10 = vpop.eup %8650 }
0x15f4   :  { %v4009_v43 = vsel %vm4008_vm6, %v8649_v37, %v4005_v41  ;;  %v4017_v45 = vmul.f32 %v8651_v10, %v4000_v5  ;;  %vm4022_vm8 = vweird.f32 %v8651_v10  ;;  %v8383_v5 = vld [vmem:[%s10793_s15 + $0x13c] sm:$0xf0]  ;;  %v7256_v41 = vld [vmem:[%s10793_s15 + $0x108] sm:$0xf] }
0x15f5   :  { %v4014_v46 = vsel %vm4011_vm7, %v4013_v42, %v4009_v43  ;;  %vm4023_vm10 = vmor %vm4021_vm9, %vm4022_vm8  ;;  %v7249_v39 = vor.u32 %v8383_v5, %v7248_v8  ;;  %v8384_v42 = vld [vmem:[%s10793_s15 + $0x144] sm:$0xf0]  ;;  %v8376_v43 = vld [vmem:[%s10793_s15 + $0x10c] sm:$0xf]  ;;  %vm6048_vm9 = vcmask 15360  }
0x15f6   :  { %v4015_v47 = vmul.f32 %v8645_v34, %v4014_v46  ;;  %v4018_v48 = vsub.f32 1.0, %v4017_v45  ;;  %v7258_v45 = vld [vmem:[%s10793_s15 + $0x148] sm:$0xf0]  ;;  %v7257_v46 = vor.u32 %v8384_v42, %v7256_v41  ;;  %v7344_v8 = vld [vmem:[%s10793_s15 + $0x1a0] sm:$0xf] }
0x15f7   :  { %4393 = vmatpush.bf16.msra.mxu2 %v7249_v39  ;;  %v8395_v5 = vld [vmem:[%s10793_s15 + $0x1a4] sm:$0xf]  ;;  %v8396_v41 = vld [vmem:[%s10793_s15 + $0x1ac] sm:$0xf] }
0x15f8   :  { %v4019_v50 = vmul.f32 %v8651_v10, %v4018_v48  ;;  %7205 = vmatmul.msk.f32.vlgmr.msra.gmra.mxu0 %vm359_vm5, %v4015_v47  ;;  %v7261_v47 = vor.u32 %v8376_v43, %v7258_v45 }
0x15f9   :  { %4421 = vmatpush.bf16.msrb.mxu0 %v7257_v46  ;;  %v7280_v46 = vld [vmem:[%s10793_s15 + $0x120] sm:$0xf] }
0x15fa   :  { %v4020_v52 = vadd.f32 %v8651_v10, %v4019_v50  ;;  %v8401_v50 = vld [vmem:[%s10793_s15 + $0x1cc] sm:$0xf0] }
0x15fc   :  { %v4024_v57 = vsel %vm4023_vm10, %v8651_v10, %v4020_v52  ;;  %v7253_v10 = vor.u32 %v8375_v9, %v7250_v28  ;;  %v7346_v9 = vld [vmem:[%s10793_s15 + $0x1e0] sm:$0xf0]  ;;  %v8404_v28 = vld [vmem:[%s10793_s15 + $0x1e4] sm:$0xf0] }
0x15fd   :  { %v4029_v59 = vsel %vm4026_vm11, %v4028_v56, %v4024_v57  ;;  %v7329_v56 = vor.u32 %v8401_v50, %v7328_v49  ;;  %v7330_v57 = vld [vmem:[%s10793_s15 + $0x1d0] sm:$0xf0]  ;;  %v7349_v45 = vor.u32 %v8395_v5, %v7346_v9  ;;  %v8379_v50 = vld [vmem:[%s10793_s15 + $0x124] sm:$0xf] }
0x15fe   :  { %v4030_v61 = vmul.f32 %v8647_v27, %v4029_v59  ;;  %v8392_v27 = vld [vmem:[%s10793_s15 + $0x18c] sm:$0xf]  ;;  %4407 = vmatpush.bf16.msra.mxu3 %v7253_v10  ;;  %v7336_v59 = vld [vmem:[%s10793_s15 + $0x198] sm:$0xf]  ;;  %v7333_v63 = vor.u32 %v8393_v51, %v7330_v57  ;;  %v7282_v51 = vld [vmem:[%s10793_s15 + $0x160] sm:$0xf0] }
0x15ff   :  { %v7325_v37 = vor.u32 %v8392_v27, %v7322_v36  ;;  %4448 = vmatpush.bf16.msrb.mxu2 %v7329_v56  ;;  %v8572_v27 = vld [vmem:[%s10792_s14 + $0x1] ss:$0 sm:$0xff]  ;;  %v7354_v10 = vld [vmem:[%s10793_s15 + $0x1e8] sm:$0xf0]  ;;  %v8388_v56 = vld [vmem:[%s10793_s15 + $0x164] sm:$0xf0] }
0x1600   :  { %7206 = vmatmul.msk.f32.gmra.mxu0 %vm359_vm5, %v4030_v61  ;;  %v8402_v61 = vld [vmem:[%s10793_s15 + $0x1d4] sm:$0xf0]  ;;  %v7357_v49 = vor.u32 %v8396_v41, %v7354_v10  ;;  %v8380_v57 = vld [vmem:[%s10793_s15 + $0x12c] sm:$0xf]  ;;  %v8435_v5 = vld [vmem:[%s10794_s17 + $0x4e0] sm:$0xff] }
0x1601   :  { %4434 = vmatpush.bf16.msrb.mxu1 %v7325_v37  ;;  %v7337_v62 = vor.u32 %v8402_v61, %v7336_v59  ;;  %v7290_v59 = vld [vmem:[%s10793_s15 + $0x168] sm:$0xf0]  ;;  %v8411_v9 = vld [vmem:[%s10794_s17 + $0x420] sm:$0xff]  ;;  %v8434_v41 = vld [vmem:[%s10794_s17 + $0x4d8] sm:$0xff] }
0x1602   :  { %4462 = vmatpush.bf16.msrb.mxu3 %v7333_v63  ;;  %v7285_v63 = vor.u32 %v8379_v50, %v7282_v51  ;;  %v8410_v10 = vld [vmem:[%s10794_s17 + $0x418] sm:$0xff]  ;;  %v8408_v50 = vld [vmem:[%s10794_s17 + $0x408] sm:$0xff] }
0x1603   :  { %4476 = vmatpush.bf16.msra.mxu0 %v7337_v62  ;;  %v8416_v51 = vld [vmem:[%s10794_s17 + $0x448] sm:$0xff] }
0x1605   :  { %4435 = vmatpush.bf16.msrb.mxu1 %v7261_v47  ;;  %v8387_v47 = vld [vmem:[%s10793_s15 + $0x15c] sm:$0xf0] }
0x1606   :  { %v7281_v61 = vor.u32 %v8387_v47, %v7280_v46  ;;  %v8433_v46 = vld [vmem:[%s10794_s17 + $0x4d0] sm:$0xff] }
0x1607   :  { %v8409_v47 = vld [vmem:[%s10794_s17 + $0x410] sm:$0xff] }
0x1675   :  { %v4054_v0 = vpop.f32.mrf.mxu0 }
0x167d   :  { %v4057_v1 = vpop.f32.mrf.mxu0 }
0x167e   :  { %v4060_v40 = vpack.c.bf16 %v4057_v1, %v4054_v0  ;;  %v8394_v0 = vld [vmem:[%s10793_s15 + $0x19c] sm:$0xf] }
0x167f   :  { %v7338_v1 = vld [vmem:[%s10793_s15 + $0x1d8] sm:$0xf0] }
0x1680   :  { %7208 = vmatmul.msk.bf16.vlgmr.msra.gmra.mxu1 %vm319_vm3, %v4060_v40  ;;  %v7264_v40 = vld [vmem:[%s10793_s15 + $0x110] sm:$0xf] }
0x16fd   :  { %v4078_v3 = vpop.f32.mrf.mxu1 }
0x16fe   :  { %v4083_v4 = vadd.f32 %v4078_v3, %v9983_v17 }
0x1700   :  { %v4085_v11 = vadd.f32 %v4083_v4, %v9810_v14 }
0x1702   :  { %v4092_v12 = vadd.f32 %v8570_v44, %v4085_v11  ;;  %v8385_v11 = vld [vmem:[%s10793_s15 + $0x14c] sm:$0xf0] }
0x1704   :  { %v4098_v22 = vsel %vm183_vm2, %v4092_v12, 0.0 }
0x1705   :  { %v4080_v29 = vpop.f32.mrf.mxu1  ;;  %4099 = vadd.xlane.f32.xlu1 %v4098_v22 }
0x1706   :  { %v4084_v13 = vadd.f32 %v4080_v29, %v9986_v19  ;;  %v7265_v29 = vor.u32 %v8385_v11, %v7264_v40  ;;  %v8405_v40 = vld [vmem:[%s10793_s15 + $0x1ec] sm:$0xf0]  ;;  %v8406_v11 = vld [vmem:[%s10793_s15 + $0x1f4] sm:$0xf0] }
0x1708   :  { %v4086_v15 = vadd.f32 %v4084_v13, %v9812_v21  ;;  %v7266_v13 = vld [vmem:[%s10793_s15 + $0x150] sm:$0xf0]  ;;  %4449 = vmatpush.bf16.msrb.mxu2 %v7265_v29 }
0x170a   :  { %v4093_v16 = vadd.f32 %v8570_v44, %v4086_v15  ;;  %v7341_v44 = vor.u32 %v8394_v0, %v7338_v1  ;;  %v7272_v15 = vld [vmem:[%s10793_s15 + $0x118] sm:$0xf]  ;;  %v7293_v0 = vor.u32 %v8380_v57, %v7290_v59  ;;  %v7360_v1 = vld [vmem:[%s10793_s15 + $0x1b0] sm:$0xf] }
0x170b   :  { %v7361_v29 = vor.u32 %v8405_v40, %v7360_v1  ;;  %v8462_v57 = vld [vmem:[%s10794_s17 + $0x5b8] sm:$0xff]  ;;  %v8461_v1 = vld [vmem:[%s10794_s17 + $0x5b0] sm:$0xff] }
0x170c   :  { %v4101_v18 = vsel %vm183_vm2, %v4093_v16, 0.0  ;;  %4490 = vmatpush.bf16.msra.mxu1 %v7341_v44  ;;  %v7368_v44 = vld [vmem:[%s10793_s15 + $0x1b8] sm:$0xf]  ;;  %v8469_v40 = vld [vmem:[%s10794_s17 + $0x5f0] sm:$0xff] }
0x170d   :  { %4102 = vadd.xlane.f32.xlu2 %v4101_v18  ;;  %v8470_v59 = vld [vmem:[%s10794_s17 + $0x5f8] sm:$0xff] }
0x1778   :  { %v4100_v17 = vpop.xlane.xlu1 %4099 }
0x1779   :  { %v4104_v20 = vmul.f32 %v4100_v17, %v9090_v25 }
0x177b   :  { %v10011_v23 = vsub.f32 %v4092_v12, %v4104_v20  ;;  %v8377_v12 = vld [vmem:[%s10793_s15 + $0x114] sm:$0xf]  ;;  %v8378_v20 = vld [vmem:[%s10793_s15 + $0x11c] sm:$0xf] }
0x177c   :  { %v7269_v18 = vor.u32 %v8377_v12, %v7266_v13  ;;  %v8398_v12 = vld [vmem:[%s10793_s15 + $0x1bc] sm:$0xf] }
0x177d   :  { %v4108_v14 = vmul.f32 %v10011_v23, %v10011_v23 }
0x177e   :  { %4463 = vmatpush.bf16.msrb.mxu3 %v7269_v18  ;;  %v7369_v18 = vor.u32 %v8406_v11, %v7368_v44  ;;  %v8460_v44 = vld [vmem:[%s10794_s17 + $0x5a8] sm:$0xff] }
0x177f   :  { %v4110_v26 = vsel %vm183_vm2, %v4108_v14, 0.0  ;;  %v7274_v14 = vld [vmem:[%s10793_s15 + $0x158] sm:$0xf0]  ;;  %v8468_v11 = vld [vmem:[%s10794_s17 + $0x5e8] sm:$0xff] }
0x1780   :  { %v4103_v30 = vpop.xlane.xlu2 %4102  ;;  %4111 = vadd.xlane.f32.xlu0 %v4110_v26 }
0x1781   :  { %v4105_v19 = vmul.f32 %v4103_v30, %v9090_v25  ;;  %v7277_v30 = vor.u32 %v8378_v20, %v7274_v14  ;;  %v8381_v20 = vld [vmem:[%s10793_s15 + $0x134] sm:$0xf] }
0x1782   :  { %v7298_v14 = vld [vmem:[%s10793_s15 + $0x170] sm:$0xf0] }
0x1783   :  { %v10017_v31 = vsub.f32 %v4093_v16, %v4105_v19  ;;  %v8386_v16 = vld [vmem:[%s10793_s15 + $0x154] sm:$0xf0]  ;;  %4491 = vmatpush.bf16.msra.mxu1 %v7277_v30 }
0x1784   :  { %v7273_v17 = vor.u32 %v8386_v16, %v7272_v15  ;;  %v7296_v15 = vld [vmem:[%s10793_s15 + $0x130] sm:$0xf]  ;;  %v8390_v30 = vld [vmem:[%s10793_s15 + $0x174] sm:$0xf0] }
0x1785   :  { %v4109_v21 = vmul.f32 %v10017_v31, %v10017_v31  ;;  %v8389_v16 = vld [vmem:[%s10793_s15 + $0x16c] sm:$0xf0] }
0x1786   :  { %4477 = vmatpush.bf16.msra.mxu0 %v7273_v17 }
0x1787   :  { %v4113_v32 = vsel %vm183_vm2, %v4109_v21, 0.0 }
0x1788   :  { %4114 = vadd.xlane.f32.xlu1 %v4113_v32 }
0x17f3   :  { %v4112_v34 = vpop.xlane.xlu0 %4111 }
0x17f4   :  { %v4116_v2 = vmul.f32 %v4112_v34, %v9090_v25 }
0x17f6   :  { %v10056_v38 = vadd.f32 1e-05, %v4116_v2 }
0x17f8   :  { %8652 = vrsqrt.f32 %v10056_v38  ;;  %vm4126_vm3 = vweird.f32 %v10056_v38 }
0x17fb   :  { %v4115_v48 = vpop.xlane.xlu1 %4114 }
0x17fc   :  { %v4117_v52 = vmul.f32 %v4115_v48, %v9090_v25 }
0x17fe   :  { %v8653_v3 = vpop.eup %8652  ;;  %v4119_v4 = vadd.f32 1e-05, %v4117_v52  ;;  %v7288_v52 = vld [vmem:[%s10793_s15 + $0x128] sm:$0xf] }
0x17ff   :  { %v4121_v22 = vmul.f32 %v8653_v3, %v10056_v38  ;;  %vm4127_vm0 = vweird.f32 %v8653_v3  ;;  %v7289_v62 = vor.u32 %v8388_v56, %v7288_v52  ;;  %v8423_v52 = vld [vmem:[%s10794_s17 + $0x480] sm:$0xff] }
0x1800   :  { %8654 = vrsqrt.f32 %v4119_v4  ;;  %vm4128_vm5 = vmor %vm4126_vm3, %vm4127_vm0  ;;  %vm4136_vm13 = vweird.f32 %v4119_v4  ;;  %v8431_v56 = vld [vmem:[%s10794_s17 + $0x4c0] sm:$0xff]  ;;  %vm6087_vm3 = vcmask 7168  }
0x1801   :  { %v4122_v26 = vmul.f32 %v8653_v3, %v4121_v22  ;;  %v7370_v22 = vld [vmem:[%s10793_s15 + $0x1f8] sm:$0xf0] }
0x1802   :  { %v7373_v17 = vor.u32 %v8398_v12, %v7370_v22  ;;  %v8459_v12 = vld [vmem:[%s10794_s17 + $0x5a0] sm:$0xff] }
0x1803   :  { %v4123_v19 = vmul.f32 0.5, %v4122_v26  ;;  %v7304_v26 = vld [vmem:[%s10793_s15 + $0x138] sm:$0xf]  ;;  %v8467_v22 = vld [vmem:[%s10794_s17 + $0x5e0] sm:$0xff] }
0x1805   :  { %v4124_v21 = vsub.f32 1.5, %v4123_v19  ;;  %v8382_v19 = vld [vmem:[%s10793_s15 + $0x13c] sm:$0xf] }
0x1806   :  { %v8655_v32 = vpop.eup %8654 }
0x1807   :  { %v4125_v33 = vmul.f32 %v8653_v3, %v4124_v21  ;;  %v4131_v53 = vmul.f32 %v8655_v32, %v4119_v4  ;;  %vm4137_vm12 = vweird.f32 %v8655_v32  ;;  %v7362_v4 = vld [vmem:[%s10793_s15 + $0x1f0] sm:$0xf0]  ;;  %v7306_v21 = vld [vmem:[%s10793_s15 + $0x178] sm:$0xf0] }
0x1808   :  { %vm4138_vm14 = vmor %vm4136_vm13, %vm4137_vm12 }
0x1809   :  { %v4132_v55 = vmul.f32 %v8655_v32, %v4131_v53  ;;  %v4129_v6 = vsel %vm4128_vm5, %v8653_v3, %v4125_v33  ;;  %v8397_v3 = vld [vmem:[%s10793_s15 + $0x1b4] sm:$0xf]  ;;  %v7301_v33 = vor.u32 %v8381_v20, %v7298_v14  ;;  %v7305_v53 = vor.u32 %v8390_v30, %v7304_v26  ;;  %v8442_v26 = vld [vmem:[%s10794_s17 + $0x518] sm:$0xff] }
0x180a   :  { %v4140_v34 = vmul.f32 %v4129_v6, %v10011_v23  ;;  %v8403_v23 = vld [vmem:[%s10793_s15 + $0x1dc] sm:$0xf0]  ;;  %v7365_v13 = vor.u32 %v8397_v3, %v7362_v4  ;;  %v8430_v6 = vld [vmem:[%s10794_s17 + $0x4b8] sm:$0xff]  ;;  %v8445_v3 = vld [vmem:[%s10794_s17 + $0x530] sm:$0xff] }
0x180b   :  { %v4133_v7 = vmul.f32 0.5, %v4132_v55  ;;  %v7345_v43 = vor.u32 %v8403_v23, %v7344_v8  ;;  %v7309_v55 = vor.u32 %v8382_v19, %v7306_v21  ;;  %v8420_v8 = vld [vmem:[%s10794_s17 + $0x468] sm:$0xff]  ;;  %v8427_v23 = vld [vmem:[%s10794_s17 + $0x4a0] sm:$0xff]  ;;  %v8453_v4 = vld [vmem:[%s10794_s17 + $0x570] sm:$0xff] }
0x180c   :  { %v4145_v36 = vmul.f32 %v8571_v24, %v4140_v34  ;;  %v8429_v34 = vld [vmem:[%s10794_s17 + $0x4b0] sm:$0xff]  ;;  %v8450_v30 = vld [vmem:[%s10794_s17 + $0x558] sm:$0xff]  ;;  %v8456_v19 = vld [vmem:[%s10794_s17 + $0x588] sm:$0xff] }
0x180d   :  { %v4134_v58 = vsub.f32 1.5, %v4133_v7  ;;  %v8438_v7 = vld [vmem:[%s10794_s17 + $0x4f8] sm:$0xff]  ;;  %v8457_v20 = vld [vmem:[%s10794_s17 + $0x590] sm:$0xff]  ;;  %v8464_v21 = vld [vmem:[%s10794_s17 + $0x5c8] sm:$0xff] }
0x180e   :  { %v10148_v38 = vadd.f32 %v8572_v27, %v4145_v36  ;;  %v8428_v36 = vld [vmem:[%s10794_s17 + $0x4a8] sm:$0xff]  ;;  %v8465_v14 = vld [vmem:[%s10794_s17 + $0x5d0] sm:$0xff] }
0x180f   :  { %v4135_v35 = vmul.f32 %v8655_v32, %v4134_v58  ;;  %v8414_v58 = vld [vmem:[%s10794_s17 + $0x438] sm:$0xff] }
0x1811   :  { %v4139_v60 = vsel %vm4138_vm14, %v8655_v32, %v4135_v35  ;;  %v7297_v32 = vor.u32 %v8389_v16, %v7296_v15  ;;  %v8437_v35 = vld [vmem:[%s10794_s17 + $0x4f0] sm:$0xff]  ;;  %v8458_v15 = vld [vmem:[%s10794_s17 + $0x598] sm:$0xff] }
0x1812   :  { %v4141_v2 = vmul.f32 %v4139_v60, %v10017_v31  ;;  %v7352_v31 = vld [vmem:[%s10793_s15 + $0x1a8] sm:$0xf]  ;;  %v8413_v60 = vld [vmem:[%s10794_s17 + $0x430] sm:$0xff]  ;;  %v8466_v16 = vld [vmem:[%s10794_s17 + $0x5d8] sm:$0xff] }
0x1813   :  { %v7353_v48 = vor.u32 %v8404_v28, %v7352_v31  ;;  %v8419_v31 = vld [vmem:[%s10794_s17 + $0x460] sm:$0xff]  ;;  %v8426_v28 = vld [vmem:[%s10794_s17 + $0x498] sm:$0xff] }
0x1814   :  { %v4146_v37 = vmul.f32 %v8571_v24, %v4141_v2  ;;  %v8422_v24 = vld [vmem:[%s10794_s17 + $0x478] sm:$0xff]  ;;  %v8436_v2 = vld [vmem:[%s10794_s17 + $0x4e8] sm:$0xff] }
0x1816   :  { %v10150_v39 = vadd.f32 %v8572_v27, %v4146_v37  ;;  %v8421_v27 = vld [vmem:[%s10794_s17 + $0x470] sm:$0xff]  ;;  %v8412_v37 = vld [vmem:[%s10794_s17 + $0x428] sm:$0xff] }
0x1818   :  { %v10163_v42 = vpack.c.bf16 %v10150_v39, %v10148_v38 }
0x181a   :  { %7374 = vmatmul.msk.bf16.vlgmr.msra.gmra.mxu2 %vm183_vm2, %v10163_v42  ;;  %7375 = vmatmul.msk.bf16.vlgmr.msra.gmra.mxu3 %vm183_vm2, %v10163_v42 }
0x181b   :  { %7376 = vmatmul.msk.bf16.vlgmr.msrb.gmra.mxu0 %vm183_vm2, %v10163_v42  ;;  %7377 = vmatmul.msk.bf16.vlgmr.msrb.gmra.mxu1 %vm183_vm2, %v10163_v42 }
0x181c   :  { %4504 = vmatpush.bf16.msra.mxu2 %v7345_v43  ;;  %4518 = vmatpush.bf16.msra.mxu3 %v7349_v45  ;;  %v8418_v43 = vld [vmem:[%s10794_s17 + $0x458] sm:$0xff]  ;;  %v8425_v45 = vld [vmem:[%s10794_s17 + $0x490] sm:$0xff] }
0x181d   :  { %4532 = vmatpush.bf16.msrb.mxu0 %v7353_v48  ;;  %4546 = vmatpush.bf16.msrb.mxu1 %v7357_v49  ;;  %v8424_v48 = vld [vmem:[%s10794_s17 + $0x488] sm:$0xff] }
0x181e   :  { %v8432_v49 = vld [vmem:[%s10794_s17 + $0x4c8] sm:$0xff] }
0x1820   :  { %4505 = vmatpush.bf16.msra.mxu2 %v7281_v61  ;;  %4519 = vmatpush.bf16.msra.mxu3 %v7285_v63  ;;  %v8407_v61 = vld [vmem:[%s10794_s17 + $0x400] sm:$0xff] }
0x1821   :  { %4533 = vmatpush.bf16.msrb.mxu0 %v7289_v62  ;;  %4547 = vmatpush.bf16.msrb.mxu1 %v7293_v0  ;;  %v8415_v63 = vld [vmem:[%s10794_s17 + $0x440] sm:$0xff]  ;;  %v8446_v62 = vld [vmem:[%s10794_s17 + $0x538] sm:$0xff] }
0x1822   :  { %v8454_v0 = vld [vmem:[%s10794_s17 + $0x578] sm:$0xff] }
0x182a   :  { %7378 = vmatmul.msk.bf16.vlgmr.msrb.gmra.mxu2 %vm183_vm2, %v10163_v42  ;;  %7379 = vmatmul.msk.bf16.vlgmr.msrb.gmra.mxu3 %vm183_vm2, %v10163_v42 }
0x182b   :  { %7380 = vmatmul.msk.bf16.vlgmr.msra.gmra.mxu0 %vm183_vm2, %v10163_v42  ;;  %7381 = vmatmul.msk.bf16.vlgmr.msra.gmra.mxu1 %vm183_vm2, %v10163_v42 }
0x182c   :  { %4560 = vmatpush.bf16.msrb.mxu2 %v7361_v29  ;;  %4574 = vmatpush.bf16.msrb.mxu3 %v7365_v13  ;;  %v8444_v29 = vld [vmem:[%s10794_s17 + $0x528] sm:$0xff] }
0x182d   :  { %4588 = vmatpush.bf16.msra.mxu0 %v7369_v18  ;;  %4602 = vmatpush.bf16.msra.mxu1 %v7373_v17  ;;  %v8452_v13 = vld [vmem:[%s10794_s17 + $0x568] sm:$0xff]  ;;  %v8443_v18 = vld [vmem:[%s10794_s17 + $0x520] sm:$0xff] }
0x182e   :  { %v8451_v17 = vld [vmem:[%s10794_s17 + $0x560] sm:$0xff] }
0x1830   :  { %4561 = vmatpush.bf16.msrb.mxu2 %v7297_v32  ;;  %4575 = vmatpush.bf16.msrb.mxu3 %v7301_v33  ;;  %v8441_v32 = vld [vmem:[%s10794_s17 + $0x510] sm:$0xff] }
0x1831   :  { %4589 = vmatpush.bf16.msra.mxu0 %v7305_v53  ;;  %4603 = vmatpush.bf16.msra.mxu1 %v7309_v55  ;;  %v8449_v33 = vld [vmem:[%s10794_s17 + $0x550] sm:$0xff]  ;;  %v8455_v53 = vld [vmem:[%s10794_s17 + $0x580] sm:$0xff] }
0x1832   :  { %v8463_v55 = vld [vmem:[%s10794_s17 + $0x5c0] sm:$0xff] }
0x183a   :  { %7382 = vmatmul.msk.bf16.vlgmr.msra.gmra.mxu2 %vm183_vm2, %v10163_v42  ;;  %7383 = vmatmul.msk.bf16.vlgmr.msra.gmra.mxu3 %vm183_vm2, %v10163_v42 }
0x183b   :  { %7384 = vmatmul.msk.bf16.vlgmr.msrb.gmra.mxu0 %vm183_vm2, %v10163_v42  ;;  %7385 = vmatmul.msk.bf16.vlgmr.msrb.gmra.mxu1 %vm183_vm2, %v10163_v42 }
0x183c   :  { %5716 = vmatpush.bf16.msrb.mxu0 %v8430_v6  ;;  %5730 = vmatpush.bf16.msrb.mxu1 %v8438_v7  ;;  %v8440_v6 = vld [vmem:[%s10794_s17 + $0x508] sm:$0xff] }
0x183d   :  { %5688 = vmatpush.bf16.msra.mxu2 %v8414_v58  ;;  %5702 = vmatpush.bf16.msra.mxu3 %v8422_v24  ;;  %v8448_v7 = vld [vmem:[%s10794_s17 + $0x548] sm:$0xff]  ;;  %v8439_v58 = vld [vmem:[%s10794_s17 + $0x500] sm:$0xff] }
0x183e   :  { %v8447_v24 = vld [vmem:[%s10794_s17 + $0x540] sm:$0xff] }
0x1840   :  { %5717 = vmatpush.bf16.msrb.mxu0 %v8429_v34  ;;  %5731 = vmatpush.bf16.msrb.mxu1 %v8437_v35  ;;  %v10464_v34 = vld [vmem:[%s10795_s16 + $0x10] sm:$0xff] }
0x1841   :  { %5689 = vmatpush.bf16.msra.mxu2 %v8413_v60  ;;  %5703 = vmatpush.bf16.msra.mxu3 %v8421_v27  ;;  %v4193_v27 = vperm.slane %v10464_v34, 2 }
0x1844   :  { %5718 = vmatpush.bf16.msrb.mxu0 %v8428_v36  ;;  %5732 = vmatpush.bf16.msrb.mxu1 %v8436_v2  ;;  %v4194_v36 = vperm.slane %v10464_v34, 3 }
0x1845   :  { %5690 = vmatpush.bf16.msra.mxu2 %v8412_v37  ;;  %5704 = vmatpush.bf16.msra.mxu3 %v8420_v8 }
0x1848   :  { %5719 = vmatpush.bf16.msrb.mxu0 %v8427_v23  ;;  %5733 = vmatpush.bf16.msrb.mxu1 %v8435_v5  ;;  %v4191_v5 = vperm.slane %v10464_v34, 0 }
0x1849   :  { %5691 = vmatpush.bf16.msra.mxu2 %v8411_v9  ;;  %5705 = vmatpush.bf16.msra.mxu3 %v8419_v31  ;;  %v4192_v9 = vperm.slane %v10464_v34, 1 }
0x184a   :  { %7386 = vmatmul.msk.bf16.vlgmr.msrb.gmra.mxu2 %vm183_vm2, %v10163_v42  ;;  %7387 = vmatmul.msk.bf16.vlgmr.msrb.gmra.mxu3 %vm183_vm2, %v10163_v42 }
0x184b   :  { %7388 = vmatmul.msk.bf16.vlgmr.msra.gmra.mxu0 %vm183_vm2, %v10163_v42  ;;  %7389 = vmatmul.msk.bf16.vlgmr.msra.gmra.mxu1 %vm183_vm2, %v10163_v42  ;;  %v8417_v42 = vld [vmem:[%s10794_s17 + $0x450] sm:$0xff] }
0x184c   :  { %5720 = vmatpush.bf16.msrb.mxu0 %v8426_v28  ;;  %5734 = vmatpush.bf16.msrb.mxu1 %v8434_v41 }
0x184d   :  { %5692 = vmatpush.bf16.msra.mxu2 %v8410_v10  ;;  %5706 = vmatpush.bf16.msra.mxu3 %v8418_v43 }
0x1850   :  { %5721 = vmatpush.bf16.msrb.mxu0 %v8425_v45  ;;  %5735 = vmatpush.bf16.msrb.mxu1 %v8433_v46 }
0x1851   :  { %5693 = vmatpush.bf16.msra.mxu2 %v8409_v47  ;;  %5707 = vmatpush.bf16.msra.mxu3 %v8417_v42 }
0x1854   :  { %5722 = vmatpush.bf16.msrb.mxu0 %v8424_v48  ;;  %5736 = vmatpush.bf16.msrb.mxu1 %v8432_v49  ;;  %v8494_v49 = vld [vmem:[%s10794_s17 + $0x6b8] sm:$0xff] }
0x1855   :  { %5694 = vmatpush.bf16.msra.mxu2 %v8408_v50  ;;  %5708 = vmatpush.bf16.msra.mxu3 %v8416_v51  ;;  %v8502_v50 = vld [vmem:[%s10794_s17 + $0x6f8] sm:$0xff] }
0x1858   :  { %5723 = vmatpush.bf16.msrb.mxu0 %v8423_v52  ;;  %5737 = vmatpush.bf16.msrb.mxu1 %v8431_v56 }
0x1859   :  { %5695 = vmatpush.bf16.msra.mxu2 %v8407_v61  ;;  %5709 = vmatpush.bf16.msra.mxu3 %v8415_v63 }
0x185c   :  { %5772 = vmatpush.bf16.msra.mxu0 %v8462_v57  ;;  %5786 = vmatpush.bf16.msra.mxu1 %v8470_v59 }
0x185d   :  { %5744 = vmatpush.bf16.msrb.mxu2 %v8446_v62  ;;  %5758 = vmatpush.bf16.msrb.mxu3 %v8454_v0 }
0x1860   :  { %5773 = vmatpush.bf16.msra.mxu0 %v8461_v1  ;;  %5787 = vmatpush.bf16.msra.mxu1 %v8469_v40 }
0x1861   :  { %5745 = vmatpush.bf16.msrb.mxu2 %v8445_v3  ;;  %5759 = vmatpush.bf16.msrb.mxu3 %v8453_v4  ;;  %v8493_v4 = vld [vmem:[%s10794_s17 + $0x6b0] sm:$0xff] }
0x1864   :  { %5774 = vmatpush.bf16.msra.mxu0 %v8460_v44  ;;  %5788 = vmatpush.bf16.msra.mxu1 %v8468_v11  ;;  %v8501_v44 = vld [vmem:[%s10794_s17 + $0x6f0] sm:$0xff] }
0x1865   :  { %5746 = vmatpush.bf16.msrb.mxu2 %v8444_v29  ;;  %5760 = vmatpush.bf16.msrb.mxu3 %v8452_v13  ;;  %v8486_v29 = vld [vmem:[%s10794_s17 + $0x678] sm:$0xff]  ;;  %v4197_v13 = vperm.slane %v10464_v34, 6 }
0x1868   :  { %5775 = vmatpush.bf16.msra.mxu0 %v8459_v12  ;;  %5789 = vmatpush.bf16.msra.mxu1 %v8467_v22  ;;  %v8478_v22 = vld [vmem:[%s10794_s17 + $0x638] sm:$0xff] }
0x1869   :  { %5747 = vmatpush.bf16.msrb.mxu2 %v8443_v18  ;;  %5761 = vmatpush.bf16.msrb.mxu3 %v8451_v17  ;;  %v8500_v18 = vld [vmem:[%s10794_s17 + $0x6e8] sm:$0xff] }
0x186c   :  { %5776 = vmatpush.bf16.msra.mxu0 %v8458_v15  ;;  %5790 = vmatpush.bf16.msra.mxu1 %v8466_v16  ;;  %v4198_v15 = vperm.slane %v10464_v34, 7  ;;  %v8492_v16 = vld [vmem:[%s10794_s17 + $0x6a8] sm:$0xff] }
0x186d   :  { %5748 = vmatpush.bf16.msrb.mxu2 %v8442_v26  ;;  %5762 = vmatpush.bf16.msrb.mxu3 %v8450_v30  ;;  %v8485_v26 = vld [vmem:[%s10794_s17 + $0x670] sm:$0xff] }
0x1870   :  { %5777 = vmatpush.bf16.msra.mxu0 %v8457_v20  ;;  %5791 = vmatpush.bf16.msra.mxu1 %v8465_v14  ;;  %v8477_v14 = vld [vmem:[%s10794_s17 + $0x630] sm:$0xff] }
0x1871   :  { %5749 = vmatpush.bf16.msrb.mxu2 %v8441_v32  ;;  %5763 = vmatpush.bf16.msrb.mxu3 %v8449_v33  ;;  %v4196_v32 = vperm.slane %v10464_v34, 5 }
0x1874   :  { %5778 = vmatpush.bf16.msra.mxu0 %v8456_v19  ;;  %5792 = vmatpush.bf16.msra.mxu1 %v8464_v21  ;;  %v4195_v21 = vperm.slane %v10464_v34, 4  ;;  %v8484_v34 = vld [vmem:[%s10794_s17 + $0x668] sm:$0xff] }
0x1875   :  { %5750 = vmatpush.bf16.msrb.mxu2 %v8440_v6  ;;  %5764 = vmatpush.bf16.msrb.mxu3 %v8448_v7  ;;  %v8499_v6 = vld [vmem:[%s10794_s17 + $0x6e0] sm:$0xff] }
0x1878   :  { %5779 = vmatpush.bf16.msra.mxu0 %v8455_v53  ;;  %5793 = vmatpush.bf16.msra.mxu1 %v8463_v55  ;;  %v8491_v55 = vld [vmem:[%s10794_s17 + $0x6a0] sm:$0xff] }
0x1879   :  { %5751 = vmatpush.bf16.msrb.mxu2 %v8439_v58  ;;  %5765 = vmatpush.bf16.msrb.mxu3 %v8447_v24  ;;  %v8476_v24 = vld [vmem:[%s10794_s17 + $0x628] sm:$0xff] }
0x1898   :  { %v4423_v35 = vpop.f32.mrf.mxu0  ;;  %v4437_v60 = vpop.f32.mrf.mxu1 }
0x1899   :  { %v4424_v8 = vadd.f32 %v4423_v35, %v4193_v27  ;;  %v4438_v23 = vadd.f32 %v4437_v60, %v4194_v36 }
0x189b   :  { %v4612_v43 = vmax.f32 %v4424_v8, 0.0  ;;  %v4613_v45 = vmax.f32 %v4438_v23, 0.0  ;;  %v8490_v8 = vld [vmem:[%s10794_s17 + $0x698] sm:$0xff] }
0x189c   :  { %v8498_v23 = vld [vmem:[%s10794_s17 + $0x6d8] sm:$0xff] }
0x189d   :  { %v4395_v2 = vpop.f32.mrf.mxu2  ;;  %v4409_v37 = vpop.f32.mrf.mxu3 }
0x189e   :  { %v4396_v42 = vadd.f32 %v4395_v2, %v4191_v5  ;;  %v4410_v48 = vadd.f32 %v4409_v37, %v4192_v9 }
0x18a0   :  { %v4425_v31 = vpop.f32.mrf.mxu0  ;;  %v4439_v28 = vpop.f32.mrf.mxu1  ;;  %v4610_v63 = vmax.f32 %v4396_v42, 0.0  ;;  %v4611_v62 = vmax.f32 %v4410_v48, 0.0 }
0x18a1   :  { %v4426_v41 = vadd.f32 %v4425_v31, %v4193_v27  ;;  %v4440_v10 = vadd.f32 %v4439_v28, %v4194_v36 }
0x18a3   :  { %v4628_v46 = vmax.f32 %v4426_v41, 0.0  ;;  %v4629_v47 = vmax.f32 %v4440_v10, 0.0 }
0x18a5   :  { %v4644_v51 = vpack.c.bf16 %v4628_v46, %v4612_v43  ;;  %v4645_v52 = vpack.c.bf16 %v4629_v47, %v4613_v45  ;;  %v4397_v56 = vpop.f32.mrf.mxu2  ;;  %v4411_v57 = vpop.f32.mrf.mxu3  ;;  %v8475_v43 = vld [vmem:[%s10794_s17 + $0x620] sm:$0xff]  ;;  %v10531_v46 = vld [vmem:[%s10795_s16 + $0x18] sm:$0xff] }
0x18a6   :  { %v4398_v59 = vadd.f32 %v4397_v56, %v4191_v5  ;;  %v4412_v61 = vadd.f32 %v4411_v57, %v4192_v9  ;;  %v8483_v45 = vld [vmem:[%s10794_s17 + $0x660] sm:$0xff]  ;;  %v8497_v56 = vld [vmem:[%s10794_s17 + $0x6d0] sm:$0xff] }
0x18a7   :  { %5724 = vmatmul.bf16.vlgmr.msrb.gmra.mxu0 %v4644_v51  ;;  %5738 = vmatmul.bf16.vlgmr.msrb.gmra.mxu1 %v4645_v52  ;;  %v8489_v52 = vld [vmem:[%s10794_s17 + $0x690] sm:$0xff] }
0x18a8   :  { %v4626_v0 = vmax.f32 %v4398_v59, 0.0  ;;  %v4627_v1 = vmax.f32 %v4412_v61, 0.0  ;;  %5828 = vmatpush.bf16.msrb.mxu0 %v8494_v49  ;;  %5842 = vmatpush.bf16.msrb.mxu1 %v8502_v50  ;;  %v4479_v40 = vpop.f32.mrf.mxu0  ;;  %v4493_v3 = vpop.f32.mrf.mxu1  ;;  %v8474_v61 = vld [vmem:[%s10794_s17 + $0x618] sm:$0xff] }
0x18a9   :  { %v4480_v30 = vadd.f32 %v4479_v40, %v4197_v13  ;;  %v4494_v19 = vadd.f32 %v4493_v3, %v4198_v15  ;;  %v8496_v40 = vld [vmem:[%s10794_s17 + $0x6c8] sm:$0xff] }
0x18aa   :  { %v4642_v11 = vpack.c.bf16 %v4626_v0, %v4610_v63  ;;  %v4643_v12 = vpack.c.bf16 %v4627_v1, %v4611_v62  ;;  %v8482_v63 = vld [vmem:[%s10794_s17 + $0x658] sm:$0xff]  ;;  %v4201_v62 = vperm.slane %v10531_v46, 2  ;;  %v4202_v0 = vperm.slane %v10531_v46, 3  ;;  %v8488_v1 = vld [vmem:[%s10794_s17 + $0x688] sm:$0xff] }
0x18ab   :  { %v4616_v35 = vmax.f32 %v4480_v30, 0.0  ;;  %v4617_v60 = vmax.f32 %v4494_v19, 0.0  ;;  %v8534_v30 = vld [vmem:[%s10794_s17 + $0x7f8] sm:$0xff]  ;;  %v8472_v19 = vld [vmem:[%s10794_s17 + $0x608] sm:$0xff] }
0x18ac   :  { %5829 = vmatpush.bf16.msrb.mxu0 %v8493_v4  ;;  %5843 = vmatpush.bf16.msrb.mxu1 %v8501_v44  ;;  %v8473_v44 = vld [vmem:[%s10794_s17 + $0x610] sm:$0xff] }
0x18ad   :  { %5696 = vmatmul.bf16.vlgmr.msra.gmra.mxu2 %v4642_v11  ;;  %5710 = vmatmul.bf16.vlgmr.msra.gmra.mxu3 %v4643_v12  ;;  %v4451_v17 = vpop.f32.mrf.mxu2  ;;  %v4465_v20 = vpop.f32.mrf.mxu3  ;;  %v8481_v11 = vld [vmem:[%s10794_s17 + $0x650] sm:$0xff] }
0x18ae   :  { %5800 = vmatpush.bf16.msra.mxu2 %v8478_v22  ;;  %5814 = vmatpush.bf16.msra.mxu3 %v8486_v29  ;;  %v4452_v2 = vadd.f32 %v4451_v17, %v4195_v21  ;;  %v4466_v37 = vadd.f32 %v4465_v20, %v4196_v32  ;;  %v4199_v29 = vperm.slane %v10531_v46, 0  ;;  %v8495_v17 = vld [vmem:[%s10794_s17 + $0x6c0] sm:$0xff] }
0x18b0   :  { %5830 = vmatpush.bf16.msrb.mxu0 %v8492_v16  ;;  %5844 = vmatpush.bf16.msrb.mxu1 %v8500_v18  ;;  %v4481_v33 = vpop.f32.mrf.mxu0  ;;  %v4495_v53 = vpop.f32.mrf.mxu1  ;;  %v4614_v47 = vmax.f32 %v4452_v2, 0.0  ;;  %v4615_v42 = vmax.f32 %v4466_v37, 0.0  ;;  %v8487_v18 = vld [vmem:[%s10794_s17 + $0x680] sm:$0xff] }
0x18b1   :  { %v4482_v7 = vadd.f32 %v4481_v33, %v4197_v13  ;;  %v4496_v58 = vadd.f32 %v4495_v53, %v4198_v15  ;;  %v4200_v13 = vperm.slane %v10531_v46, 1  ;;  %v8471_v37 = vld [vmem:[%s10794_s17 + $0x600] sm:$0xff] }
0x18b2   :  { %5801 = vmatpush.bf16.msra.mxu2 %v8477_v14  ;;  %5815 = vmatpush.bf16.msra.mxu3 %v8485_v26  ;;  %v8526_v26 = vld [vmem:[%s10794_s17 + $0x7b8] sm:$0xff] }
0x18b3   :  { %v4632_v27 = vmax.f32 %v4482_v7, 0.0  ;;  %v4633_v36 = vmax.f32 %v4496_v58, 0.0 }
0x18b4   :  { %5831 = vmatpush.bf16.msrb.mxu0 %v8491_v55  ;;  %5845 = vmatpush.bf16.msrb.mxu1 %v8499_v6 }
0x18b5   :  { %v4648_v5 = vpack.c.bf16 %v4632_v27, %v4616_v35  ;;  %v4649_v9 = vpack.c.bf16 %v4633_v36, %v4617_v60  ;;  %v4453_v31 = vpop.f32.mrf.mxu2  ;;  %v4467_v28 = vpop.f32.mrf.mxu3  ;;  %v8525_v60 = vld [vmem:[%s10794_s17 + $0x7b0] sm:$0xff] }
0x18b6   :  { %5802 = vmatpush.bf16.msra.mxu2 %v8476_v24  ;;  %5816 = vmatpush.bf16.msra.mxu3 %v8484_v34  ;;  %v4454_v41 = vadd.f32 %v4453_v31, %v4195_v21  ;;  %v4468_v10 = vadd.f32 %v4467_v28, %v4196_v32  ;;  %v8480_v21 = vld [vmem:[%s10794_s17 + $0x648] sm:$0xff]  ;;  %v8533_v27 = vld [vmem:[%s10794_s17 + $0x7f0] sm:$0xff] }
0x18b7   :  { %5780 = vmatmul.bf16.vlgmr.msra.gmra.mxu0 %v4648_v5  ;;  %5794 = vmatmul.bf16.vlgmr.msra.gmra.mxu1 %v4649_v9  ;;  %v8518_v5 = vld [vmem:[%s10794_s17 + $0x778] sm:$0xff] }
0x18b8   :  { %v4630_v48 = vmax.f32 %v4454_v41, 0.0  ;;  %v4631_v49 = vmax.f32 %v4468_v10, 0.0  ;;  %5832 = vmatpush.bf16.msrb.mxu0 %v8490_v8  ;;  %5846 = vmatpush.bf16.msrb.mxu1 %v8498_v23  ;;  %v4535_v50 = vpop.f32.mrf.mxu0  ;;  %v4549_v51 = vpop.f32.mrf.mxu1  ;;  %v8479_v8 = vld [vmem:[%s10794_s17 + $0x640] sm:$0xff]  ;;  %v8510_v23 = vld [vmem:[%s10794_s17 + $0x738] sm:$0xff]  ;;  %v8524_v10 = vld [vmem:[%s10794_s17 + $0x7a8] sm:$0xff] }
0x18b9   :  { %v4536_v12 = vadd.f32 %v4535_v50, %v4201_v62  ;;  %v4550_v22 = vadd.f32 %v4549_v51, %v4202_v0  ;;  %v8523_v51 = vld [vmem:[%s10794_s17 + $0x7a0] sm:$0xff] }
0x18ba   :  { %v4646_v57 = vpack.c.bf16 %v4630_v48, %v4614_v47  ;;  %v4647_v59 = vpack.c.bf16 %v4631_v49, %v4615_v42  ;;  %5803 = vmatpush.bf16.msra.mxu2 %v8475_v43  ;;  %5817 = vmatpush.bf16.msra.mxu3 %v8483_v45  ;;  %v8532_v43 = vld [vmem:[%s10794_s17 + $0x7e8] sm:$0xff]  ;;  %v8509_v42 = vld [vmem:[%s10794_s17 + $0x730] sm:$0xff] }
0x18bb   :  { %v4620_v32 = vmax.f32 %v4536_v12, 0.0  ;;  %v4621_v33 = vmax.f32 %v4550_v22, 0.0  ;;  %v8517_v48 = vld [vmem:[%s10794_s17 + $0x770] sm:$0xff]  ;;  %v8514_v12 = vld [vmem:[%s10794_s17 + $0x758] sm:$0xff]  ;;  %v4205_v22 = vperm.slane %v10531_v46, 6 }
0x18bc   :  { %5833 = vmatpush.bf16.msrb.mxu0 %v8489_v52  ;;  %5847 = vmatpush.bf16.msrb.mxu1 %v8497_v56  ;;  %v8531_v52 = vld [vmem:[%s10794_s17 + $0x7e0] sm:$0xff]  ;;  %v8508_v56 = vld [vmem:[%s10794_s17 + $0x728] sm:$0xff] }
0x18bd   :  { %5752 = vmatmul.bf16.vlgmr.msrb.gmra.mxu2 %v4646_v57  ;;  %5766 = vmatmul.bf16.vlgmr.msrb.gmra.mxu3 %v4647_v59  ;;  %v4507_v3 = vpop.f32.mrf.mxu2  ;;  %v4521_v4 = vpop.f32.mrf.mxu3  ;;  %v8516_v57 = vld [vmem:[%s10794_s17 + $0x768] sm:$0xff]  ;;  %v8522_v59 = vld [vmem:[%s10794_s17 + $0x798] sm:$0xff] }
0x18be   :  { %5804 = vmatpush.bf16.msra.mxu2 %v8474_v61  ;;  %5818 = vmatpush.bf16.msra.mxu3 %v8482_v63  ;;  %v4508_v6 = vadd.f32 %v4507_v3, %v4199_v29  ;;  %v4522_v7 = vadd.f32 %v4521_v4, %v4200_v13  ;;  %v8530_v61 = vld [vmem:[%s10794_s17 + $0x7d8] sm:$0xff]  ;;  %v8529_v3 = vld [vmem:[%s10794_s17 + $0x7d0] sm:$0xff] }
0x18c0   :  { %5834 = vmatpush.bf16.msrb.mxu0 %v8488_v1  ;;  %5848 = vmatpush.bf16.msrb.mxu1 %v8496_v40  ;;  %v4537_v15 = vpop.f32.mrf.mxu0  ;;  %v4551_v16 = vpop.f32.mrf.mxu1  ;;  %v4618_v9 = vmax.f32 %v4508_v6, 0.0  ;;  %v4619_v31 = vmax.f32 %v4522_v7, 0.0  ;;  %v8515_v1 = vld [vmem:[%s10794_s17 + $0x760] sm:$0xff]  ;;  %v8521_v40 = vld [vmem:[%s10794_s17 + $0x790] sm:$0xff]  ;;  %v8504_v7 = vld [vmem:[%s10794_s17 + $0x708] sm:$0xff] }
0x18c1   :  { %v4538_v20 = vadd.f32 %v4537_v15, %v4201_v62  ;;  %v4552_v14 = vadd.f32 %v4551_v16, %v4202_v0  ;;  %v8507_v0 = vld [vmem:[%s10794_s17 + $0x720] sm:$0xff]  ;;  %v8528_v15 = vld [vmem:[%s10794_s17 + $0x7c8] sm:$0xff] }
0x18c2   :  { %5805 = vmatpush.bf16.msra.mxu2 %v8473_v44  ;;  %5819 = vmatpush.bf16.msra.mxu3 %v8481_v11  ;;  %v8506_v11 = vld [vmem:[%s10794_s17 + $0x718] sm:$0xff] }
0x18c3   :  { %v4636_v53 = vmax.f32 %v4538_v20, 0.0  ;;  %v4637_v55 = vmax.f32 %v4552_v14, 0.0  ;;  %v8513_v20 = vld [vmem:[%s10794_s17 + $0x750] sm:$0xff] }
0x18c4   :  { %5835 = vmatpush.bf16.msrb.mxu0 %v8487_v18  ;;  %5849 = vmatpush.bf16.msrb.mxu1 %v8495_v17  ;;  %v8505_v17 = vld [vmem:[%s10794_s17 + $0x710] sm:$0xff] }
0x18c5   :  { %v4652_v58 = vpack.c.bf16 %v4636_v53, %v4620_v32  ;;  %v4653_v24 = vpack.c.bf16 %v4637_v55, %v4621_v33  ;;  %v4509_v34 = vpop.f32.mrf.mxu2  ;;  %v4523_v35 = vpop.f32.mrf.mxu3  ;;  %v8527_v32 = vld [vmem:[%s10794_s17 + $0x7c0] sm:$0xff]  ;;  %v4203_v33 = vperm.slane %v10531_v46, 4  ;;  %v4204_v53 = vperm.slane %v10531_v46, 5 }
0x18c6   :  { %5806 = vmatpush.bf16.msra.mxu2 %v8472_v19  ;;  %5820 = vmatpush.bf16.msra.mxu3 %v8480_v21  ;;  %v4510_v36 = vadd.f32 %v4509_v34, %v4199_v29  ;;  %v4524_v2 = vadd.f32 %v4523_v35, %v4200_v13  ;;  %v4206_v29 = vperm.slane %v10531_v46, 7  ;;  %v8520_v13 = vld [vmem:[%s10794_s17 + $0x788] sm:$0xff]  ;;  %v8519_v21 = vld [vmem:[%s10794_s17 + $0x780] sm:$0xff] }
0x18c7   :  { %5836 = vmatmul.bf16.vlgmr.msrb.gmra.mxu0 %v4652_v58  ;;  %5850 = vmatmul.bf16.vlgmr.msrb.gmra.mxu1 %v4653_v24  ;;  %v8512_v58 = vld [vmem:[%s10794_s17 + $0x748] sm:$0xff] }
0x18c8   :  { %5884 = vmatpush.bf16.msra.mxu0 %v8526_v26  ;;  %5898 = vmatpush.bf16.msra.mxu1 %v8534_v30  ;;  %v4634_v28 = vmax.f32 %v4510_v36, 0.0  ;;  %v4635_v41 = vmax.f32 %v4524_v2, 0.0  ;;  %v4591_v49 = vpop.f32.mrf.mxu0  ;;  %v4605_v50 = vpop.f32.mrf.mxu1 }
0x18c9   :  { %v4592_v14 = vadd.f32 %v4591_v49, %v4205_v22  ;;  %v4606_v26 = vadd.f32 %v4605_v50, %v4206_v29  ;;  %v8573_v50 = vld [vmem:[%s10796_s18 + $0x1] ss:$0 sm:$0xff] }
0x18ca   :  { %v4650_v45 = vpack.c.bf16 %v4634_v28, %v4618_v9  ;;  %v4651_v47 = vpack.c.bf16 %v4635_v41, %v4619_v31  ;;  %5807 = vmatpush.bf16.msra.mxu2 %v8471_v37  ;;  %5821 = vmatpush.bf16.msra.mxu3 %v8479_v8  ;;  %v8503_v37 = vld [vmem:[%s10794_s17 + $0x700] sm:$0xff] }
0x18cb   :  { %v4624_v24 = vmax.f32 %v4592_v14, 0.0  ;;  %v4625_v34 = vmax.f32 %v4606_v26, 0.0  ;;  %v8511_v8 = vld [vmem:[%s10794_s17 + $0x740] sm:$0xff] }
0x18cc   :  { %5885 = vmatpush.bf16.msra.mxu0 %v8525_v60  ;;  %5899 = vmatpush.bf16.msra.mxu1 %v8533_v27 }
0x18cd   :  { %5808 = vmatmul.bf16.vlgmr.msra.gmra.mxu2 %v4650_v45  ;;  %5822 = vmatmul.bf16.vlgmr.msra.gmra.mxu3 %v4651_v47  ;;  %v4563_v63 = vpop.f32.mrf.mxu2  ;;  %v4577_v62 = vpop.f32.mrf.mxu3 }
0x18ce   :  { %5856 = vmatpush.bf16.msrb.mxu2 %v8510_v23  ;;  %5870 = vmatpush.bf16.msrb.mxu3 %v8518_v5  ;;  %v4564_v27 = vadd.f32 %v4563_v63, %v4203_v33  ;;  %v4578_v46 = vadd.f32 %v4577_v62, %v4204_v53 }
0x18d0   :  { %5886 = vmatpush.bf16.msra.mxu0 %v8524_v10  ;;  %5900 = vmatpush.bf16.msra.mxu1 %v8532_v43  ;;  %v4593_v4 = vpop.f32.mrf.mxu0  ;;  %v4607_v44 = vpop.f32.mrf.mxu1  ;;  %v4622_v9 = vmax.f32 %v4564_v27, 0.0  ;;  %v4623_v31 = vmax.f32 %v4578_v46, 0.0 }
0x18d1   :  { %v4594_v16 = vadd.f32 %v4593_v4, %v4205_v22  ;;  %v4608_v18 = vadd.f32 %v4607_v44, %v4206_v29 }
0x18d2   :  { %5857 = vmatpush.bf16.msrb.mxu2 %v8509_v42  ;;  %5871 = vmatpush.bf16.msrb.mxu3 %v8517_v48 }
0x18d3   :  { %v4640_v55 = vmax.f32 %v4594_v16, 0.0  ;;  %v4641_v6 = vmax.f32 %v4608_v18, 0.0 }
0x18d4   :  { %5887 = vmatpush.bf16.msra.mxu0 %v8523_v51  ;;  %5901 = vmatpush.bf16.msra.mxu1 %v8531_v52 }
0x18d5   :  { %v4565_v30 = vpop.f32.mrf.mxu2  ;;  %v4579_v19 = vpop.f32.mrf.mxu3  ;;  %v4656_v36 = vpack.c.bf16 %v4640_v55, %v4624_v24  ;;  %v4657_v2 = vpack.c.bf16 %v4641_v6, %v4625_v34 }
0x18d6   :  { %5858 = vmatpush.bf16.msrb.mxu2 %v8508_v56  ;;  %5872 = vmatpush.bf16.msrb.mxu3 %v8516_v57  ;;  %v4566_v35 = vadd.f32 %v4565_v30, %v4203_v33  ;;  %v4580_v60 = vadd.f32 %v4579_v19, %v4204_v53 }
0x18d8   :  { %5888 = vmatpush.bf16.msra.mxu0 %v8522_v59  ;;  %5902 = vmatpush.bf16.msra.mxu1 %v8530_v61  ;;  %v4638_v23 = vmax.f32 %v4566_v35, 0.0  ;;  %v4639_v5 = vmax.f32 %v4580_v60, 0.0 }
0x18da   :  { %5859 = vmatpush.bf16.msrb.mxu2 %v8507_v0  ;;  %5873 = vmatpush.bf16.msrb.mxu3 %v8515_v1  ;;  %v4654_v28 = vpack.c.bf16 %v4638_v23, %v4622_v9  ;;  %v4655_v41 = vpack.c.bf16 %v4639_v5, %v4623_v31 }
0x18dc   :  { %5889 = vmatpush.bf16.msra.mxu0 %v8521_v40  ;;  %5903 = vmatpush.bf16.msra.mxu1 %v8529_v3 }
0x18de   :  { %5860 = vmatpush.bf16.msrb.mxu2 %v8506_v11  ;;  %5874 = vmatpush.bf16.msrb.mxu3 %v8514_v12 }
0x18e0   :  { %5890 = vmatpush.bf16.msra.mxu0 %v8520_v13  ;;  %5904 = vmatpush.bf16.msra.mxu1 %v8528_v15 }
0x18e2   :  { %5861 = vmatpush.bf16.msrb.mxu2 %v8505_v17  ;;  %5875 = vmatpush.bf16.msrb.mxu3 %v8513_v20 }
0x18e4   :  { %5891 = vmatpush.bf16.msra.mxu0 %v8519_v21  ;;  %5905 = vmatpush.bf16.msra.mxu1 %v8527_v32 }
0x18e6   :  { %5862 = vmatpush.bf16.msrb.mxu2 %v8504_v7  ;;  %5876 = vmatpush.bf16.msrb.mxu3 %v8512_v58 }
0x18e7   :  { %5892 = vmatmul.bf16.vlgmr.msra.gmra.mxu0 %v4656_v36  ;;  %5906 = vmatmul.bf16.vlgmr.msra.gmra.mxu1 %v4657_v2 }
0x18ea   :  { %5863 = vmatpush.bf16.msrb.mxu2 %v8503_v37  ;;  %5877 = vmatpush.bf16.msrb.mxu3 %v8511_v8 }
0x18ed   :  { %5864 = vmatmul.bf16.vlgmr.msrb.gmra.mxu2 %v4654_v28  ;;  %5878 = vmatmul.bf16.vlgmr.msrb.gmra.mxu3 %v4655_v41 }
0x1924   :  { %v5725_v45 = vpop.f32.mrf.mxu0  ;;  %v5739_v47 = vpop.f32.mrf.mxu1 }
0x192c   :  { %v5727_v49 = vpop.f32.mrf.mxu0  ;;  %v5741_v51 = vpop.f32.mrf.mxu1 }
0x1930   :  { %v5697_v10 = vpop.f32.mrf.mxu2  ;;  %v5711_v43 = vpop.f32.mrf.mxu3 }
0x1931   :  { %v5698_v52 = vadd.f32 %v8573_v50, %v5697_v10 }
0x1933   :  { %v5712_v59 = vadd.f32 %v5711_v43, %v5698_v52 }
0x1934   :  { %v5781_v61 = vpop.f32.mrf.mxu0  ;;  %v5795_v63 = vpop.f32.mrf.mxu1 }
0x1935   :  { %v5726_v62 = vadd.f32 %v5725_v45, %v5712_v59 }
0x1937   :  { %v5740_v40 = vadd.f32 %v5739_v47, %v5726_v62 }
0x1938   :  { %v5699_v42 = vpop.f32.mrf.mxu2  ;;  %v5713_v48 = vpop.f32.mrf.mxu3 }
0x1939   :  { %v5700_v0 = vadd.f32 %v8573_v50, %v5699_v42 }
0x193b   :  { %v5714_v1 = vadd.f32 %v5713_v48, %v5700_v0 }
0x193c   :  { %v5783_v11 = vpop.f32.mrf.mxu0  ;;  %v5797_v22 = vpop.f32.mrf.mxu1 }
0x193d   :  { %v5728_v12 = vadd.f32 %v5727_v49, %v5714_v1 }
0x193f   :  { %v5742_v13 = vadd.f32 %v5741_v51, %v5728_v12 }
0x1940   :  { %v5753_v56 = vpop.f32.mrf.mxu2  ;;  %v5767_v57 = vpop.f32.mrf.mxu3 }
0x1941   :  { %v5754_v44 = vadd.f32 %v5753_v56, %v5740_v40  ;;  %v5974_v40 = vld [vmem:[%s10800_s21 + $0x10] sm:$0xff] }
0x1943   :  { %v5768_v29 = vadd.f32 %v5767_v57, %v5754_v44 }
0x1944   :  { %v5837_v20 = vpop.f32.mrf.mxu0  ;;  %v5851_v30 = vpop.f32.mrf.mxu1 }
0x1945   :  { %v5782_v15 = vadd.f32 %v5781_v61, %v5768_v29  ;;  %v6013_v29 = vld [vmem:[%s10801_s23 + $0x10] sm:$0xff] }
0x1947   :  { %v5796_v26 = vadd.f32 %v5795_v63, %v5782_v15 }
0x1948   :  { %v5755_v3 = vpop.f32.mrf.mxu2  ;;  %v5769_v4 = vpop.f32.mrf.mxu3 }
0x1949   :  { %v5756_v16 = vadd.f32 %v5755_v3, %v5742_v13  ;;  %v5973_v3 = vld [vmem:[%s10800_s21 + $0x8] sm:$0xff] }
0x194a   :  { %v6012_v13 = vld [vmem:[%s10801_s23 + $0x8] sm:$0xff] }
0x194b   :  { %v5770_v14 = vadd.f32 %v5769_v4, %v5756_v16  ;;  %v5972_v4 = vld [vmem:[%s10800_s21] sm:$0xff] }
0x194c   :  { %v5839_v6 = vpop.f32.mrf.mxu0  ;;  %v5853_v24 = vpop.f32.mrf.mxu1 }
0x194d   :  { %v5784_v21 = vadd.f32 %v5783_v11, %v5770_v14 }
0x194f   :  { %v5798_v55 = vadd.f32 %v5797_v22, %v5784_v21  ;;  %v6014_v22 = vld [vmem:[%s10801_s23 + $0x18] sm:$0xff] }
0x1950   :  { %v5809_v18 = vpop.f32.mrf.mxu2  ;;  %v5823_v17 = vpop.f32.mrf.mxu3  ;;  %6037 = vmatpush.msra.mxu3 %v6014_v22 }
0x1951   :  { %v5810_v19 = vadd.f32 %v5809_v18, %v5796_v26 }
0x1952   :  { %6038 = vmatpush.msra.mxu3 %v6013_v29 }
0x1953   :  { %v5824_v32 = vadd.f32 %v5823_v17, %v5810_v19 }
0x1954   :  { %6039 = vmatpush.msra.mxu3 %v6012_v13 }
0x1955   :  { %v5838_v7 = vadd.f32 %v5837_v20, %v5824_v32 }
0x1957   :  { %v5852_v35 = vadd.f32 %v5851_v30, %v5838_v7 }
0x1958   :  { %v5811_v33 = vpop.f32.mrf.mxu2  ;;  %v5825_v53 = vpop.f32.mrf.mxu3 }
0x1959   :  { %v5812_v58 = vadd.f32 %v5811_v33, %v5798_v55  ;;  %v8574_v33 = vld [vmem:[%s10797_s19 + $0x1] ss:$0 sm:$0xff] }
0x195a   :  { %v8575_v55 = vld [vmem:[%s10798_s20 + $0x1] ss:$0 sm:$0xff] }
0x195b   :  { %v5826_v34 = vadd.f32 %v5825_v53, %v5812_v58 }
0x195d   :  { %v5840_v2 = vadd.f32 %v5839_v6, %v5826_v34 }
0x195f   :  { %v5854_v5 = vadd.f32 %v5853_v24, %v5840_v2  ;;  %v6011_v2 = vld [vmem:[%s10801_s23] sm:$0xff] }
0x1960   :  { %6040 = vmatpush.msra.mxu3 %v6011_v2 }
0x1964   :  { %v5893_v36 = vpop.f32.mrf.mxu0  ;;  %v5907_v8 = vpop.f32.mrf.mxu1 }
0x196c   :  { %v5895_v47 = vpop.f32.mrf.mxu0  ;;  %v5909_v48 = vpop.f32.mrf.mxu1 }
0x1970   :  { %v5865_v60 = vpop.f32.mrf.mxu2  ;;  %v5879_v27 = vpop.f32.mrf.mxu3 }
0x1971   :  { %v5866_v46 = vadd.f32 %v5865_v60, %v5852_v35 }
0x1973   :  { %v5880_v37 = vadd.f32 %v5879_v27, %v5866_v46 }
0x1975   :  { %v5894_v23 = vadd.f32 %v5893_v36, %v5880_v37  ;;  %v8576_v37 = vld [vmem:[%s10799_s22] ss:$0 sm:$0xff] }
0x1977   :  { %v5908_v9 = vadd.f32 %v5907_v8, %v5894_v23 }
0x1978   :  { %v5867_v31 = vpop.f32.mrf.mxu2  ;;  %v5881_v10 = vpop.f32.mrf.mxu3 }
0x1979   :  { %v5868_v28 = vadd.f32 %v5867_v31, %v5854_v5  ;;  %v5912_v41 = vadd.f32 %v5908_v9, %v10148_v38 }
0x197b   :  { %v5882_v43 = vadd.f32 %v5881_v10, %v5868_v28  ;;  %v5918_v45 = vsel %vm183_vm2, %v5912_v41, 0.0 }
0x197c   :  { %5919 = vadd.xlane.f32.xlu2 %v5918_v45 }
0x197d   :  { %v5896_v42 = vadd.f32 %v5895_v47, %v5882_v43  ;;  %v6090_v43 = vld [vmem:[%s10853_s25] sm:$0xff] }
0x197f   :  { %v5910_v49 = vadd.f32 %v5909_v48, %v5896_v42 }
0x1981   :  { %v5913_v50 = vadd.f32 %v5910_v49, %v10150_v39  ;;  %v5975_v39 = vld [vmem:[%s10800_s21 + $0x18] sm:$0xff] }
0x1982   :  { %5998 = vmatpush.msra.mxu2 %v5975_v39 }
0x1983   :  { %v5921_v51 = vsel %vm183_vm2, %v5913_v50, 0.0 }
0x1984   :  { %5922 = vadd.xlane.f32.xlu0 %v5921_v51  ;;  %5999 = vmatpush.msra.mxu2 %v5974_v40 }
0x1986   :  { %6000 = vmatpush.msra.mxu2 %v5973_v3 }
0x1988   :  { %6001 = vmatpush.msra.mxu2 %v5972_v4 }
0x19ef   :  { %v5920_v52 = vpop.xlane.xlu2 %5919 }
0x19f0   :  { %v5924_v56 = vmul.f32 %v5920_v52, %v9090_v25 }
0x19f2   :  { %v5926_v57 = vsub.f32 %v5912_v41, %v5924_v56  ;;  %v8577_v41 = vld [vmem:[%s10852_s26] ss:$0 sm:$0xff] }
0x19f4   :  { %v5928_v59 = vmul.f32 %v5926_v57, %v5926_v57 }
0x19f6   :  { %v5930_v38 = vsel %vm183_vm2, %v5928_v59, 0.0 }
0x19f7   :  { %v5923_v61 = vpop.xlane.xlu0 %5922  ;;  %5931 = vadd.xlane.f32.xlu1 %v5930_v38 }
0x19f8   :  { %v5925_v63 = vmul.f32 %v5923_v61, %v9090_v25 }
0x19fa   :  { %v5927_v62 = vsub.f32 %v5913_v50, %v5925_v63  ;;  %v6091_v50 = vld [vmem:[%s10853_s25 + $0x8] sm:$0xff] }
0x19fc   :  { %v5929_v0 = vmul.f32 %v5927_v62, %v5927_v62 }
0x19fe   :  { %v5933_v1 = vsel %vm183_vm2, %v5929_v0, 0.0 }
0x19ff   :  { %5934 = vadd.xlane.f32.xlu2 %v5933_v1 }
0x1a6a   :  { %v5932_v44 = vpop.xlane.xlu1 %5931 }
0x1a6b   :  { %v5936_v11 = vmul.f32 %v5932_v44, %v9090_v25 }
0x1a6d   :  { %v5938_v12 = vadd.f32 1e-05, %v5936_v11 }
0x1a6f   :  { %8656 = vrsqrt.f32 %v5938_v12  ;;  %vm5946_vm1 = vweird.f32 %v5938_v12 }
0x1a72   :  { %v5935_v15 = vpop.xlane.xlu2 %5934 }
0x1a73   :  { %v5937_v16 = vmul.f32 %v5935_v15, %v9090_v25 }
0x1a75   :  { %v8657_v18 = vpop.eup %8656  ;;  %v5939_v17 = vadd.f32 1e-05, %v5937_v16 }
0x1a76   :  { %v5941_v20 = vmul.f32 %v8657_v18, %v5938_v12  ;;  %vm5947_vm15 = vweird.f32 %v8657_v18 }
0x1a77   :  { %8658 = vrsqrt.f32 %v5939_v17  ;;  %vm5948_vm4 = vmor %vm5946_vm1, %vm5947_vm15  ;;  %vm5956_vm7 = vweird.f32 %v5939_v17 }
0x1a78   :  { %v5942_v14 = vmul.f32 %v8657_v18, %v5941_v20 }
0x1a7a   :  { %v5943_v26 = vmul.f32 0.5, %v5942_v14 }
0x1a7c   :  { %v5944_v30 = vsub.f32 1.5, %v5943_v26 }
0x1a7d   :  { %v8659_v19 = vpop.eup %8658 }
0x1a7e   :  { %v5945_v21 = vmul.f32 %v8657_v18, %v5944_v30  ;;  %v5951_v32 = vmul.f32 %v8659_v19, %v5939_v17  ;;  %vm5957_vm6 = vweird.f32 %v8659_v19 }
0x1a7f   :  { %vm5958_vm8 = vmor %vm5956_vm7, %vm5957_vm6 }
0x1a80   :  { %v5949_v53 = vsel %vm5948_vm4, %v8657_v18, %v5945_v21  ;;  %v5952_v25 = vmul.f32 %v8659_v19, %v5951_v32 }
0x1a81   :  { %v5960_v6 = vmul.f32 %v5949_v53, %v5926_v57 }
0x1a82   :  { %v5953_v7 = vmul.f32 0.5, %v5952_v25 }
0x1a83   :  { %v5965_v58 = vmul.f32 %v8574_v33, %v5960_v6 }
0x1a84   :  { %v5954_v24 = vsub.f32 1.5, %v5953_v7 }
0x1a85   :  { %v5970_v34 = vadd.f32 %v8575_v55, %v5965_v58 }
0x1a86   :  { %v5955_v35 = vmul.f32 %v8659_v19, %v5954_v24 }
0x1a87   :  { %8161 = vmatmul.msk.f32.vlgmr.msra.gmra.mxu2 %vm183_vm2, %v5970_v34 }
0x1a88   :  { %v5959_v60 = vsel %vm5958_vm8, %v8659_v19, %v5955_v35 }
0x1a89   :  { %v5961_v27 = vmul.f32 %v5959_v60, %v5927_v62 }
0x1a8b   :  { %v5966_v46 = vmul.f32 %v8574_v33, %v5961_v27 }
0x1a8d   :  { %v5971_v36 = vadd.f32 %v8575_v55, %v5966_v46 }
0x1a8f   :  { %8162 = vmatmul.msk.f32.gmra.mxu2 %vm183_vm2, %v5971_v36 }
0x1b0a   :  { %v6003_v8 = vpop.f32.mrf.mxu2 }
0x1b0b   :  { %v6004_v23 = vadd.f32 %v8576_v37, %v6003_v8 }
0x1b0d   :  { %v6009_v5 = vmax.f32 %v6004_v23, 0.0 }
0x1b0f   :  { %8163 = vmatmul.msk.f32.vlgmr.msra.gmra.mxu3 %vm183_vm2, %v6009_v5 }
0x1b12   :  { %v6006_v9 = vpop.f32.mrf.mxu2 }
0x1b13   :  { %v6007_v31 = vadd.f32 %v8576_v37, %v6006_v9 }
0x1b15   :  { %v6010_v28 = vmax.f32 %v6007_v31, 0.0 }
0x1b17   :  { %8164 = vmatmul.msk.f32.gmra.mxu3 %vm183_vm2, %v6010_v28 }
0x1b92   :  { %v6042_v10 = vpop.f32.mrf.mxu3 }
0x1b93   :  { %v6043_v45 = vadd.f32 %v8577_v41, %v6042_v10 }
0x1b95   :  { %v6049_v47 = vsel %vm6048_vm9, %v6043_v45, -inf  ;;  %v6092_v42 = vadd.f32 %v6090_v43, %v6043_v45 }
0x1b96   :  { %6050 = vmax.xlane.f32.xlu2 %v6049_v47 }
0x1b97   :  { %v6094_v48 = vsel %vm6048_vm9, %v6092_v42, -inf }
0x1b98   :  { %6095 = vmax.xlane.f32.xlu0 %v6094_v48 }
0x1b9a   :  { %v6045_v49 = vpop.f32.mrf.mxu3 }
0x1b9b   :  { %v6046_v51 = vadd.f32 %v8577_v41, %v6045_v49  ;;  %v8674_v41 = vmov 0.0  }
0x1b9d   :  { %v6093_v52 = vadd.f32 %v6091_v50, %v6046_v51  ;;  %v6052_v57 = vsel %vm6048_vm9, %v6046_v51, -inf }
0x1b9f   :  { %v6097_v56 = vsel %vm6048_vm9, %v6093_v52, -inf }
0x1ba0   :  { %6098 = vmax.xlane.f32.xlu1 %v6097_v56  ;;  %6053 = vmax.xlane.f32.xlu0 %v6052_v57 }
0x1c09   :  { %v6051_v59 = vpop.xlane.xlu2 %6050 }
0x1c0a   :  { %v6055_v38 = vsub.f32 %v6043_v45, %v6051_v59 }
0x1c0b   :  { %v6096_v61 = vpop.xlane.xlu0 %6095 }
0x1c0c   :  { %v6057_v63 = vmul.f32 1.442695, %v6055_v38  ;;  %vm6100_vm2 = vcmp.ge.f32.partialorder %v6092_v42, %v6096_v61 }
0x1c0d   :  { %v6102_v62 = vsel %vm6100_vm2, %v8924_v54, 2 }
0x1c0e   :  { %8660 = vpow2.f32 %v6057_v63  ;;  %v6104_v0 = vsel %vm6048_vm9, %v6102_v62, 2147483647 }
0x1c0f   :  { %v6106_v1 = vshra.s32 %v6104_v0, 16  ;;  %v6105_v17 = vand.u32 65535, %v6104_v0 }
0x1c11   :  { %v6108_v39 = vcvt.s32.f32 %v6106_v1  ;;  %v6107_v14 = vcvt.s32.f32 %v6105_v17 }
0x1c13   :  { %6109 = vmin.xlane.f32.xlu1 %v6108_v39  ;;  %v6099_v40 = vpop.xlane.xlu1 %6098  ;;  %v6054_v3 = vpop.xlane.xlu0 %6053 }
0x1c14   :  { %v8661_v4 = vpop.eup %8660  ;;  %vm6101_vm10 = vcmp.ge.f32.partialorder %v6093_v52, %v6099_v40  ;;  %v6056_v44 = vsub.f32 %v6046_v51, %v6054_v3 }
0x1c15   :  { %v6103_v11 = vsel %vm6101_vm10, %v8924_v54, 2  ;;  %v6061_v12 = vsel %vm6048_vm9, %v8661_v4, 0.0 }
0x1c16   :  { %v6119_v22 = vsel %vm6048_vm9, %v6103_v11, 2147483647  ;;  %v6059_v29 = vmul.f32 1.442695, %v6056_v44  ;;  %6062 = vadd.xlane.f32.xlu0 %v6061_v12 }
0x1c17   :  { %v6121_v13 = vshra.s32 %v6119_v22, 16  ;;  %v6120_v19 = vand.u32 65535, %v6119_v22 }
0x1c18   :  { %8662 = vpow2.f32 %v6059_v29 }
0x1c19   :  { %v6123_v15 = vcvt.s32.f32 %v6121_v13  ;;  %v6122_v32 = vcvt.s32.f32 %v6120_v19 }
0x1c1b   :  { %6124 = vmin.xlane.f32.xlu2 %v6123_v15 }
0x1c1e   :  { %v8663_v16 = vpop.eup %8662 }
0x1c1f   :  { %v6064_v18 = vsel %vm6048_vm9, %v8663_v16, 0.0 }
0x1c20   :  { %6065 = vadd.xlane.f32.xlu1 %v6064_v18 }
0x1c86   :  { %v6110_v20 = vpop.xlane.xlu1 %6109 }
0x1c87   :  { %vm6111_vm11 = vcmp.eq.f32.partialorder %v6108_v39, %v6110_v20  ;;  %v6116_v8 = vcvt.f32.s32 %v6110_v20 }
0x1c88   :  { %v6112_v26 = vsel %vm6111_vm11, %v6107_v14, inf }
0x1c89   :  { %6113 = vmin.xlane.f32.xlu2 %v6112_v26  ;;  %v6063_v30 = vpop.xlane.xlu0 %6062  ;;  %v6117_v5 = vshll.u32 %v6116_v8, 16 }
0x1c8a   :  { %8664 = vlog2.f32 %v6063_v30 }
0x1c8e   :  { %v6125_v21 = vpop.xlane.xlu2 %6124 }
0x1c8f   :  { %vm6126_vm0 = vcmp.eq.f32.partialorder %v6123_v15, %v6125_v21  ;;  %v6131_v28 = vcvt.f32.s32 %v6125_v21 }
0x1c90   :  { %v8665_v33 = vpop.eup %8664  ;;  %v6127_v53 = vsel %vm6126_vm0, %v6122_v32, inf }
0x1c91   :  { %v6068_v25 = vmul.f32 0.6931472, %v8665_v33  ;;  %6128 = vmin.xlane.f32.xlu0 %v6127_v53  ;;  %v6132_v47 = vshll.u32 %v6131_v28, 16 }
0x1c93   :  { %v6071_v55 = vsub.f32 %v6055_v38, %v6068_v25  ;;  %v6066_v6 = vpop.xlane.xlu1 %6065 }
0x1c94   :  { %8666 = vlog2.f32 %v6066_v6 }
0x1c95   :  { %v6073_v7 = vmul.f32 1.442695, %v6071_v55 }
0x1c97   :  { %8668 = vpow2.f32 %v6073_v7 }
0x1c9a   :  { %v8667_v58 = vpop.eup %8666 }
0x1c9b   :  { %v6070_v24 = vmul.f32 0.6931472, %v8667_v58 }
0x1c9d   :  { %v8669_v34 = vpop.eup %8668  ;;  %v6072_v35 = vsub.f32 %v6056_v44, %v6070_v24 }
0x1c9e   :  { %v6077_v60 = vmul.f32 %v8669_v34, %v6071_v55 }
0x1c9f   :  { %v6075_v27 = vmul.f32 1.442695, %v6072_v35 }
0x1ca0   :  { %v6079_v46 = vsel %vm6048_vm9, %v6077_v60, 0.0 }
0x1ca1   :  { %8670 = vpow2.f32 %v6075_v27  ;;  %6080 = vadd.xlane.f32.xlu1 %v6079_v46 }
0x1ca7   :  { %v8671_v36 = vpop.eup %8670 }
0x1ca8   :  { %v6078_v2 = vmul.f32 %v8671_v36, %v6072_v35 }
0x1caa   :  { %v6082_v37 = vsel %vm6048_vm9, %v6078_v2, 0.0 }
0x1cab   :  { %6083 = vadd.xlane.f32.xlu2 %v6082_v37 }
0x1cfc   :  { %v6114_v23 = vpop.xlane.xlu2 %6113 }
0x1cfd   :  { %v6115_v9 = vcvt.f32.s32 %v6114_v23 }
0x1cff   :  { %v6118_v31 = vadd.s32 %v6117_v5, %v6115_v9 }
0x1d01   :  { %6134 = vst.msk [vmem:[%s10854_s27] sm:$0xff] %vm6087_vm3, %v6118_v31  ;;  %vm6136_vm5 = vcmp.eq.s32.totalorder %v8924_v54, %v6118_v31 }
0x1d02   :  { %v8165_v10 = vsel %vm6136_vm5, 1.0, %v8674_v41 }
0x1d03   :  { %v6142_v43 = vmul.f32 %v8165_v10, %v6071_v55 }
0x1d04   :  { %v6129_v45 = vpop.xlane.xlu0 %6128 }
0x1d05   :  { %v6130_v42 = vcvt.f32.s32 %v6129_v45  ;;  %v6144_v48 = vsel %vm6048_vm9, %v6142_v43, 0.0 }
0x1d06   :  { %6145 = vadd.xlane.f32.xlu0 %v6144_v48 }
0x1d07   :  { %v6133_v49 = vadd.s32 %v6132_v47, %v6130_v42 }
0x1d09   :  { %6135 = vst.msk [vmem:[%s10854_s27 + $0x8] sm:$0xff] %vm6087_vm3, %v6133_v49  ;;  %vm6137_vm12 = vcmp.eq.s32.totalorder %v8924_v54, %v6133_v49 }
0x1d0a   :  { %v8166_v50 = vsel %vm6137_vm12, 1.0, %v8674_v41 }
0x1d0b   :  { %v6143_v51 = vmul.f32 %v8166_v50, %v6072_v35 }
0x1d0d   :  { %v6147_v52 = vsel %vm6048_vm9, %v6143_v51, 0.0 }
0x1d0e   :  { %6148 = vadd.xlane.f32.xlu1 %v6147_v52 }
0x1d14   :  { %v6081_v56 = vpop.xlane.xlu1 %6080 }
0x1d15   :  { %v6085_v57 = vsub.f32 0.0, %v6081_v56 }
0x1d17   :  { %6088 = vst.msk [vmem:[%s10855_s11] sm:$0xff] %vm6087_vm3, %v6085_v57 }
0x1d1e   :  { %v6084_v59 = vpop.xlane.xlu2 %6083 }
0x1d1f   :  { %v6086_v38 = vsub.f32 0.0, %v6084_v59 }
0x1d21   :  { %6089 = vst.msk [vmem:[%s10855_s11 + $0x8] sm:$0xff] %vm6087_vm3, %v6086_v38 }
0x1d79   :  { %v6146_v54 = vpop.xlane.xlu0 %6145 }
0x1d7a   :  { %6150 = vst.msk [vmem:[%s10856_s9] sm:$0xff] %vm6087_vm3, %v6146_v54 }
0x1d81   :  { %v6149_v61 = vpop.xlane.xlu1 %6148 }
0x1d82   :  { %6151 = vst.msk [vmem:[%s10856_s9 + $0x8] sm:$0xff] %vm6087_vm3, %v6149_v61 }

</bundles_post_ra>
